<compile_context>
chip_gen: v5e
topology: v5e:2x2
jax: 0.10.0
libtpu: 0.0.40
codegen_flags: <defaults>
</compile_context>

<pallas_src>
import functools
import math

import jax
import jax.numpy as jnp
from jax.experimental import pallas as pl
from jax.experimental.pallas import tpu as pltpu


# ---------------------------------------------------------------------------
# helpers (used in-kernel and by the pure-JAX reference)
# ---------------------------------------------------------------------------
def _gelu_exact(x):
    # matches torch.nn.GELU() default (erf form)
    return 0.5 * x * (1.0 + jax.lax.erf(x * (1.0 / math.sqrt(2.0))))


def _layernorm(x, gamma, beta, eps=1e-5):
    mean = jnp.mean(x, axis=-1, keepdims=True)
    var = jnp.mean(jnp.square(x - mean), axis=-1, keepdims=True)
    return (x - mean) * jax.lax.rsqrt(var + eps) * gamma + beta


# ---------------------------------------------------------------------------
# Pallas kernel: each grid step processes G windows (M = G*N token rows)
# ---------------------------------------------------------------------------
def _window_block_kernel(x_ref, wqkv_ref, bqkv_ref, wproj_ref, bproj_ref,
                         rpb_ref, ga_ref, ba_ref, w1_ref, b1_ref,
                         w2_ref, b2_ref, gm_ref, bm_ref,
                         o_ref,
                         *, heads, windows, window_len, head_dim, mm_dtype):
    N, hd, G = window_len, head_dim, windows
    P = heads * hd

    x = x_ref[...]                                   # (M, C) f32 (residual path)
    M, C = x.shape
    x_mm = x.astype(mm_dtype)                        # bf16 operand for matmuls

    # ---- fused QKV projection: ONE (M, C) @ (C, 3P) MXU dispatch ----
    # 1/sqrt(hd) is already folded into the Q columns of wqkv / bqkv.
    qkv = jnp.dot(x_mm, wqkv_ref[...],
                  preferred_element_type=jnp.float32) + bqkv_ref[...]   # (M, 3P) f32

    rpb = rpb_ref[...]                               # (heads, N, N) f32

    # ---- attention: batched over windows (dot_general batch dim), short
    # static loop over heads (16-lane static slices, sublane-only reshapes) ----
    head_out = []
    for h in range(heads):
        qh = qkv[:, h * hd:(h + 1) * hd].astype(mm_dtype).reshape(G, N, hd)
        kh = qkv[:, P + h * hd:P + (h + 1) * hd].astype(mm_dtype).reshape(G, N, hd)
        vh = qkv[:, 2 * P + h * hd:2 * P + (h + 1) * hd].astype(mm_dtype).reshape(G, N, hd)

        # scores (G, N, N) with relative-position bias (same bias every window)
        s = jax.lax.dot_general(qh, kh, (((2,), (2,)), ((0,), (0,))),
                                preferred_element_type=jnp.float32)
        s = s + rpb[h][None]
        s_max = jnp.max(s, axis=-1, keepdims=True)
        e = jnp.exp(s - s_max)
        denom = jnp.sum(e, axis=-1, keepdims=True)
        p = (e * pl.reciprocal(denom, approx=True)).astype(mm_dtype)

        # P @ V -> (G, N, hd) -> (M, hd)   (leading-dim merge, no lane movement)
        oh = jax.lax.dot_general(p, vh, (((2,), (1,)), ((0,), (0,))),
                                 preferred_element_type=jnp.float32)
        head_out.append(oh.reshape(M, hd))

    # lane-concat heads -> (M, P); head order matches wproj's (heads, hd) rows
    o_heads = jnp.concatenate(head_out, axis=-1)

    # ---- output projection with the head-sum folded into the K=P contraction ----
    attn = jnp.dot(o_heads.astype(mm_dtype), wproj_ref[...],
                   preferred_element_type=jnp.float32) + bproj_ref[...]  # (M, C)

    # post-norm, drop_path(identity at eval), residual
    y = _layernorm(attn, ga_ref[...], ba_ref[...]) + x

    # FeedForwardNetwork: Linear -> GELU -> Linear, post-norm, residual
    h1 = jnp.dot(y.astype(mm_dtype), w1_ref[...],
                 preferred_element_type=jnp.float32) + b1_ref[...]
    h1 = _gelu_exact(h1)
    z = jnp.dot(h1.astype(mm_dtype), w2_ref[...],
                preferred_element_type=jnp.float32) + b2_ref[...]
    z = _layernorm(z, gm_ref[...], bm_ref[...]) + y

    o_ref[...] = z.astype(o_ref.dtype)


# ---------------------------------------------------------------------------
# Glue: parameters, relative position bias, window partition, pallas_call
# ---------------------------------------------------------------------------
def make_params(key, embedding_dim, projection_dim, heads, mlp_ratio, kernel_size):
    C, P = embedding_dim, projection_dim
    hidden = C * mlp_ratio
    kh, kw = kernel_size
    ks = jax.random.split(key, 8)
    n = lambda k, s: (jax.random.normal(k, s, jnp.float32) * 0.02)
    return dict(
        wqkv=n(ks[0], (C, 3 * P)), bqkv=jnp.zeros((1, 3 * P), jnp.float32),
        wproj=n(ks[1], (P, C)), bproj=jnp.zeros((1, C), jnp.float32),
        rpb_table=n(ks[2], ((2 * kh - 1) * (2 * kw - 1), heads)),
        ga=jnp.ones((1, C), jnp.float32), ba=jnp.zeros((1, C), jnp.float32),
        w1=n(ks[3], (C, hidden)), b1=jnp.zeros((1, hidden), jnp.float32),
        w2=n(ks[4], (hidden, C)), b2=jnp.zeros((1, C), jnp.float32),
        gm=jnp.ones((1, C), jnp.float32), bm=jnp.zeros((1, C), jnp.float32),
    )


def relative_position_bias(table, kernel_size, heads):
    # Swin-style BiasEncoder: (heads, N, N) additive bias.
    kh, kw = kernel_size
    coords = jnp.stack(jnp.meshgrid(jnp.arange(kh), jnp.arange(kw), indexing="ij"))
    coords = coords.reshape(2, -1)                                  # (2, N)
    rel = coords[:, :, None] - coords[:, None, :]                   # (2, N, N)
    rel = rel.at[0].add(kh - 1)
    rel = rel.at[1].add(kw - 1)
    idx = rel[0] * (2 * kw - 1) + rel[1]                            # (N, N)
    N = kh * kw
    bias = table[idx.reshape(-1)].reshape(N, N, heads)
    return jnp.transpose(bias, (2, 0, 1)).astype(jnp.float32)       # (heads, N, N)


def _choose_group(nwin, window_len, target_rows=1024, min_steps=4):
    # Batch windows so each grid step carries up to ~target_rows token rows
    # (grid is a serial loop on v5e/v6e), but keep >= min_steps grid steps so
    # each v7x TensorCore still gets >1 iteration and can pipeline block DMA.
    g = max(1, min(nwin, target_rows // max(window_len, 1)))
    if nwin >= min_steps:
        g = min(g, max(1, nwin // min_steps))
    while g > 1 and nwin % g:
        g -= 1
    return g


def window_attention_block(x, params, kernel_size, heads, mm_dtype=jnp.bfloat16):
    B, H, W, C = x.shape
    kh, kw = kernel_size
    N = kh * kw
    nh, nw = H // kh, W // kw

    # Batch2d partition: (B, H, W, C) -> (B*num_windows*N, C)
    xw = x.reshape(B, nh, kh, nw, kw, C).transpose(0, 1, 3, 2, 4, 5).reshape(-1, N, C)
    nwin = xw.shape[0]
    x2d = xw.reshape(nwin * N, C).astype(jnp.float32)

    P = params["wproj"].shape[0]
    hd = P // heads
    scale = 1.0 / math.sqrt(hd)

    # Fold the 1/sqrt(hd) softmax scale into the Q columns (weight + bias);
    # keep wqkv lane-dense as (C, 3P) bf16.
    col_scale = jnp.concatenate([jnp.full((P,), scale, jnp.float32),
                                 jnp.ones((2 * P,), jnp.float32)])
    wqkv = (params["wqkv"] * col_scale[None, :]).astype(mm_dtype)      # (C, 3P)
    bqkv = (params["bqkv"] * col_scale[None, :]).astype(jnp.float32)   # (1, 3P)
    wproj = params["wproj"].astype(mm_dtype)                           # (P, C)
    rpb = relative_position_bias(params["rpb_table"], kernel_size, heads)

    G = _choose_group(nwin, N)
    steps = nwin // G
    M = G * N

    weight_args = (wqkv, bqkv, wproj, params["bproj"], rpb,
                   params["ga"], params["ba"],
                   params["w1"].astype(mm_dtype), params["b1"],
                   params["w2"].astype(mm_dtype), params["b2"],
                   params["gm"], params["bm"])

    def full_spec(a):
        nd = a.ndim
        return pl.BlockSpec(a.shape, lambda i, _nd=nd: (0,) * _nd)

    kernel = functools.partial(_window_block_kernel, heads=heads, windows=G,
                               window_len=N, head_dim=hd, mm_dtype=mm_dtype)

    # NOTE on lane density: the (M, C=32) output block stores with masked lanes
    # but only ~M/8 vst per step, and the HBM-side DMA of the block is a single
    # contiguous M*C*4-byte run -> the store is not on the critical path here.
    out2d = pl.pallas_call(
        kernel,
        out_shape=jax.ShapeDtypeStruct((nwin * N, C), jnp.float32),
        grid=(steps,),
        in_specs=[pl.BlockSpec((M, C), lambda i: (i, 0))]
                 + [full_spec(a) for a in weight_args],
        out_specs=pl.BlockSpec((M, C), lambda i: (i, 0)),
        compiler_params=pltpu.CompilerParams(
            dimension_semantics=("parallel",),
            vmem_limit_bytes=32 * 1024 * 1024),
    )(x2d, *weight_args)

    # reverse partition: (B*num_windows*N, C) -> (B, H, W, C)
    out = (out2d.reshape(B, nh, nw, kh, kw, C)
           .transpose(0, 1, 3, 2, 4, 5).reshape(B, H, W, C))
    return out.astype(x.dtype)


# ---------------------------------------------------------------------------
# Pure-JAX reference (same bf16-operand / f32-statistics policy) for checking
# ---------------------------------------------------------------------------
def _reference_forward(x, params, kernel_size, heads, mm_dtype=jnp.bfloat16):
    B, H, W, C = x.shape
    kh, kw = kernel_size
    N = kh * kw
    nh, nw = H // kh, W // kw
    xw = (x.reshape(B, nh, kh, nw, kw, C).transpose(0, 1, 3, 2, 4, 5)
          .reshape(-1, N, C)).astype(jnp.float32)
    P = params["wproj"].shape[0]
    hd = P // heads
    rpb = relative_position_bias(params["rpb_table"], kernel_size, heads)

    qkv = jnp.einsum("wnc,cp->wnp", xw.astype(mm_dtype),
                     params["wqkv"].astype(mm_dtype),
                     preferred_element_type=jnp.float32) + params["bqkv"]
    q, k, v = qkv[..., :P], qkv[..., P:2 * P], qkv[..., 2 * P:]
    split = lambda t: t.reshape(-1, N, heads, hd).transpose(0, 2, 1, 3)
    q = split(q) * (1.0 / math.sqrt(hd))
    k = split(k)
    v = split(v)
    s = jnp.einsum("whqd,whkd->whqk", q.astype(mm_dtype), k.astype(mm_dtype),
                   preferred_element_type=jnp.float32) + rpb[None]
    p = jax.nn.softmax(s, axis=-1)
    o = jnp.einsum("whqk,whkd->whqd", p.astype(mm_dtype), v.astype(mm_dtype),
                   preferred_element_type=jnp.float32)
    o = o.transpose(0, 2, 1, 3).reshape(-1, N, P)
    attn = jnp.einsum("wnp,pc->wnc", o.astype(mm_dtype),
                      params["wproj"].astype(mm_dtype),
                      preferred_element_type=jnp.float32) + params["bproj"]
    y = _layernorm(attn, params["ga"], params["ba"]) + xw
    h1 = jnp.einsum("wnc,ch->wnh", y.astype(mm_dtype),
                    params["w1"].astype(mm_dtype),
                    preferred_element_type=jnp.float32) + params["b1"]
    h1 = _gelu_exact(h1)
    z = jnp.einsum("wnh,hc->wnc", h1.astype(mm_dtype),
                   params["w2"].astype(mm_dtype),
                   preferred_element_type=jnp.float32) + params["b2"]
    z = _layernorm(z, params["gm"], params["bm"]) + y
    out = (z.reshape(B, nh, nw, kh, kw, C).transpose(0, 1, 3, 2, 4, 5)
           .reshape(B, H, W, C))
    return out.astype(x.dtype)


# ---------------------------------------------------------------------------
if __name__ == "__main__":
    # volume_size=(16, 16), kernel_size=(8, 8), embedding_dim=32,
    # projection_dim=64, heads=4, mlp_ratio=3, shifted=False, eval mode.
    B, H, W = 2, 16, 16
    embedding_dim = 32
    projection_dim = 64
    heads = 4
    mlp_ratio = 3
    kernel_size = (8, 8)

    key = jax.random.PRNGKey(0)
    kx, kp = jax.random.split(key)
    x = jax.random.normal(kx, (B, H, W, embedding_dim), jnp.float32)
    params = make_params(kp, embedding_dim, projection_dim, heads, mlp_ratio, kernel_size)

    out = jax.block_until_ready(window_attention_block(x, params, kernel_size, heads))
    assert out.shape == (B, H, W, embedding_dim)
    assert bool(jnp.all(jnp.isfinite(out)))

    ref = jax.block_until_ready(_reference_forward(x, params, kernel_size, heads))
    assert float(jnp.max(jnp.abs(out - ref))) < 5e-2

    print("KERNEL_OK")
</pallas_src>

<mosaic_0001>
module attributes {stable_mosaic.version = 11 : i64} {
  func.func @_window_block_kernel(%arg0: i32, %arg1: memref<128x32xf32, #tpu.memory_space<vmem>>, %arg2: memref<32x192xbf16, #tpu.memory_space<vmem>>, %arg3: memref<1x192xf32, #tpu.memory_space<vmem>>, %arg4: memref<64x32xbf16, #tpu.memory_space<vmem>>, %arg5: memref<1x32xf32, #tpu.memory_space<vmem>>, %arg6: memref<4x64x64xf32, #tpu.memory_space<vmem>>, %arg7: memref<1x32xf32, #tpu.memory_space<vmem>>, %arg8: memref<1x32xf32, #tpu.memory_space<vmem>>, %arg9: memref<32x96xbf16, #tpu.memory_space<vmem>>, %arg10: memref<1x96xf32, #tpu.memory_space<vmem>>, %arg11: memref<96x32xbf16, #tpu.memory_space<vmem>>, %arg12: memref<1x32xf32, #tpu.memory_space<vmem>>, %arg13: memref<1x32xf32, #tpu.memory_space<vmem>>, %arg14: memref<1x32xf32, #tpu.memory_space<vmem>>, %arg15: memref<128x32xf32, #tpu.memory_space<vmem>>) attributes {dimension_semantics = [#tpu.dimension_semantics<parallel>], iteration_bounds = array<i64: 4>, scalar_prefetch = 0 : i64, scratch_operands = 0 : i64, tpu.core_type = #tpu.core_type<tc>, window_params = [{transform_indices = @transform_0, window_bounds = array<i64: 128, 32>}, {pipeline_mode = #tpu.pipeline_mode<synchronous>, transform_indices = @transform_1, window_bounds = array<i64: 32, 192>}, {pipeline_mode = #tpu.pipeline_mode<synchronous>, transform_indices = @transform_2, window_bounds = array<i64: 1, 192>}, {pipeline_mode = #tpu.pipeline_mode<synchronous>, transform_indices = @transform_3, window_bounds = array<i64: 64, 32>}, {pipeline_mode = #tpu.pipeline_mode<synchronous>, transform_indices = @transform_4, window_bounds = array<i64: 1, 32>}, {pipeline_mode = #tpu.pipeline_mode<synchronous>, transform_indices = @transform_5, window_bounds = array<i64: 4, 64, 64>}, {pipeline_mode = #tpu.pipeline_mode<synchronous>, transform_indices = @transform_6, window_bounds = array<i64: 1, 32>}, {pipeline_mode = #tpu.pipeline_mode<synchronous>, transform_indices = @transform_7, window_bounds = array<i64: 1, 32>}, {pipeline_mode = #tpu.pipeline_mode<synchronous>, transform_indices = @transform_8, window_bounds = array<i64: 32, 96>}, {pipeline_mode = #tpu.pipeline_mode<synchronous>, transform_indices = @transform_9, window_bounds = array<i64: 1, 96>}, {pipeline_mode = #tpu.pipeline_mode<synchronous>, transform_indices = @transform_10, window_bounds = array<i64: 96, 32>}, {pipeline_mode = #tpu.pipeline_mode<synchronous>, transform_indices = @transform_11, window_bounds = array<i64: 1, 32>}, {pipeline_mode = #tpu.pipeline_mode<synchronous>, transform_indices = @transform_12, window_bounds = array<i64: 1, 32>}, {pipeline_mode = #tpu.pipeline_mode<synchronous>, transform_indices = @transform_13, window_bounds = array<i64: 1, 32>}, {transform_indices = @transform_14, window_bounds = array<i64: 128, 32>}]} {
    %c0 = arith.constant 0 : index
    %c0_0 = arith.constant 0 : index
    %0 = vector.load %arg1[%c0, %c0_0] : memref<128x32xf32, #tpu.memory_space<vmem>>, vector<128x32xf32>
    %1 = arith.truncf %0 : vector<128x32xf32> to vector<128x32xbf16>
    %c0_1 = arith.constant 0 : index
    %c0_2 = arith.constant 0 : index
    %2 = vector.load %arg2[%c0_1, %c0_2] : memref<32x192xbf16, #tpu.memory_space<vmem>>, vector<32x192xbf16>
    %cst = arith.constant dense<0.000000e+00> : vector<128x192xf32>
    %3 = tpu.matmul %1, %2, %cst {dimension_numbers = #tpu.dot_dimension_numbers<[1], [0], [0], [1], [0, 0, 1, 1], [], []>} : vector<128x32xbf16>, vector<32x192xbf16>, vector<128x192xf32> -> vector<128x192xf32>
    %c0_3 = arith.constant 0 : index
    %c0_4 = arith.constant 0 : index
    %4 = vector.load %arg3[%c0_3, %c0_4] : memref<1x192xf32, #tpu.memory_space<vmem>>, vector<1x192xf32>
    %5 = vector.broadcast %4 : vector<1x192xf32> to vector<128x192xf32>
    %6 = arith.addf %3, %5 : vector<128x192xf32>
    %c0_5 = arith.constant 0 : index
    %c0_6 = arith.constant 0 : index
    %c0_7 = arith.constant 0 : index
    %7 = vector.load %arg6[%c0_5, %c0_6, %c0_7] : memref<4x64x64xf32, #tpu.memory_space<vmem>>, vector<4x64x64xf32>
    %8 = vector.extract_strided_slice %6 {offsets = [0, 0], sizes = [128, 16], strides = [1, 1]} : vector<128x192xf32> to vector<128x16xf32>
    %9 = arith.truncf %8 : vector<128x16xf32> to vector<128x16xbf16>
    %10 = vector.shape_cast %9 : vector<128x16xbf16> to vector<2x64x16xbf16>
    %11 = vector.extract_strided_slice %6 {offsets = [0, 64], sizes = [128, 16], strides = [1, 1]} : vector<128x192xf32> to vector<128x16xf32>
    %12 = arith.truncf %11 : vector<128x16xf32> to vector<128x16xbf16>
    %13 = vector.shape_cast %12 : vector<128x16xbf16> to vector<2x64x16xbf16>
    %14 = vector.extract_strided_slice %6 {offsets = [0, 128], sizes = [128, 16], strides = [1, 1]} : vector<128x192xf32> to vector<128x16xf32>
    %15 = arith.truncf %14 : vector<128x16xf32> to vector<128x16xbf16>
    %16 = vector.shape_cast %15 : vector<128x16xbf16> to vector<2x64x16xbf16>
    %cst_8 = arith.constant dense<0.000000e+00> : vector<2x64x64xf32>
    %17 = tpu.matmul %10, %13, %cst_8 {dimension_numbers = #tpu.dot_dimension_numbers<[2], [2], [1], [1], [0, 0, 0, 1, 1, 1], [0], [0]>} : vector<2x64x16xbf16>, vector<2x64x16xbf16>, vector<2x64x64xf32> -> vector<2x64x64xf32>
    %18 = vector.extract_strided_slice %7 {offsets = [0, 0, 0], sizes = [1, 64, 64], strides = [1, 1, 1]} : vector<4x64x64xf32> to vector<1x64x64xf32>
    %19 = vector.shape_cast %18 : vector<1x64x64xf32> to vector<64x64xf32>
    %20 = vector.shape_cast %19 : vector<64x64xf32> to vector<1x64x64xf32>
    %21 = vector.broadcast %20 : vector<1x64x64xf32> to vector<2x64x64xf32>
    %22 = arith.addf %17, %21 : vector<2x64x64xf32>
    %cst_9 = arith.constant dense<0xFF800000> : vector<2x64xf32>
    %23 = vector.multi_reduction <maximumf>, %22, %cst_9 [2] : vector<2x64x64xf32> to vector<2x64xf32>
    %24 = vector.shape_cast %23 : vector<2x64xf32> to vector<2x64x1xf32>
    %25 = vector.broadcast %24 : vector<2x64x1xf32> to vector<2x64x64xf32>
    %26 = arith.subf %22, %25 : vector<2x64x64xf32>
    %27 = math.exp %26 : vector<2x64x64xf32>
    %cst_10 = arith.constant dense<0.000000e+00> : vector<2x64xf32>
    %28 = vector.multi_reduction <add>, %27, %cst_10 [2] : vector<2x64x64xf32> to vector<2x64xf32>
    %29 = vector.shape_cast %28 : vector<2x64xf32> to vector<2x64x1xf32>
    %30 = tpu.reciprocal %29 {approx = true} : vector<2x64x1xf32> -> vector<2x64x1xf32>
    %31 = vector.broadcast %30 : vector<2x64x1xf32> to vector<2x64x64xf32>
    %32 = arith.mulf %27, %31 : vector<2x64x64xf32>
    %33 = arith.truncf %32 : vector<2x64x64xf32> to vector<2x64x64xbf16>
    %cst_11 = arith.constant dense<0.000000e+00> : vector<2x64x16xf32>
    %34 = tpu.matmul %33, %16, %cst_11 {dimension_numbers = #tpu.dot_dimension_numbers<[2], [1], [1], [2], [0, 0, 0, 1, 1, 2], [0], [0]>} : vector<2x64x64xbf16>, vector<2x64x16xbf16>, vector<2x64x16xf32> -> vector<2x64x16xf32>
    %35 = vector.shape_cast %34 : vector<2x64x16xf32> to vector<128x16xf32>
    %36 = vector.extract_strided_slice %6 {offsets = [0, 16], sizes = [128, 16], strides = [1, 1]} : vector<128x192xf32> to vector<128x16xf32>
    %37 = arith.truncf %36 : vector<128x16xf32> to vector<128x16xbf16>
    %38 = vector.shape_cast %37 : vector<128x16xbf16> to vector<2x64x16xbf16>
    %39 = vector.extract_strided_slice %6 {offsets = [0, 80], sizes = [128, 16], strides = [1, 1]} : vector<128x192xf32> to vector<128x16xf32>
    %40 = arith.truncf %39 : vector<128x16xf32> to vector<128x16xbf16>
    %41 = vector.shape_cast %40 : vector<128x16xbf16> to vector<2x64x16xbf16>
    %42 = vector.extract_strided_slice %6 {offsets = [0, 144], sizes = [128, 16], strides = [1, 1]} : vector<128x192xf32> to vector<128x16xf32>
    %43 = arith.truncf %42 : vector<128x16xf32> to vector<128x16xbf16>
    %44 = vector.shape_cast %43 : vector<128x16xbf16> to vector<2x64x16xbf16>
    %cst_12 = arith.constant dense<0.000000e+00> : vector<2x64x64xf32>
    %45 = tpu.matmul %38, %41, %cst_12 {dimension_numbers = #tpu.dot_dimension_numbers<[2], [2], [1], [1], [0, 0, 0, 1, 1, 1], [0], [0]>} : vector<2x64x16xbf16>, vector<2x64x16xbf16>, vector<2x64x64xf32> -> vector<2x64x64xf32>
    %46 = vector.extract_strided_slice %7 {offsets = [1, 0, 0], sizes = [1, 64, 64], strides = [1, 1, 1]} : vector<4x64x64xf32> to vector<1x64x64xf32>
    %47 = vector.shape_cast %46 : vector<1x64x64xf32> to vector<64x64xf32>
    %48 = vector.shape_cast %47 : vector<64x64xf32> to vector<1x64x64xf32>
    %49 = vector.broadcast %48 : vector<1x64x64xf32> to vector<2x64x64xf32>
    %50 = arith.addf %45, %49 : vector<2x64x64xf32>
    %cst_13 = arith.constant dense<0xFF800000> : vector<2x64xf32>
    %51 = vector.multi_reduction <maximumf>, %50, %cst_13 [2] : vector<2x64x64xf32> to vector<2x64xf32>
    %52 = vector.shape_cast %51 : vector<2x64xf32> to vector<2x64x1xf32>
    %53 = vector.broadcast %52 : vector<2x64x1xf32> to vector<2x64x64xf32>
    %54 = arith.subf %50, %53 : vector<2x64x64xf32>
    %55 = math.exp %54 : vector<2x64x64xf32>
    %cst_14 = arith.constant dense<0.000000e+00> : vector<2x64xf32>
    %56 = vector.multi_reduction <add>, %55, %cst_14 [2] : vector<2x64x64xf32> to vector<2x64xf32>
    %57 = vector.shape_cast %56 : vector<2x64xf32> to vector<2x64x1xf32>
    %58 = tpu.reciprocal %57 {approx = true} : vector<2x64x1xf32> -> vector<2x64x1xf32>
    %59 = vector.broadcast %58 : vector<2x64x1xf32> to vector<2x64x64xf32>
    %60 = arith.mulf %55, %59 : vector<2x64x64xf32>
    %61 = arith.truncf %60 : vector<2x64x64xf32> to vector<2x64x64xbf16>
    %cst_15 = arith.constant dense<0.000000e+00> : vector<2x64x16xf32>
    %62 = tpu.matmul %61, %44, %cst_15 {dimension_numbers = #tpu.dot_dimension_numbers<[2], [1], [1], [2], [0, 0, 0, 1, 1, 2], [0], [0]>} : vector<2x64x64xbf16>, vector<2x64x16xbf16>, vector<2x64x16xf32> -> vector<2x64x16xf32>
    %63 = vector.shape_cast %62 : vector<2x64x16xf32> to vector<128x16xf32>
    %64 = vector.extract_strided_slice %6 {offsets = [0, 32], sizes = [128, 16], strides = [1, 1]} : vector<128x192xf32> to vector<128x16xf32>
    %65 = arith.truncf %64 : vector<128x16xf32> to vector<128x16xbf16>
    %66 = vector.shape_cast %65 : vector<128x16xbf16> to vector<2x64x16xbf16>
    %67 = vector.extract_strided_slice %6 {offsets = [0, 96], sizes = [128, 16], strides = [1, 1]} : vector<128x192xf32> to vector<128x16xf32>
    %68 = arith.truncf %67 : vector<128x16xf32> to vector<128x16xbf16>
    %69 = vector.shape_cast %68 : vector<128x16xbf16> to vector<2x64x16xbf16>
    %70 = vector.extract_strided_slice %6 {offsets = [0, 160], sizes = [128, 16], strides = [1, 1]} : vector<128x192xf32> to vector<128x16xf32>
    %71 = arith.truncf %70 : vector<128x16xf32> to vector<128x16xbf16>
    %72 = vector.shape_cast %71 : vector<128x16xbf16> to vector<2x64x16xbf16>
    %cst_16 = arith.constant dense<0.000000e+00> : vector<2x64x64xf32>
    %73 = tpu.matmul %66, %69, %cst_16 {dimension_numbers = #tpu.dot_dimension_numbers<[2], [2], [1], [1], [0, 0, 0, 1, 1, 1], [0], [0]>} : vector<2x64x16xbf16>, vector<2x64x16xbf16>, vector<2x64x64xf32> -> vector<2x64x64xf32>
    %74 = vector.extract_strided_slice %7 {offsets = [2, 0, 0], sizes = [1, 64, 64], strides = [1, 1, 1]} : vector<4x64x64xf32> to vector<1x64x64xf32>
    %75 = vector.shape_cast %74 : vector<1x64x64xf32> to vector<64x64xf32>
    %76 = vector.shape_cast %75 : vector<64x64xf32> to vector<1x64x64xf32>
    %77 = vector.broadcast %76 : vector<1x64x64xf32> to vector<2x64x64xf32>
    %78 = arith.addf %73, %77 : vector<2x64x64xf32>
    %cst_17 = arith.constant dense<0xFF800000> : vector<2x64xf32>
    %79 = vector.multi_reduction <maximumf>, %78, %cst_17 [2] : vector<2x64x64xf32> to vector<2x64xf32>
    %80 = vector.shape_cast %79 : vector<2x64xf32> to vector<2x64x1xf32>
    %81 = vector.broadcast %80 : vector<2x64x1xf32> to vector<2x64x64xf32>
    %82 = arith.subf %78, %81 : vector<2x64x64xf32>
    %83 = math.exp %82 : vector<2x64x64xf32>
    %cst_18 = arith.constant dense<0.000000e+00> : vector<2x64xf32>
    %84 = vector.multi_reduction <add>, %83, %cst_18 [2] : vector<2x64x64xf32> to vector<2x64xf32>
    %85 = vector.shape_cast %84 : vector<2x64xf32> to vector<2x64x1xf32>
    %86 = tpu.reciprocal %85 {approx = true} : vector<2x64x1xf32> -> vector<2x64x1xf32>
    %87 = vector.broadcast %86 : vector<2x64x1xf32> to vector<2x64x64xf32>
    %88 = arith.mulf %83, %87 : vector<2x64x64xf32>
    %89 = arith.truncf %88 : vector<2x64x64xf32> to vector<2x64x64xbf16>
    %cst_19 = arith.constant dense<0.000000e+00> : vector<2x64x16xf32>
    %90 = tpu.matmul %89, %72, %cst_19 {dimension_numbers = #tpu.dot_dimension_numbers<[2], [1], [1], [2], [0, 0, 0, 1, 1, 2], [0], [0]>} : vector<2x64x64xbf16>, vector<2x64x16xbf16>, vector<2x64x16xf32> -> vector<2x64x16xf32>
    %91 = vector.shape_cast %90 : vector<2x64x16xf32> to vector<128x16xf32>
    %92 = vector.extract_strided_slice %6 {offsets = [0, 48], sizes = [128, 16], strides = [1, 1]} : vector<128x192xf32> to vector<128x16xf32>
    %93 = arith.truncf %92 : vector<128x16xf32> to vector<128x16xbf16>
    %94 = vector.shape_cast %93 : vector<128x16xbf16> to vector<2x64x16xbf16>
    %95 = vector.extract_strided_slice %6 {offsets = [0, 112], sizes = [128, 16], strides = [1, 1]} : vector<128x192xf32> to vector<128x16xf32>
    %96 = arith.truncf %95 : vector<128x16xf32> to vector<128x16xbf16>
    %97 = vector.shape_cast %96 : vector<128x16xbf16> to vector<2x64x16xbf16>
    %98 = vector.extract_strided_slice %6 {offsets = [0, 176], sizes = [128, 16], strides = [1, 1]} : vector<128x192xf32> to vector<128x16xf32>
    %99 = arith.truncf %98 : vector<128x16xf32> to vector<128x16xbf16>
    %100 = vector.shape_cast %99 : vector<128x16xbf16> to vector<2x64x16xbf16>
    %cst_20 = arith.constant dense<0.000000e+00> : vector<2x64x64xf32>
    %101 = tpu.matmul %94, %97, %cst_20 {dimension_numbers = #tpu.dot_dimension_numbers<[2], [2], [1], [1], [0, 0, 0, 1, 1, 1], [0], [0]>} : vector<2x64x16xbf16>, vector<2x64x16xbf16>, vector<2x64x64xf32> -> vector<2x64x64xf32>
    %102 = vector.extract_strided_slice %7 {offsets = [3, 0, 0], sizes = [1, 64, 64], strides = [1, 1, 1]} : vector<4x64x64xf32> to vector<1x64x64xf32>
    %103 = vector.shape_cast %102 : vector<1x64x64xf32> to vector<64x64xf32>
    %104 = vector.shape_cast %103 : vector<64x64xf32> to vector<1x64x64xf32>
    %105 = vector.broadcast %104 : vector<1x64x64xf32> to vector<2x64x64xf32>
    %106 = arith.addf %101, %105 : vector<2x64x64xf32>
    %cst_21 = arith.constant dense<0xFF800000> : vector<2x64xf32>
    %107 = vector.multi_reduction <maximumf>, %106, %cst_21 [2] : vector<2x64x64xf32> to vector<2x64xf32>
    %108 = vector.shape_cast %107 : vector<2x64xf32> to vector<2x64x1xf32>
    %109 = vector.broadcast %108 : vector<2x64x1xf32> to vector<2x64x64xf32>
    %110 = arith.subf %106, %109 : vector<2x64x64xf32>
    %111 = math.exp %110 : vector<2x64x64xf32>
    %cst_22 = arith.constant dense<0.000000e+00> : vector<2x64xf32>
    %112 = vector.multi_reduction <add>, %111, %cst_22 [2] : vector<2x64x64xf32> to vector<2x64xf32>
    %113 = vector.shape_cast %112 : vector<2x64xf32> to vector<2x64x1xf32>
    %114 = tpu.reciprocal %113 {approx = true} : vector<2x64x1xf32> -> vector<2x64x1xf32>
    %115 = vector.broadcast %114 : vector<2x64x1xf32> to vector<2x64x64xf32>
    %116 = arith.mulf %111, %115 : vector<2x64x64xf32>
    %117 = arith.truncf %116 : vector<2x64x64xf32> to vector<2x64x64xbf16>
    %cst_23 = arith.constant dense<0.000000e+00> : vector<2x64x16xf32>
    %118 = tpu.matmul %117, %100, %cst_23 {dimension_numbers = #tpu.dot_dimension_numbers<[2], [1], [1], [2], [0, 0, 0, 1, 1, 2], [0], [0]>} : vector<2x64x64xbf16>, vector<2x64x16xbf16>, vector<2x64x16xf32> -> vector<2x64x16xf32>
    %119 = vector.shape_cast %118 : vector<2x64x16xf32> to vector<128x16xf32>
    %120 = tpu.concatenate %35, %63, %91, %119 in 1 : vector<128x16xf32>, vector<128x16xf32>, vector<128x16xf32>, vector<128x16xf32> -> vector<128x64xf32>
    %121 = arith.truncf %120 : vector<128x64xf32> to vector<128x64xbf16>
    %c0_24 = arith.constant 0 : index
    %c0_25 = arith.constant 0 : index
    %122 = vector.load %arg4[%c0_24, %c0_25] : memref<64x32xbf16, #tpu.memory_space<vmem>>, vector<64x32xbf16>
    %cst_26 = arith.constant dense<0.000000e+00> : vector<128x32xf32>
    %123 = tpu.matmul %121, %122, %cst_26 {dimension_numbers = #tpu.dot_dimension_numbers<[1], [0], [0], [1], [0, 0, 1, 1], [], []>} : vector<128x64xbf16>, vector<64x32xbf16>, vector<128x32xf32> -> vector<128x32xf32>
    %c0_27 = arith.constant 0 : index
    %c0_28 = arith.constant 0 : index
    %124 = vector.load %arg5[%c0_27, %c0_28] : memref<1x32xf32, #tpu.memory_space<vmem>>, vector<1x32xf32>
    %125 = vector.broadcast %124 : vector<1x32xf32> to vector<128x32xf32>
    %126 = arith.addf %123, %125 : vector<128x32xf32>
    %c0_29 = arith.constant 0 : index
    %c0_30 = arith.constant 0 : index
    %127 = vector.load %arg7[%c0_29, %c0_30] : memref<1x32xf32, #tpu.memory_space<vmem>>, vector<1x32xf32>
    %c0_31 = arith.constant 0 : index
    %c0_32 = arith.constant 0 : index
    %128 = vector.load %arg8[%c0_31, %c0_32] : memref<1x32xf32, #tpu.memory_space<vmem>>, vector<1x32xf32>
    %cst_33 = arith.constant dense<0.000000e+00> : vector<128xf32>
    %129 = vector.multi_reduction <add>, %126, %cst_33 [1] : vector<128x32xf32> to vector<128xf32>
    %130 = vector.shape_cast %129 : vector<128xf32> to vector<128x1xf32>
    %cst_34 = arith.constant 3.200000e+01 : f32
    %131 = vector.broadcast %cst_34 : f32 to vector<128x1xf32>
    %132 = arith.divf %130, %131 : vector<128x1xf32>
    %133 = vector.broadcast %132 : vector<128x1xf32> to vector<128x32xf32>
    %134 = arith.subf %126, %133 : vector<128x32xf32>
    %135 = arith.mulf %134, %134 : vector<128x32xf32>
    %cst_35 = arith.constant dense<0.000000e+00> : vector<128xf32>
    %136 = vector.multi_reduction <add>, %135, %cst_35 [1] : vector<128x32xf32> to vector<128xf32>
    %137 = vector.shape_cast %136 : vector<128xf32> to vector<128x1xf32>
    %cst_36 = arith.constant 3.200000e+01 : f32
    %138 = vector.broadcast %cst_36 : f32 to vector<128x1xf32>
    %139 = arith.divf %137, %138 : vector<128x1xf32>
    %140 = vector.broadcast %132 : vector<128x1xf32> to vector<128x32xf32>
    %141 = arith.subf %126, %140 : vector<128x32xf32>
    %cst_37 = arith.constant 9.99999974E-6 : f32
    %142 = vector.broadcast %cst_37 : f32 to vector<128x1xf32>
    %143 = arith.addf %139, %142 : vector<128x1xf32>
    %144 = math.rsqrt %143 : vector<128x1xf32>
    %145 = vector.broadcast %144 : vector<128x1xf32> to vector<128x32xf32>
    %146 = arith.mulf %141, %145 : vector<128x32xf32>
    %147 = vector.broadcast %127 : vector<1x32xf32> to vector<128x32xf32>
    %148 = arith.mulf %146, %147 : vector<128x32xf32>
    %149 = vector.broadcast %128 : vector<1x32xf32> to vector<128x32xf32>
    %150 = arith.addf %148, %149 : vector<128x32xf32>
    %151 = arith.addf %150, %0 : vector<128x32xf32>
    %152 = arith.truncf %151 : vector<128x32xf32> to vector<128x32xbf16>
    %c0_38 = arith.constant 0 : index
    %c0_39 = arith.constant 0 : index
    %153 = vector.load %arg9[%c0_38, %c0_39] : memref<32x96xbf16, #tpu.memory_space<vmem>>, vector<32x96xbf16>
    %cst_40 = arith.constant dense<0.000000e+00> : vector<128x96xf32>
    %154 = tpu.matmul %152, %153, %cst_40 {dimension_numbers = #tpu.dot_dimension_numbers<[1], [0], [0], [1], [0, 0, 1, 1], [], []>} : vector<128x32xbf16>, vector<32x96xbf16>, vector<128x96xf32> -> vector<128x96xf32>
    %c0_41 = arith.constant 0 : index
    %c0_42 = arith.constant 0 : index
    %155 = vector.load %arg10[%c0_41, %c0_42] : memref<1x96xf32, #tpu.memory_space<vmem>>, vector<1x96xf32>
    %156 = vector.broadcast %155 : vector<1x96xf32> to vector<128x96xf32>
    %157 = arith.addf %154, %156 : vector<128x96xf32>
    %cst_43 = arith.constant 5.000000e-01 : f32
    %158 = vector.broadcast %cst_43 : f32 to vector<128x96xf32>
    %159 = arith.mulf %158, %157 : vector<128x96xf32>
    %cst_44 = arith.constant 0.707106769 : f32
    %160 = vector.broadcast %cst_44 : f32 to vector<128x96xf32>
    %161 = arith.mulf %157, %160 : vector<128x96xf32>
    %162 = math.erf %161 : vector<128x96xf32>
    %cst_45 = arith.constant 1.000000e+00 : f32
    %163 = vector.broadcast %cst_45 : f32 to vector<128x96xf32>
    %164 = arith.addf %163, %162 : vector<128x96xf32>
    %165 = arith.mulf %159, %164 : vector<128x96xf32>
    %166 = arith.truncf %165 : vector<128x96xf32> to vector<128x96xbf16>
    %c0_46 = arith.constant 0 : index
    %c0_47 = arith.constant 0 : index
    %167 = vector.load %arg11[%c0_46, %c0_47] : memref<96x32xbf16, #tpu.memory_space<vmem>>, vector<96x32xbf16>
    %cst_48 = arith.constant dense<0.000000e+00> : vector<128x32xf32>
    %168 = tpu.matmul %166, %167, %cst_48 {dimension_numbers = #tpu.dot_dimension_numbers<[1], [0], [0], [1], [0, 0, 1, 1], [], []>} : vector<128x96xbf16>, vector<96x32xbf16>, vector<128x32xf32> -> vector<128x32xf32>
    %c0_49 = arith.constant 0 : index
    %c0_50 = arith.constant 0 : index
    %169 = vector.load %arg12[%c0_49, %c0_50] : memref<1x32xf32, #tpu.memory_space<vmem>>, vector<1x32xf32>
    %170 = vector.broadcast %169 : vector<1x32xf32> to vector<128x32xf32>
    %171 = arith.addf %168, %170 : vector<128x32xf32>
    %c0_51 = arith.constant 0 : index
    %c0_52 = arith.constant 0 : index
    %172 = vector.load %arg13[%c0_51, %c0_52] : memref<1x32xf32, #tpu.memory_space<vmem>>, vector<1x32xf32>
    %c0_53 = arith.constant 0 : index
    %c0_54 = arith.constant 0 : index
    %173 = vector.load %arg14[%c0_53, %c0_54] : memref<1x32xf32, #tpu.memory_space<vmem>>, vector<1x32xf32>
    %cst_55 = arith.constant dense<0.000000e+00> : vector<128xf32>
    %174 = vector.multi_reduction <add>, %171, %cst_55 [1] : vector<128x32xf32> to vector<128xf32>
    %175 = vector.shape_cast %174 : vector<128xf32> to vector<128x1xf32>
    %cst_56 = arith.constant 3.200000e+01 : f32
    %176 = vector.broadcast %cst_56 : f32 to vector<128x1xf32>
    %177 = arith.divf %175, %176 : vector<128x1xf32>
    %178 = vector.broadcast %177 : vector<128x1xf32> to vector<128x32xf32>
    %179 = arith.subf %171, %178 : vector<128x32xf32>
    %180 = arith.mulf %179, %179 : vector<128x32xf32>
    %cst_57 = arith.constant dense<0.000000e+00> : vector<128xf32>
    %181 = vector.multi_reduction <add>, %180, %cst_57 [1] : vector<128x32xf32> to vector<128xf32>
    %182 = vector.shape_cast %181 : vector<128xf32> to vector<128x1xf32>
    %cst_58 = arith.constant 3.200000e+01 : f32
    %183 = vector.broadcast %cst_58 : f32 to vector<128x1xf32>
    %184 = arith.divf %182, %183 : vector<128x1xf32>
    %185 = vector.broadcast %177 : vector<128x1xf32> to vector<128x32xf32>
    %186 = arith.subf %171, %185 : vector<128x32xf32>
    %cst_59 = arith.constant 9.99999974E-6 : f32
    %187 = vector.broadcast %cst_59 : f32 to vector<128x1xf32>
    %188 = arith.addf %184, %187 : vector<128x1xf32>
    %189 = math.rsqrt %188 : vector<128x1xf32>
    %190 = vector.broadcast %189 : vector<128x1xf32> to vector<128x32xf32>
    %191 = arith.mulf %186, %190 : vector<128x32xf32>
    %192 = vector.broadcast %172 : vector<1x32xf32> to vector<128x32xf32>
    %193 = arith.mulf %191, %192 : vector<128x32xf32>
    %194 = vector.broadcast %173 : vector<1x32xf32> to vector<128x32xf32>
    %195 = arith.addf %193, %194 : vector<128x32xf32>
    %196 = arith.addf %195, %151 : vector<128x32xf32>
    %c0_60 = arith.constant 0 : index
    %c0_61 = arith.constant 0 : index
    %197 = vector.load %arg15[%c0_60, %c0_61] : memref<128x32xf32, #tpu.memory_space<vmem>>, vector<128x32xf32>
    tpu.vector_store %arg15[%c0_60, %c0_61], %196 {strides = array<i32>} : memref<128x32xf32, #tpu.memory_space<vmem>>, vector<128x32xf32>,
    return
  }
  func.func @transform_0(%arg0: i32) -> (i32, i32) {
    %c0_i32 = arith.constant 0 : i32
    %c0_i32_0 = arith.constant 0 : i32
    return %arg0, %c0_i32 : i32, i32
  }
  func.func @transform_1(%arg0: i32) -> (i32, i32) {
    %c0_i32 = arith.constant 0 : i32
    %c0_i32_0 = arith.constant 0 : i32
    %c0_i32_1 = arith.constant 0 : i32
    return %c0_i32, %c0_i32_0 : i32, i32
  }
  func.func @transform_2(%arg0: i32) -> (i32, i32) {
    %c0_i32 = arith.constant 0 : i32
    %c0_i32_0 = arith.constant 0 : i32
    %c0_i32_1 = arith.constant 0 : i32
    return %c0_i32, %c0_i32_0 : i32, i32
  }
  func.func @transform_3(%arg0: i32) -> (i32, i32) {
    %c0_i32 = arith.constant 0 : i32
    %c0_i32_0 = arith.constant 0 : i32
    %c0_i32_1 = arith.constant 0 : i32
    return %c0_i32, %c0_i32_0 : i32, i32
  }
  func.func @transform_4(%arg0: i32) -> (i32, i32) {
    %c0_i32 = arith.constant 0 : i32
    %c0_i32_0 = arith.constant 0 : i32
    %c0_i32_1 = arith.constant 0 : i32
    return %c0_i32, %c0_i32_0 : i32, i32
  }
  func.func @transform_5(%arg0: i32) -> (i32, i32, i32) {
    %c0_i32 = arith.constant 0 : i32
    %c0_i32_0 = arith.constant 0 : i32
    %c0_i32_1 = arith.constant 0 : i32
    %c0_i32_2 = arith.constant 0 : i32
    return %c0_i32, %c0_i32_0, %c0_i32_1 : i32, i32, i32
  }
  func.func @transform_6(%arg0: i32) -> (i32, i32) {
    %c0_i32 = arith.constant 0 : i32
    %c0_i32_0 = arith.constant 0 : i32
    %c0_i32_1 = arith.constant 0 : i32
    return %c0_i32, %c0_i32_0 : i32, i32
  }
  func.func @transform_7(%arg0: i32) -> (i32, i32) {
    %c0_i32 = arith.constant 0 : i32
    %c0_i32_0 = arith.constant 0 : i32
    %c0_i32_1 = arith.constant 0 : i32
    return %c0_i32, %c0_i32_0 : i32, i32
  }
  func.func @transform_8(%arg0: i32) -> (i32, i32) {
    %c0_i32 = arith.constant 0 : i32
    %c0_i32_0 = arith.constant 0 : i32
    %c0_i32_1 = arith.constant 0 : i32
    return %c0_i32, %c0_i32_0 : i32, i32
  }
  func.func @transform_9(%arg0: i32) -> (i32, i32) {
    %c0_i32 = arith.constant 0 : i32
    %c0_i32_0 = arith.constant 0 : i32
    %c0_i32_1 = arith.constant 0 : i32
    return %c0_i32, %c0_i32_0 : i32, i32
  }
  func.func @transform_10(%arg0: i32) -> (i32, i32) {
    %c0_i32 = arith.constant 0 : i32
    %c0_i32_0 = arith.constant 0 : i32
    %c0_i32_1 = arith.constant 0 : i32
    return %c0_i32, %c0_i32_0 : i32, i32
  }
  func.func @transform_11(%arg0: i32) -> (i32, i32) {
    %c0_i32 = arith.constant 0 : i32
    %c0_i32_0 = arith.constant 0 : i32
    %c0_i32_1 = arith.constant 0 : i32
    return %c0_i32, %c0_i32_0 : i32, i32
  }
  func.func @transform_12(%arg0: i32) -> (i32, i32) {
    %c0_i32 = arith.constant 0 : i32
    %c0_i32_0 = arith.constant 0 : i32
    %c0_i32_1 = arith.constant 0 : i32
    return %c0_i32, %c0_i32_0 : i32, i32
  }
  func.func @transform_13(%arg0: i32) -> (i32, i32) {
    %c0_i32 = arith.constant 0 : i32
    %c0_i32_0 = arith.constant 0 : i32
    %c0_i32_1 = arith.constant 0 : i32
    return %c0_i32, %c0_i32_0 : i32, i32
  }
  func.func @transform_14(%arg0: i32) -> (i32, i32) {
    %c0_i32 = arith.constant 0 : i32
    %c0_i32_0 = arith.constant 0 : i32
    return %arg0, %c0_i32 : i32, i32
  }
}

</mosaic_0001>

<bundles_post_ra>
// kernel: tpu_custom_call.1
= control target key start
LH: loop header
LB: loop body
LE: loop exit
PB: predicated region body
PF: predicated region fallthrough
CT: control target
= control target key end

     0   :  { %s5687_s29 = smov 0   ;;  %s8582_s0 = inlined_call_operand.vmem [shape: f32[512,32], index: 0, kind: input, shape index: {}]   ;;  %s8583_s1 = inlined_call_operand.vmem [shape: bf16[32,192], index: 1, kind: input, shape index: {}]   ;;  %s8584_s2 = inlined_call_operand.vmem [shape: f32[1,192], index: 2, kind: input, shape index: {}]   ;;  %s8585_s3 = inlined_call_operand.vmem [shape: bf16[64,32], index: 3, kind: input, shape index: {}]   ;;  %s8586_s4 = inlined_call_operand.vmem [shape: f32[1,32], index: 4, kind: input, shape index: {}]   ;;  %s8587_s5 = inlined_call_operand.vmem [shape: f32[4,64,64], index: 5, kind: input, shape index: {}]   ;;  %s8588_s6 = inlined_call_operand.vmem [shape: f32[1,32], index: 6, kind: input, shape index: {}]   ;;  %s8589_s7 = inlined_call_operand.vmem [shape: f32[1,32], index: 7, kind: input, shape index: {}]   ;;  %s8590_s8 = inlined_call_operand.vmem [shape: bf16[32,96], index: 8, kind: input, shape index: {}]   ;;  %s8591_s9 = inlined_call_operand.vmem [shape: f32[1,96], index: 9, kind: input, shape index: {}]   ;;  %s8592_s10 = inlined_call_operand.vmem [shape: bf16[96,32], index: 10, kind: input, shape index: {}]   ;;  %s8593_s11 = inlined_call_operand.vmem [shape: f32[1,32], index: 11, kind: input, shape index: {}]   ;;  %s8594_s12 = inlined_call_operand.vmem [shape: f32[1,32], index: 12, kind: input, shape index: {}]   ;;  %s8595_s13 = inlined_call_operand.vmem [shape: f32[1,32], index: 13, kind: input, shape index: {}]   ;;  %s8596_s14 = inlined_call_operand.vmem [shape: f32[512,32], index: 14, kind: output, shape index: {}]  }
   0x1 LB: > { %s4859_s30 = sadd.s32 4294967295, %s5602_s29   ;;  %p4863_p0 = scmp.ge.s32.totalorder %s5602_s29, 1  ;;  %s5602_s29 = sphi %s5687_s29, %s24_s29  }
   0x2   : > { %p413_p1 = scmp.lt.s32.totalorder %s5602_s29, 5 }
   0x4   : > { %p414_p2 = pnand %p4863_p0, %p413_p1 }
   0x6   : > { %417 = sbr.rel (%p414_p2) target bundleno = 2891 (0xb4b), region = 76 }
   0xb   : > { %v4878_v0 = vld [vmem:[%s8583_s1 + $0x10] sm:$0xf]  ;;  %v5057_v1 = vld [vmem:[%s8583_s1 + $0x14] sm:$0xf0]  ;;  %v4870_v2 = vld [vmem:[%s8583_s1] sm:$0xf] }
   0xc   : > { %v4879_v3 = vor.u32 %v5057_v1, %v4878_v0  ;;  %v5055_v4 = vld [vmem:[%s8583_s1 + $0x4] sm:$0xf0]  ;;  %s4864_s23 = sshll.u32 %s4859_s30, 4  ;;  %vm526_vm0 = vcmask 261120   ;;  %v5056_v18 = vld [vmem:[%s8583_s1 + $0x14] sm:$0xf] }
   0xd   : > { %p460_p3 = scmp.lt.s32.totalorder %s4864_s23, 63  ;;  %v4871_v5 = vor.u32 %v5055_v4, %v4870_v2  ;;  %v4880_v19 = vld [vmem:[%s8583_s1 + $0x18] sm:$0xf0]  ;;  %v5054_v20 = vld [vmem:[%s8583_s1 + $0x4] sm:$0xf]  ;;  %s5604_s25 = smov 64  }
   0xe   : > { %557 = vmatpush.bf16.msra.mxu0 %v4879_v3  ;;  %v4883_v21 = vor.u32 %v5056_v18, %v4880_v19  ;;  %v4872_v22 = vld [vmem:[%s8583_s1 + $0x8] sm:$0xf0]  ;;  %v5762_v38 = vld [vmem:[%s8584_s2] sm:$0x3]  ;;  %s5605_s26 = smov 48   ;;  %s5606_s28 = smov 112  }
   0xf   : > { %s8727_s23 = smov (!%p460_p3, %s4864_s23), 63  ;;  %v4875_v23 = vor.u32 %v5054_v20, %v4872_v22  ;;  %v5765_v40 = vperm.slane %v5762_v38, 0  ;;  %s5607_s30 = smov 96   ;;  %vm741_vm1 = vcmask 130048   ;;  %vm876_vm2 = vcmask 523264  }
  0x10   : > { %s4865_s24 = sshll.u32 %s8727_s23, 3  ;;  %606 = vmatpush.bf16.msra.mxu1 %v4883_v21  ;;  %s5608_s15 = smov 32   ;;  %vm2891_vm3 = vcmask 392192  }
  0x11   : > { %s5715_s27 = scalar_lea.vmem %s8582_s0, %s4865_s24  ;;  %s5609_s16 = smov 16  }
  0x12   : > { %558 = vmatpush.bf16.msra.mxu0 %v4871_v5  ;;  %v472_v6 = vld [vmem:[%s5715_s27] sm:$0xff]  ;;  %v473_v7 = vld [vmem:[%s5715_s27 + $0x8] sm:$0xff]  ;;  %v474_v9 = vld [vmem:[%s5715_s27 + $0x10] sm:$0xff]  ;;  %s5610_s17 = smov 80  }
  0x13   : > { %v488_v8 = vpack.c.bf16 %v473_v7, %v472_v6  ;;  %v475_v10 = vld [vmem:[%s5715_s27 + $0x18] sm:$0xff]  ;;  %v476_v12 = vld [vmem:[%s5715_s27 + $0x20] sm:$0xff]  ;;  %v477_v13 = vld [vmem:[%s5715_s27 + $0x28] sm:$0xff] }
  0x14   : > { %v489_v11 = vpack.c.bf16 %v475_v10, %v474_v9  ;;  %v490_v14 = vpack.c.bf16 %v477_v13, %v476_v12  ;;  %v478_v15 = vld [vmem:[%s5715_s27 + $0x30] sm:$0xff]  ;;  %v479_v16 = vld [vmem:[%s5715_s27 + $0x38] sm:$0xff]  ;;  %607 = vmatpush.bf16.msra.mxu1 %v4875_v23  ;;  %v480_v24 = vld [vmem:[%s5715_s27 + $0x40] sm:$0xff] }
  0x15   : > { %4884 = vmatmul.msk.bf16.vlgmr.msra.gmra.mxu0 %vm526_vm0, %v488_v8  ;;  %v491_v17 = vpack.c.bf16 %v479_v16, %v478_v15  ;;  %v481_v25 = vld [vmem:[%s5715_s27 + $0x48] sm:$0xff]  ;;  %v482_v27 = vld [vmem:[%s5715_s27 + $0x50] sm:$0xff]  ;;  %v483_v28 = vld [vmem:[%s5715_s27 + $0x58] sm:$0xff] }
  0x16   : > { %v492_v26 = vpack.c.bf16 %v481_v25, %v480_v24  ;;  %v493_v29 = vpack.c.bf16 %v483_v28, %v482_v27  ;;  %v484_v30 = vld [vmem:[%s5715_s27 + $0x60] sm:$0xff]  ;;  %v485_v31 = vld [vmem:[%s5715_s27 + $0x68] sm:$0xff]  ;;  %v486_v33 = vld [vmem:[%s5715_s27 + $0x70] sm:$0xff] }
  0x17   : > { %4892 = vmatmul.msk.bf16.vlgmr.msra.gmra.mxu1 %vm526_vm0, %v488_v8  ;;  %v494_v32 = vpack.c.bf16 %v485_v31, %v484_v30  ;;  %v487_v34 = vld [vmem:[%s5715_s27 + $0x78] sm:$0xff] }
  0x18   : > { %v495_v35 = vpack.c.bf16 %v487_v34, %v486_v33 }
  0x25   : > { %4885 = vmatmul.msk.bf16.gmra.mxu0 %vm526_vm0, %v489_v11 }
  0x27   : > { %4893 = vmatmul.msk.bf16.gmra.mxu1 %vm526_vm0, %v489_v11 }
  0x35   : > { %4886 = vmatmul.msk.bf16.gmra.mxu0 %vm526_vm0, %v490_v14 }
  0x37   : > { %4894 = vmatmul.msk.bf16.gmra.mxu1 %vm526_vm0, %v490_v14 }
  0x45   : > { %4887 = vmatmul.msk.bf16.gmra.mxu0 %vm526_vm0, %v491_v17 }
  0x47   : > { %4895 = vmatmul.msk.bf16.gmra.mxu1 %vm526_vm0, %v491_v17 }
  0x55   : > { %4888 = vmatmul.msk.bf16.gmra.mxu0 %vm526_vm0, %v492_v26 }
  0x57   : > { %4896 = vmatmul.msk.bf16.gmra.mxu1 %vm526_vm0, %v492_v26 }
  0x65   : > { %4889 = vmatmul.msk.bf16.gmra.mxu0 %vm526_vm0, %v493_v29 }
  0x67   : > { %4897 = vmatmul.msk.bf16.gmra.mxu1 %vm526_vm0, %v493_v29 }
  0x75   : > { %4890 = vmatmul.msk.bf16.gmra.mxu0 %vm526_vm0, %v494_v32 }
  0x77   : > { %4898 = vmatmul.msk.bf16.gmra.mxu1 %vm526_vm0, %v494_v32 }
  0x85   : > { %4891 = vmatmul.msk.bf16.gmra.mxu0 %vm526_vm0, %v495_v35 }
  0x87   : > { %4899 = vmatmul.msk.bf16.gmra.mxu1 %vm526_vm0, %v495_v35 }
  0x92   : > { %v560_v36 = vpop.f32.mrf.mxu0 }
  0x93   : > { %v561_v47 = vadd.f32 %v560_v36, %v5765_v40 }
  0x94   : > { %v5819_v19 = vpop.f32.mrf.mxu1 }
  0x95   : > { %v681_v53 = vpack.c.bf16 %v561_v47, %v561_v47 }
  0x97   : > { %v721_v55 = vunpack.c.l.b16 %v681_v53 }
  0x9a   : > { %v562_v37 = vpop.f32.mrf.mxu0 }
  0x9b   : > { %v563_v45 = vadd.f32 %v562_v37, %v5765_v40 }
  0x9c   : > { %v5827_v21 = vpop.f32.mrf.mxu1 }
  0x9d   : > { %v682_v50 = vpack.c.bf16 %v563_v45, %v563_v45 }
  0x9f   : > { %v722_v54 = vunpack.c.l.b16 %v682_v50 }
  0xa1   : > { %v5777_v57 = vpack.c.b16 %v722_v54, %v721_v55 }
  0xa2   : > { %v565_v39 = vpop.f32.mrf.mxu0 }
  0xa3   : > { %v566_v41 = vadd.f32 %v565_v39, %v5765_v40 }
  0xa4   : > { %v614_v25 = vpop.f32.mrf.mxu1 }
  0xa5   : > { %v683_v43 = vpack.c.bf16 %v566_v41, %v566_v41 }
  0xa7   : > { %v723_v48 = vunpack.c.l.b16 %v683_v43 }
  0xaa   : > { %v567_v42 = vpop.f32.mrf.mxu0 }
  0xab   : > { %v568_v44 = vadd.f32 %v567_v42, %v5765_v40 }
  0xac   : > { %v616_v31 = vpop.f32.mrf.mxu1 }
  0xad   : > { %v684_v46 = vpack.c.bf16 %v568_v44, %v568_v44 }
  0xaf   : > { %v724_v49 = vunpack.c.l.b16 %v684_v46  ;;  %v5866_v46 = vperm.slane %v5762_v38, 1 }
  0xb1   : > { %v5772_v51 = vpack.c.b16 %v724_v49, %v723_v48 }
  0xb2   : > { %v570_v52 = vpop.f32.mrf.mxu0 }
  0xb3   : > { %735 = vrot.lane.b32.xlu1 %v5772_v51, %s5604_s25  ;;  %v571_v56 = vadd.f32 %v570_v52, %v5765_v40 }
  0xb4   : > { %v619_v34 = vpop.f32.mrf.mxu1 }
  0xb5   : > { %v685_v59 = vpack.c.bf16 %v571_v56, %v571_v56  ;;  %v620_v38 = vadd.f32 %v619_v34, %v5866_v46 }
  0xb7   : > { %v725_v62 = vunpack.c.l.b16 %v685_v59  ;;  %v617_v59 = vadd.f32 %v616_v31, %v5866_v46 }
  0xba   : > { %v572_v58 = vpop.f32.mrf.mxu0 }
  0xbb   : > { %v573_v60 = vadd.f32 %v572_v58, %v5765_v40  ;;  %733 = vrot.lane.b32.xlu1 %v5777_v57, %s5604_s25  ;;  %v615_v58 = vadd.f32 %v614_v25, %v5866_v46 }
  0xbc   : > { %v621_v37 = vpop.f32.mrf.mxu1 }
  0xbd   : > { %v686_v61 = vpack.c.bf16 %v573_v60, %v573_v60  ;;  %v622_v53 = vadd.f32 %v621_v37, %v5866_v46 }
  0xbf   : > { %v726_v63 = vunpack.c.l.b16 %v686_v61 }
  0xc1   : > { %v5783_v0 = vpack.c.b16 %v726_v63, %v725_v62  ;;  %v702_v63 = vpack.c.bf16 %v622_v53, %v622_v53 }
  0xc2   : > { %v575_v1 = vpop.f32.mrf.mxu0 }
  0xc3   : > { %1251 = vrot.lane.b32.xlu2 %v5783_v0, %s5605_s26  ;;  %1249 = vrot.lane.b32.xlu1 %v5772_v51, %s5605_s26  ;;  %v576_v2 = vadd.f32 %v575_v1, %v5765_v40 }
  0xc4   : > { %v624_v45 = vpop.f32.mrf.mxu1 }
  0xc5   : > { %v687_v4 = vpack.c.bf16 %v576_v2, %v576_v2  ;;  %v625_v49 = vadd.f32 %v624_v45, %v5866_v46 }
  0xc7   : > { %v727_v7 = vunpack.c.l.b16 %v687_v4  ;;  %v703_v54 = vpack.c.bf16 %v625_v49, %v625_v49  ;;  %v612_v4 = vadd.f32 %v5827_v21, %v5866_v46 }
  0xc9   : > { %v1103_v1 = vunpack.c.l.b16 %v703_v54 }
  0xca   : > { %v577_v3 = vpop.f32.mrf.mxu0 }
  0xcb   : > { %v578_v5 = vadd.f32 %v577_v3, %v5765_v40  ;;  %1247 = vrot.lane.b32.xlu2 %v5777_v57, %s5605_s26  ;;  %1241 = vrot.lane.b32.xlu1 %v5772_v51, %s5606_s28  ;;  %v610_v3 = vadd.f32 %v5819_v19, %v5866_v46 }
  0xcc   : > { %v626_v56 = vpop.f32.mrf.mxu1 }
  0xcd   : > { %v688_v6 = vpack.c.bf16 %v578_v5, %v578_v5  ;;  %v627_v60 = vadd.f32 %v626_v56, %v5866_v46  ;;  %v699_v5 = vpack.c.bf16 %v615_v58, %v615_v58 }
  0xcf   : > { %v728_v8 = vunpack.c.l.b16 %v688_v6  ;;  %v704_v2 = vpack.c.bf16 %v627_v60, %v627_v60  ;;  %v700_v6 = vpack.c.bf16 %v617_v59, %v617_v59  ;;  %v1099_v19 = vunpack.c.l.b16 %v699_v5 }
  0xd1   : > { %v5795_v9 = vpack.c.b16 %v728_v8, %v727_v7  ;;  %v1104_v7 = vunpack.c.l.b16 %v704_v2 }
  0xd2   : > { %v580_v10 = vpop.f32.mrf.mxu0 }
  0xd3   : > { %739 = vrot.lane.b32.xlu0 %v5795_v9, %s5604_s25  ;;  %1715 = vrot.lane.b32.xlu2 %v5777_v57, %s5607_s30  ;;  %v581_v11 = vadd.f32 %v580_v10, %v5765_v40 }
  0xd4   : > { %1725 = vrot.lane.b32.xlu1 %v5772_v51, %s5608_s15  ;;  %v5938_v34 = vpop.f32.mrf.mxu1 }
  0xd5   : > { %v689_v12 = vpack.c.bf16 %v581_v11, %v581_v11 }
  0xd7   : > { %v803_v15 = vunpack.c.l.b16 %v689_v12  ;;  %v1102_v12 = vunpack.c.l.b16 %v702_v63 }
  0xda   : > { %v582_v13 = vpop.f32.mrf.mxu0 }
  0xdb   : > { %v583_v14 = vadd.f32 %v582_v13, %v5765_v40  ;;  %737 = vrot.lane.b32.xlu0 %v5783_v0, %s5604_s25  ;;  %1719 = vrot.lane.b32.xlu2 %v5783_v0, %s5607_s30  ;;  %v5896_v13 = vpack.c.b16 %v1104_v7, %v1103_v1 }
  0xdc   : > { %2203 = vrot.lane.b32.xlu1 %v5783_v0, %s5609_s16 }
  0xdd   : > { %v690_v16 = vpack.c.bf16 %v583_v14, %v583_v14  ;;  %8624 = vst [vmem:[#allocation2_spill] sm:$0xff] %v5896_v13  ;;  %1129 = vmatpush.bf16.msra.mxu2 %v5896_v13 }
  0xdf   : > { %v804_v17 = vunpack.c.l.b16 %v690_v16  ;;  %v697_v16 = vpack.c.bf16 %v610_v3, %v610_v3 }
  0xe1   : > { %v5811_v18 = vpack.c.b16 %v804_v17, %v803_v15  ;;  %v698_v17 = vpack.c.bf16 %v612_v4, %v612_v4 }
  0xe2   : > { %v585_v20 = vpop.f32.mrf.mxu0 }
  0xe3   : > { %1239 = vrot.lane.b32.xlu0 %v5777_v57, %s5606_s28  ;;  %1316 = vrot.lane.b32.xlu2 %v5811_v18, %s5605_s26  ;;  %v586_v23 = vadd.f32 %v585_v20, %v5765_v40  ;;  %v1100_v20 = vunpack.c.l.b16 %v700_v6 }
  0xe4   : > { %1253 = vrot.lane.b32.xlu1 %v5795_v9, %s5605_s26 }
  0xe5   : > { %v691_v26 = vpack.c.bf16 %v586_v23, %v586_v23  ;;  %v1097_v23 = vunpack.c.l.b16 %v697_v16  ;;  %v5905_v25 = vpack.c.b16 %v1100_v20, %v1099_v19 }
  0xe7   : > { %v805_v29 = vunpack.c.l.b16 %v691_v26  ;;  %8626 = vst [vmem:[#allocation4_spill] sm:$0xff] %v5905_v25 }
  0xea   : > { %v587_v22 = vpop.f32.mrf.mxu0 }
  0xeb   : > { %1243 = vrot.lane.b32.xlu0 %v5783_v0, %s5606_s28  ;;  %1308 = vrot.lane.b32.xlu2 %v5811_v18, %s5606_s28  ;;  %v588_v24 = vadd.f32 %v587_v22, %v5765_v40 }
  0xec   : > { %1245 = vrot.lane.b32.xlu1 %v5795_v9, %s5606_s28 }
  0xed   : > { %v692_v27 = vpack.c.bf16 %v588_v24, %v588_v24  ;;  %v1098_v24 = vunpack.c.l.b16 %v698_v17 }
  0xef   : > { %v806_v30 = vunpack.c.l.b16 %v692_v27 }
  0xf1   : > { %v5843_v32 = vpack.c.b16 %v806_v30, %v805_v29 }
  0xf2   : > { %v590_v28 = vpop.f32.mrf.mxu0 }
  0xf3   : > { %1727 = vrot.lane.b32.xlu0 %v5783_v0, %s5608_s15  ;;  %2199 = vrot.lane.b32.xlu2 %v5777_v57, %s5609_s16  ;;  %v591_v35 = vadd.f32 %v590_v28, %v5765_v40  ;;  %v5916_v28 = vpack.c.b16 %v1098_v24, %v1097_v23 }
  0xf4   : > { %2205 = vrot.lane.b32.xlu1 %v5795_v9, %s5609_s16 }
  0xf5   : > { %v693_v41 = vpack.c.bf16 %v591_v35, %v591_v35 }
  0xf7   : > { %v807_v43 = vunpack.c.l.b16 %v693_v41  ;;  %v5951_v41 = vpop.f32.mrf.mxu1 }
  0xfa   : > { %v592_v33 = vpop.f32.mrf.mxu0 }
  0xfb   : > { %1723 = vrot.lane.b32.xlu0 %v5777_v57, %s5608_s15  ;;  %2195 = vrot.lane.b32.xlu2 %v5783_v0, %s5610_s17  ;;  %v593_v36 = vadd.f32 %v592_v33, %v5765_v40 }
  0xfc   : > { %1721 = vrot.lane.b32.xlu1 %v5795_v9, %s5607_s30 }
  0xfd   : > { %v694_v42 = vpack.c.bf16 %v593_v36, %v593_v36 }
  0xff   : > { %v808_v44 = vunpack.c.l.b16 %v694_v42 }
 0x101   : > { %v5868_v47 = vpack.c.b16 %v808_v44, %v807_v43 }
 0x102   : > { %v595_v39 = vpop.f32.mrf.mxu0 }
 0x103   : > { %1717 = vrot.lane.b32.xlu0 %v5772_v51, %s5607_s30  ;;  %1794 = vrot.lane.b32.xlu2 %v5843_v32, %s5608_s15  ;;  %v596_v50 = vadd.f32 %v595_v39, %v5765_v40 }
 0x104   : > { %815 = vrot.lane.b32.xlu1 %v5811_v18, %s5604_s25 }
 0x105   : > { %v695_v61 = vpack.c.bf16 %v596_v50, %v596_v50 }
 0x107   : > { %v809_v8 = vunpack.c.l.b16 %v695_v61 }
 0x10a   : > { %v597_v48 = vpop.f32.mrf.mxu0 }
 0x10b   : > { %1729 = vrot.lane.b32.xlu0 %v5795_v9, %s5608_s15  ;;  %1786 = vrot.lane.b32.xlu2 %v5843_v32, %s5607_s30  ;;  %v598_v52 = vadd.f32 %v597_v48, %v5765_v40  ;;  %v701_v40 = vpack.c.bf16 %v620_v38, %v620_v38  ;;  %v5962_v48 = vpop.f32.mrf.mxu1 }
 0x10c   : > { %1792 = vrot.lane.b32.xlu1 %v5811_v18, %s5608_s15 }
 0x10d   : > { %v696_v62 = vpack.c.bf16 %v598_v52, %v598_v52  ;;  %v1101_v11 = vunpack.c.l.b16 %v701_v40 }
 0x10f   : > { %v810_v10 = vunpack.c.l.b16 %v696_v62  ;;  %v5903_v22 = vpack.c.b16 %v1102_v12, %v1101_v11 }
 0x111   : > { %v5901_v21 = vpack.c.b16 %v810_v10, %v809_v8  ;;  %8625 = vst [vmem:[#allocation3_spill] sm:$0xff] %v5903_v22  ;;  %1130 = vmatpush.bf16.msra.mxu2 %v5903_v22 }
 0x113   : > { %817 = vrot.lane.b32.xlu0 %v5843_v32, %s5604_s25  ;;  %2262 = vrot.lane.b32.xlu2 %v5843_v32, %s5610_s17  ;;  %v5972_v54 = vpop.f32.mrf.mxu1 }
 0x114   : > { %2191 = vrot.lane.b32.xlu1 %v5777_v57, %s5610_s17 }
 0x115   : > { %1131 = vmatpush.bf16.msra.mxu2 %v5905_v25 }
 0x119   : > { %1132 = vmatpush.bf16.msra.mxu2 %v5916_v28 }
 0x11b   : > { %2201 = vrot.lane.b32.xlu0 %v5772_v51, %s5609_s16  ;;  %819 = vrot.lane.b32.xlu2 %v5868_v47, %s5604_s25  ;;  %v639_v62 = vpop.f32.mrf.mxu1 }
 0x11c   : > { %2197 = vrot.lane.b32.xlu1 %v5795_v9, %s5610_s17  ;;  %v640_v40 = vadd.f32 %v639_v62, %v5866_v46 }
 0x11d   : > { %v5881_v55 = vpop.permute.xlu2 %1251 }
 0x11e   : > { %v1274_v61 = vsel %vm741_vm1, %v5881_v55, 0  ;;  %v709_v3 = vpack.c.bf16 %v640_v40, %v640_v40 }
 0x120   : > { %v1186_v7 = vunpack.c.l.b16 %v709_v3 }
 0x123   : > { %1784 = vrot.lane.b32.xlu0 %v5811_v18, %s5607_s30  ;;  %1320 = vrot.lane.b32.xlu2 %v5868_v47, %s5605_s26  ;;  %v641_v4 = vpop.f32.mrf.mxu1 }
 0x124   : > { %2268 = vrot.lane.b32.xlu1 %v5811_v18, %s5609_s16  ;;  %v642_v5 = vadd.f32 %v641_v4, %v5866_v46 }
 0x125   : > { %v736_v14 = vpop.permute.xlu1 %735  ;;  %v5898_v15 = vpop.permute.xlu2 %1247 }
 0x126   : > { %v758_v38 = vsel %vm741_vm1, %v736_v14, 0  ;;  %v710_v6 = vpack.c.bf16 %v642_v5, %v642_v5 }
 0x128   : > { %v1187_v8 = vunpack.c.l.b16 %v710_v6 }
 0x12a   : > { %v6008_v14 = vpack.c.b16 %v1187_v8, %v1186_v7  ;;  %v635_v8 = vadd.f32 %v5962_v48, %v5866_v46 }
 0x12b   : > { %2193 = vrot.lane.b32.xlu0 %v5772_v51, %s5610_s17  ;;  %821 = vrot.lane.b32.xlu2 %v5901_v21, %s5604_s25  ;;  %v644_v16 = vpop.f32.mrf.mxu1 }
 0x12c   : > { %1318 = vrot.lane.b32.xlu1 %v5843_v32, %s5605_s26  ;;  %8627 = vst [vmem:[#allocation5_spill] sm:$0xff] %v6008_v14  ;;  %v645_v17 = vadd.f32 %v644_v16, %v5866_v46  ;;  %v707_v16 = vpack.c.bf16 %v635_v8, %v635_v8  ;;  %v6145_v8 = vld [vmem:[%s8587_s5 + $0x48] sm:$0xff] }
 0x12d   : > { %v5914_v26 = vpop.permute.xlu2 %1715  ;;  %v734_v27 = vpop.permute.xlu1 %733 }
 0x12e   : > { %v755_v60 = vsel %vm741_vm1, %v734_v27, 0 }
 0x133   : > { %2260 = vrot.lane.b32.xlu0 %v5811_v18, %s5610_s17  ;;  %2264 = vrot.lane.b32.xlu2 %v5868_v47, %s5610_s17  ;;  %v646_v24 = vpop.f32.mrf.mxu1 }
 0x134   : > { %1310 = vrot.lane.b32.xlu1 %v5843_v32, %s5606_s28  ;;  %v647_v27 = vadd.f32 %v646_v24, %v5866_v46 }
 0x135   : > { %v5926_v29 = vpop.permute.xlu2 %1719  ;;  %v1250_v30 = vpop.permute.xlu1 %1249 }
 0x136   : > { %v1271_v55 = vsel %vm741_vm1, %v1250_v30, 0 }
 0x13b   : > { %1796 = vrot.lane.b32.xlu0 %v5868_v47, %s5608_s15  ;;  %1322 = vrot.lane.b32.xlu2 %v5901_v21, %s5605_s26 }
 0x13c   : > { %2270 = vrot.lane.b32.xlu1 %v5843_v32, %s5609_s16 }
 0x13d   : > { %v5934_v31 = vpop.permute.xlu2 %1316  ;;  %v5936_v33 = vpop.permute.xlu1 %1241 }
 0x143   : > { %1593 = vrot.lane.b32.xlu0 %v5903_v22, %s5606_s28  ;;  %2266 = vrot.lane.b32.xlu2 %v5901_v21, %s5610_s17 }
 0x144   : > { %1312 = vrot.lane.b32.xlu1 %v5868_v47, %s5606_s28 }
 0x145   : > { %v740_v35 = vpop.permute.xlu0 %739  ;;  %v5946_v36 = vpop.permute.xlu2 %1308 }
 0x146   : > { %v5948_v37 = vpop.permute.xlu1 %1725  ;;  %v764_v39 = vsel %vm741_vm1, %v740_v35, 0  ;;  %v712_v35 = vpack.c.bf16 %v647_v27, %v647_v27 }
 0x147   : > { %770 = vmatpush.bf16.xpose.msra.mxu3 %v764_v39  ;;  %v1747_v4 = vsel %vm741_vm1, %v5948_v37, 0 }
 0x148   : > { %v1189_v39 = vunpack.c.l.b16 %v712_v35 }
 0x14b   : > { %1798 = vrot.lane.b32.xlu0 %v5901_v21, %s5608_s15 }
 0x14c   : > { %1788 = vrot.lane.b32.xlu1 %v5868_v47, %s5607_s30 }
 0x14d   : > { %v738_v42 = vpop.permute.xlu0 %737  ;;  %v5957_v43 = vpop.permute.xlu2 %2199 }
 0x14e   : > { %v5959_v44 = vpop.permute.xlu1 %2203  ;;  %v761_v45 = vsel %vm741_vm1, %v738_v42, 0 }
 0x14f   : > { %771 = vmatpush.bf16.xpose.msra.mxu3 %v761_v45  ;;  %v2226_v27 = vsel %vm741_vm1, %v5959_v44, 0 }
 0x153   : > { %1314 = vrot.lane.b32.xlu0 %v5901_v21, %s5606_s28 }
 0x154   : > { %2272 = vrot.lane.b32.xlu1 %v5868_v47, %s5609_s16 }
 0x155   : > { %v1240_v49 = vpop.permute.xlu0 %1239  ;;  %v5968_v50 = vpop.permute.xlu2 %2195 }
 0x156   : > { %v1254_v52 = vpop.permute.xlu1 %1253 }
 0x157   : > { %772 = vmatpush.bf16.xpose.msra.mxu3 %v758_v38  ;;  %v1277_v53 = vsel %vm741_vm1, %v1254_v52, 0 }
 0x158   : > { %1283 = vmatpush.bf16.xpose.msrb.mxu0 %v1277_v53  ;;  %5070 = vmatpush.bf16.xpose.msrb.mxu2 %v1277_v53 }
 0x15b   : > { %2274 = vrot.lane.b32.xlu0 %v5901_v21, %s5609_s16 }
 0x15c   : > { %1595 = vrot.lane.b32.xlu1 %v5896_v13, %s5606_s28 }
 0x15d   : > { %v5978_v56 = vpop.permute.xlu0 %1243  ;;  %v5980_v58 = vpop.permute.xlu2 %1794 }
 0x15e   : > { %v5982_v59 = vpop.permute.xlu1 %1245 }
 0x15f   : > { %773 = vmatpush.bf16.xpose.msra.mxu3 %v755_v60 }
 0x160   : > { %1284 = vmatpush.bf16.xpose.msrb.mxu0 %v1274_v61  ;;  %5071 = vmatpush.bf16.xpose.msrb.mxu2 %v1274_v61 }
 0x163   : > { %1589 = vrot.lane.b32.xlu0 %v5916_v28, %s5606_s28 }
 0x164   : > { %1790 = vrot.lane.b32.xlu1 %v5901_v21, %s5607_s30 }
 0x165   : > { %v1728_v63 = vpop.permute.xlu0 %1727  ;;  %v5992_v1 = vpop.permute.xlu2 %1786 }
 0x166   : > { %v5994_v2 = vpop.permute.xlu1 %2205  ;;  %4900 = vmatmul.msk.bf16.vlgmr.msra.gmra.mxu3 %vm741_vm1, %v5777_v57  ;;  %v1268_v57 = vsel %vm741_vm1, %v5898_v15, 0  ;;  %v711_v15 = vpack.c.bf16 %v645_v17, %v645_v17  ;;  %v1750_v62 = vsel %vm741_vm1, %v1728_v63, 0 }
 0x167   : > { %v2229_v37 = vsel %vm741_vm1, %v5994_v2, 0  ;;  %v632_v2 = vadd.f32 %v5951_v41, %v5866_v46 }
 0x168   : > { %1285 = vmatpush.bf16.xpose.msrb.mxu0 %v1271_v55  ;;  %5072 = vmatpush.bf16.xpose.msrb.mxu2 %v1271_v55  ;;  %v1188_v30 = vunpack.c.l.b16 %v711_v15 }
 0x16a   : > { %v6024_v53 = vpack.c.b16 %v1189_v39, %v1188_v30  ;;  %v706_v30 = vpack.c.bf16 %v632_v2, %v632_v2  ;;  %v6167_v2 = vld [vmem:[%s8587_s5 + $0x50] sm:$0xff] }
 0x16b   : > { %1666 = vrot.lane.b32.xlu0 %v6008_v14, %s5606_s28 }
 0x16c   : > { %1591 = vrot.lane.b32.xlu1 %v5905_v25, %s5606_s28  ;;  %8628 = vst [vmem:[#allocation6_spill] sm:$0xff] %v6024_v53  ;;  %1668 = vrot.lane.b32.xlu2 %v6024_v53, %s5606_s28  ;;  %v1183_v35 = vunpack.c.l.b16 %v706_v30  ;;  %v6188_v30 = vld [vmem:[%s8587_s5 + $0x58] sm:$0xff] }
 0x16d   : > { %v1724_v10 = vpop.permute.xlu0 %1723  ;;  %v6002_v11 = vpop.permute.xlu2 %2262 }
 0x16e   : > { %v6004_v12 = vpop.permute.xlu1 %1721  ;;  %v1744_v7 = vsel %vm741_vm1, %v1724_v10, 0  ;;  %v630_v10 = vadd.f32 %v5938_v34, %v5866_v46 }
 0x170   : > { %1286 = vmatpush.bf16.xpose.msrb.mxu0 %v1268_v57  ;;  %5073 = vmatpush.bf16.xpose.msrb.mxu2 %v1268_v57  ;;  %v637_v57 = vadd.f32 %v5972_v54, %v5866_v46  ;;  %v1184_v54 = vunpack.c.l.b16 %v707_v16  ;;  %v705_v34 = vpack.c.bf16 %v630_v10, %v630_v10 }
 0x172   : > { %v708_v17 = vpack.c.bf16 %v637_v57, %v637_v57 }
 0x174   : > { %2071 = vrot.lane.b32.xlu1 %v5896_v13, %s5607_s30  ;;  %v1185_v24 = vunpack.c.l.b16 %v708_v17 }
 0x175   : > { %v6015_v19 = vpop.permute.xlu0 %1717  ;;  %v820_v20 = vpop.permute.xlu2 %819 }
 0x176   : > { %v816_v23 = vpop.permute.xlu1 %815  ;;  %4901 = vmatmul.msk.bf16.gmra.mxu3 %vm741_vm1, %v5772_v51  ;;  %v842_v3 = vsel %vm741_vm1, %v820_v20, 0  ;;  %v6071_v46 = vpack.c.b16 %v1185_v24, %v1184_v54 }
 0x177   : > { %4916 = vmatmul.msk.bf16.vlgmr.msrb.gmra.mxu0 %vm741_vm1, %v1240_v49  ;;  %v836_v15 = vsel %vm741_vm1, %v816_v23, 0  ;;  %v1182_v23 = vunpack.c.l.b16 %v705_v34 }
 0x17d   : > { %v1730_v42 = vpop.permute.xlu0 %1729  ;;  %v1321_v45 = vpop.permute.xlu2 %1320 }
 0x17e   : > { %v1753_v52 = vsel %vm741_vm1, %v1730_v42, 0  ;;  %v6022_v38 = vpop.permute.xlu1 %1792  ;;  %v1343_v48 = vsel %vm741_vm1, %v1321_v45, 0  ;;  %v6081_v42 = vpack.c.b16 %v1183_v35, %v1182_v23 }
 0x17f   : > { %1759 = vmatpush.bf16.xpose.msra.mxu0 %v1753_v52  ;;  %v2220_v52 = vsel %vm741_vm1, %v5957_v43, 0 }
 0x185   : > { %v818_v51 = vpop.permute.xlu0 %817  ;;  %v822_v49 = vpop.permute.xlu2 %821 }
 0x186   : > { %v6028_v60 = vpop.permute.xlu1 %2191  ;;  %4902 = vmatmul.msk.bf16.gmra.mxu3 %vm741_vm1, %v5783_v0  ;;  %v845_v61 = vsel %vm741_vm1, %v822_v49, 0 }
 0x187   : > { %4917 = vmatmul.msk.bf16.gmra.mxu0 %vm741_vm1, %v5936_v33  ;;  %851 = vmatpush.bf16.xpose.msrb.mxu3 %v845_v61  ;;  %v839_v33 = vsel %vm741_vm1, %v818_v51, 0 }
 0x188   : > { %1760 = vmatpush.bf16.xpose.msra.mxu0 %v1750_v62  ;;  %v1816_v62 = vsel %vm741_vm1, %v5980_v58, 0 }
 0x18d   : > { %v2202_v40 = vpop.permute.xlu0 %2201  ;;  %v6036_v55 = vpop.permute.xlu2 %2264 }
 0x18e   : > { %v6041_v5 = vpop.permute.xlu1 %2197  ;;  %v2223_v44 = vsel %vm741_vm1, %v2202_v40, 0 }
 0x18f   : > { %852 = vmatpush.bf16.xpose.msrb.mxu3 %v842_v3 }
 0x190   : > { %1761 = vmatpush.bf16.xpose.msra.mxu0 %v1747_v4 }
 0x195   : > { %v6043_v0 = vpop.permute.xlu0 %1784  ;;  %v1323_v6 = vpop.permute.xlu2 %1322 }
 0x196   : > { %4903 = vmatmul.msk.bf16.gmra.mxu3 %vm741_vm1, %v5795_v9  ;;  %v1346_v63 = vsel %vm741_vm1, %v1323_v6, 0  ;;  %v6056_v9 = vpop.permute.xlu1 %2268 }
 0x197   : > { %853 = vmatpush.bf16.xpose.msrb.mxu3 %v839_v33  ;;  %1352 = vmatpush.bf16.xpose.msrb.mxu1 %v1346_v63 }
 0x198   : > { %1762 = vmatpush.bf16.xpose.msra.mxu0 %v1744_v7  ;;  %v6140_v7 = vld [vmem:[%s8587_s5] sm:$0xff] }
 0x19d   : > { %v6058_v20 = vpop.permute.xlu0 %2193 }
 0x19e   : > { %v1319_v41 = vpop.permute.xlu1 %1318 }
 0x19f   : > { %4932 = vmatmul.msk.bf16.vlgmr.msra.gmra.mxu0 %vm741_vm1, %v5914_v26  ;;  %854 = vmatpush.bf16.xpose.msrb.mxu3 %v836_v15  ;;  %v1340_v39 = vsel %vm741_vm1, %v1319_v41, 0 }
 0x1a0   : > { %2235 = vmatpush.bf16.xpose.msrb.mxu0 %v2229_v37  ;;  %1353 = vmatpush.bf16.xpose.msrb.mxu1 %v1343_v48 }
 0x1a5   : > { %v6074_v26 = vpop.permute.xlu0 %2260 }
 0x1a6   : > { %4904 = vmatmul.msk.bf16.vlgmr.msrb.gmra.mxu3 %vm741_vm1, %v5811_v18  ;;  %v1337_v18 = vsel %vm741_vm1, %v5934_v31, 0  ;;  %v1311_v51 = vpop.permute.xlu1 %1310 }
 0x1a7   : > { %1214 = vmatpush.bf16.msra.mxu3 %v6024_v53 }
 0x1a8   : > { %2236 = vmatpush.bf16.xpose.msrb.mxu0 %v2226_v27  ;;  %1354 = vmatpush.bf16.xpose.msrb.mxu1 %v1340_v39  ;;  %v6183_v27 = vld [vmem:[%s8587_s5 + $0x10] sm:$0xff] }
 0x1ab   : > { %1215 = vmatpush.bf16.msra.mxu3 %v6008_v14 }
 0x1ad   : > { %v1797_v45 = vpop.permute.xlu0 %1796 }
 0x1ae   : > { %v2271_v31 = vpop.permute.xlu1 %2270 }
 0x1af   : > { %1216 = vmatpush.bf16.msra.mxu3 %v6071_v46  ;;  %4933 = vmatmul.msk.bf16.gmra.mxu0 %vm741_vm1, %v6015_v19 }
 0x1b0   : > { %2237 = vmatpush.bf16.xpose.msrb.mxu0 %v2223_v44  ;;  %1355 = vmatpush.bf16.xpose.msrb.mxu1 %v1337_v18 }
 0x1b3   : > { %1217 = vmatpush.bf16.msra.mxu3 %v6081_v42 }
 0x1b5   : > { %v6090_v49 = vpop.permute.xlu0 %1593 }
 0x1b6   : > { %4905 = vmatmul.msk.bf16.gmra.mxu3 %vm741_vm1, %v5843_v32  ;;  %v1819_v32 = vsel %vm741_vm1, %v1797_v45, 0  ;;  %v1313_v43 = vpop.permute.xlu1 %1312 }
 0x1b7   : > { %5074 = vmatpush.bf16.xpose.msrb.mxu3 %v1346_v63  ;;  %4920 = vmatmul.msk.bf16.vlgmr.msrb.gmra.mxu1 %vm741_vm1, %v5946_v36 }
 0x1b8   : > { %2238 = vmatpush.bf16.xpose.msrb.mxu0 %v2220_v52  ;;  %v6212_v52 = vld [vmem:[%s8587_s5 + $0x18] sm:$0xff] }
 0x1bd   : > { %v1799_v61 = vpop.permute.xlu0 %1798 }
 0x1be   : > { %v1822_v19 = vsel %vm741_vm1, %v1799_v61, 0 }
 0x1bf   : > { %5075 = vmatpush.bf16.xpose.msrb.mxu3 %v1343_v48  ;;  %4934 = vmatmul.msk.bf16.gmra.mxu0 %vm741_vm1, %v5926_v29  ;;  %v1789_v29 = vpop.permute.xlu1 %1788 }
 0x1c0   : > { %1828 = vmatpush.bf16.xpose.msra.mxu1 %v1822_v19 }
 0x1c5   : > { %v6103_v36 = vpop.permute.xlu0 %1314 }
 0x1c6   : > { %4906 = vmatmul.msk.bf16.gmra.mxu3 %vm741_vm1, %v5868_v47  ;;  %8629 = vst [vmem:[#allocation7_spill] sm:$0xff] %v6103_v36  ;;  %v1813_v47 = vsel %vm741_vm1, %v6022_v38, 0  ;;  %v2289_v38 = vsel %vm741_vm1, %v6056_v9, 0 }
 0x1c7   : > { %5076 = vmatpush.bf16.xpose.msrb.mxu3 %v1340_v39  ;;  %4921 = vmatmul.msk.bf16.gmra.mxu1 %vm741_vm1, %v1311_v51  ;;  %v2273_v4 = vpop.permute.xlu1 %2272 }
 0x1c8   : > { %1829 = vmatpush.bf16.xpose.msra.mxu1 %v1819_v32  ;;  %v2295_v58 = vsel %vm741_vm1, %v2273_v4, 0 }
 0x1cd   : > { %v2275_v40 = vpop.permute.xlu0 %2274 }
 0x1ce   : > { %v2298_v3 = vsel %vm741_vm1, %v2275_v40, 0  ;;  %v6236_v40 = vld [vmem:[%s8587_s5 + $0x80] sm:$0xff] }
 0x1cf   : > { %5077 = vmatpush.bf16.xpose.msrb.mxu3 %v1337_v18  ;;  %4935 = vmatmul.msk.bf16.gmra.mxu0 %vm741_vm1, %v6004_v12  ;;  %v6193_v23 = vpop.permute.xlu1 %1595  ;;  %v6207_v18 = vld [vmem:[%s8587_s5 + $0x28] sm:$0xff] }
 0x1d0   : > { %1830 = vmatpush.bf16.xpose.msra.mxu1 %v1816_v62 }
 0x1d5   : > { %v6394_v14 = vpop.permute.xlu0 %1589 }
 0x1d6   : > { %4907 = vmatmul.msk.bf16.gmra.mxu3 %vm741_vm1, %v5901_v21  ;;  %v2292_v21 = vsel %vm741_vm1, %v2271_v31, 0 }
 0x1d7   : > { %4922 = vmatmul.msk.bf16.gmra.mxu1 %vm741_vm1, %v1313_v43  ;;  %v1791_v31 = vpop.permute.xlu1 %1790  ;;  %v6228_v43 = vld [vmem:[%s8587_s5 + $0x30] sm:$0xff] }
 0x1d8   : > { %1831 = vmatpush.bf16.xpose.msra.mxu1 %v1813_v47 }
 0x1df   : > { %4948 = vmatmul.msk.bf16.vlgmr.msrb.gmra.mxu0 %vm741_vm1, %v6028_v60  ;;  %v6128_v60 = vld [vmem:[%s8587_s5 + $0x40] sm:$0xff] }
 0x1e0   : > { %2304 = vmatpush.bf16.xpose.msrb.mxu1 %v2298_v3 }
 0x1e7   : > { %4936 = vmatmul.msk.bf16.vlgmr.msra.gmra.mxu1 %vm741_vm1, %v6043_v0 }
 0x1e8   : > { %2305 = vmatpush.bf16.xpose.msrb.mxu1 %v2295_v58 }
 0x1e9   : > { %v775_v12 = vpop.f32.mrf.mxu3 }
 0x1ea   : > { %v6148_v57 = vadd.f32 %v775_v12, %v6140_v7 }
 0x1ec   : > { %v877_v17 = vsel %vm876_vm2, %v6148_v57, -inf }
 0x1ef   : > { %4949 = vmatmul.msk.bf16.gmra.mxu0 %vm741_vm1, %v6058_v20  ;;  %v6162_v20 = vld [vmem:[%s8587_s5 + $0x8] sm:$0xff] }
 0x1f0   : > { %2306 = vmatpush.bf16.xpose.msrb.mxu1 %v2292_v21  ;;  %v6248_v21 = vld [vmem:[%s8587_s5 + $0x20] sm:$0xff] }
 0x1f1   : > { %v777_v6 = vpop.f32.mrf.mxu3 }
 0x1f4   : > { %v1288_v33 = vpop.f32.mrf.mxu0 }
 0x1f5   : > { %v6131_v0 = vadd.f32 %v1288_v33, %v6128_v60 }
 0x1f7   : > { %4937 = vmatmul.msk.bf16.gmra.mxu1 %vm741_vm1, %v5992_v1  ;;  %v1377_v63 = vsel %vm876_vm2, %v6131_v0, -inf }
 0x1f8   : > { %2307 = vmatpush.bf16.xpose.msrb.mxu1 %v2289_v38  ;;  %1378 = vmax.xlane.f32.xlu2 %v1377_v63  ;;  %v6260_v63 = vld [vmem:[%s8587_s5 + $0x88] sm:$0xff] }
 0x1f9   : > { %v780_v37 = vpop.f32.mrf.mxu3 }
 0x1fa   : > { %v6191_v41 = vadd.f32 %v780_v37, %v6183_v27 }
 0x1fc   : > { %v1290_v9 = vpop.f32.mrf.mxu0  ;;  %v883_v44 = vsel %vm876_vm2, %v6191_v41, -inf }
 0x1fd   : > { %v6151_v1 = vadd.f32 %v1290_v9, %v6145_v8  ;;  %v6265_v9 = vld [vmem:[%s8587_s5 + $0x90] sm:$0xff] }
 0x1ff   : > { %4950 = vmatmul.msk.bf16.gmra.mxu0 %vm741_vm1, %v5968_v50  ;;  %v1380_v16 = vsel %vm876_vm2, %v6151_v1, -inf  ;;  %v6170_v50 = vadd.f32 %v777_v6, %v6162_v20 }
 0x200   : > { %1381 = vmax.xlane.f32.xlu0 %v1380_v16  ;;  %878 = vmax.xlane.f32.xlu2 %v877_v17 }
 0x201   : > { %v782_v10 = vpop.f32.mrf.mxu3  ;;  %v880_v24 = vsel %vm876_vm2, %v6170_v50, -inf }
 0x202   : > { %v6218_v61 = vadd.f32 %v782_v10, %v6212_v52 }
 0x204   : > { %v1293_v15 = vpop.f32.mrf.mxu0  ;;  %v886_v32 = vsel %vm876_vm2, %v6218_v61, -inf }
 0x205   : > { %v6173_v48 = vadd.f32 %v1293_v15, %v6167_v2 }
 0x207   : > { %4938 = vmatmul.msk.bf16.gmra.mxu1 %vm741_vm1, %v1789_v29  ;;  %v1383_v54 = vsel %vm876_vm2, %v6173_v48, -inf }
 0x208   : > { %1384 = vmax.xlane.f32.xlu1 %v1383_v54  ;;  %881 = vmax.xlane.f32.xlu0 %v880_v24  ;;  %v6280_v54 = vld [vmem:[%s8587_s5 + $0x38] sm:$0xff] }
 0x209   : > { %v785_v34 = vpop.f32.mrf.mxu3 }
 0x20a   : > { %v6251_v38 = vadd.f32 %v785_v34, %v6248_v21  ;;  %v6285_v34 = vld [vmem:[%s8587_s5 + $0x98] sm:$0xff] }
 0x20c   : > { %v1295_v35 = vpop.f32.mrf.mxu0  ;;  %v889_v33 = vsel %vm876_vm2, %v6251_v38, -inf }
 0x20d   : > { %v6196_v39 = vadd.f32 %v1295_v35, %v6188_v30 }
 0x20f   : > { %4951 = vmatmul.msk.bf16.gmra.mxu0 %vm741_vm1, %v6041_v5  ;;  %v1386_v45 = vsel %vm876_vm2, %v6196_v39, -inf }
 0x210   : > { %884 = vmax.xlane.f32.xlu1 %v883_v44  ;;  %1387 = vmax.xlane.f32.xlu2 %v1386_v45 }
 0x211   : > { %v787_v51 = vpop.f32.mrf.mxu3 }
 0x212   : > { %v6215_v5 = vadd.f32 %v787_v51, %v6207_v18 }
 0x214   : > { %v892_v19 = vsel %vm876_vm2, %v6215_v5, -inf }
 0x215   : > { %893 = vmax.xlane.f32.xlu0 %v892_v19 }
 0x217   : > { %4939 = vmatmul.msk.bf16.gmra.mxu1 %vm741_vm1, %v1791_v31 }
 0x218   : > { %887 = vmax.xlane.f32.xlu2 %v886_v32 }
 0x219   : > { %v790_v62 = vpop.f32.mrf.mxu3 }
 0x21a   : > { %v6231_v29 = vadd.f32 %v790_v62, %v6228_v43 }
 0x21c   : > { %v1764_v47 = vpop.f32.mrf.mxu0  ;;  %v895_v3 = vsel %vm876_vm2, %v6231_v29, -inf }
 0x21d   : > { %v6241_v4 = vadd.f32 %v1764_v47, %v6236_v40  ;;  %896 = vmax.xlane.f32.xlu1 %v895_v3  ;;  %v6307_v47 = vld [vmem:[%s8587_s5 + $0xa0] sm:$0xff] }
 0x21e   : > { %8630 = vst [vmem:[#allocation8_spill] sm:$0xff] %v6307_v47 }
 0x21f   : > { %v1853_v58 = vsel %vm876_vm2, %v6241_v4, -inf }
 0x220   : > { %1854 = vmax.xlane.f32.xlu2 %v1853_v58 }
 0x221   : > { %v792_v12 = vpop.f32.mrf.mxu3 }
 0x222   : > { %v6288_v35 = vadd.f32 %v792_v12, %v6280_v54 }
 0x224   : > { %v1766_v6 = vpop.f32.mrf.mxu0  ;;  %v898_v32 = vsel %vm876_vm2, %v6288_v35, -inf }
 0x225   : > { %v6268_v16 = vadd.f32 %v1766_v6, %v6260_v63 }
 0x227   : > { %4952 = vmatmul.msk.bf16.vlgmr.msrb.gmra.mxu1 %vm741_vm1, %v6074_v26  ;;  %v1856_v15 = vsel %vm876_vm2, %v6268_v16, -inf }
 0x228   : > { %890 = vmax.xlane.f32.xlu2 %v889_v33 }
 0x229   : > { %v856_v37 = vpop.f32.mrf.mxu3 }
 0x22c   : > { %v1769_v17 = vpop.f32.mrf.mxu0 }
 0x22d   : > { %v6271_v26 = vadd.f32 %v1769_v17, %v6265_v9 }
 0x22f   : > { %v1859_v10 = vsel %vm876_vm2, %v6271_v26, -inf }
 0x230   : > { %1860 = vmax.xlane.f32.xlu0 %v1859_v10  ;;  %1857 = vmax.xlane.f32.xlu2 %v1856_v15  ;;  %v6330_v15 = vadd.f32 %v856_v37, %v6140_v7  ;;  %v6349_v37 = vld [vmem:[%s8587_s5 + $0xb0] sm:$0xff] }
 0x231   : > { %v858_v24 = vpop.f32.mrf.mxu3  ;;  %8631 = vst [vmem:[#allocation9_spill] sm:$0xff] %v6349_v37 }
 0x234   : > { %v1357_v44 = vpop.f32.mrf.mxu1  ;;  %v1771_v45 = vpop.f32.mrf.mxu0 }
 0x235   : > { %v6291_v51 = vadd.f32 %v1357_v44, %v6128_v60  ;;  %v6294_v19 = vadd.f32 %v1771_v45, %v6285_v34 }
 0x237   : > { %4953 = vmatmul.msk.bf16.gmra.mxu1 %vm741_vm1, %v6002_v11  ;;  %v1862_v31 = vsel %vm876_vm2, %v6294_v19, -inf  ;;  %v1401_v62 = vsel %vm876_vm2, %v6291_v51, -inf  ;;  %v6310_v11 = vadd.f32 %v858_v24, %v6162_v20 }
 0x238   : > { %1863 = vmax.xlane.f32.xlu1 %v1862_v31  ;;  %899 = vmax.xlane.f32.xlu2 %v898_v32  ;;  %v901_v32 = vsel %vm876_vm2, %v6330_v15, -inf }
 0x239   : > { %1402 = vmax.xlane.f32.xlu0 %v1401_v62  ;;  %v861_v60 = vpop.f32.mrf.mxu3  ;;  %v904_v20 = vsel %vm876_vm2, %v6310_v11, -inf }
 0x23a   : > { %v6333_v24 = vadd.f32 %v861_v60, %v6183_v27 }
 0x23c   : > { %v1359_v3 = vpop.f32.mrf.mxu1  ;;  %v1774_v58 = vpop.f32.mrf.mxu0  ;;  %v907_v7 = vsel %vm876_vm2, %v6333_v24, -inf }
 0x23d   : > { %v6313_v12 = vadd.f32 %v1359_v3, %v6145_v8  ;;  %v6316_v6 = vadd.f32 %v1774_v58, %v6307_v47  ;;  %v6327_v8 = vld [vmem:[%s8587_s5 + $0xa8] sm:$0xff] }
 0x23f   : > { %v1865_v33 = vsel %vm876_vm2, %v6316_v6, -inf  ;;  %v1404_v17 = vsel %vm876_vm2, %v6313_v12, -inf }
 0x240   : > { %1866 = vmax.xlane.f32.xlu2 %v1865_v33  ;;  %1405 = vmax.xlane.f32.xlu1 %v1404_v17 }
 0x241   : > { %905 = vmax.xlane.f32.xlu0 %v904_v20  ;;  %v863_v10 = vpop.f32.mrf.mxu3 }
 0x244   : > { %v1362_v44 = vpop.f32.mrf.mxu1  ;;  %v1776_v45 = vpop.f32.mrf.mxu0 }
 0x245   : > { %v6336_v31 = vadd.f32 %v1776_v45, %v6327_v8 }
 0x247   : > { %4954 = vmatmul.msk.bf16.gmra.mxu1 %vm741_vm1, %v6036_v55  ;;  %v1868_v62 = vsel %vm876_vm2, %v6336_v31, -inf  ;;  %v6352_v55 = vadd.f32 %v1362_v44, %v6167_v2 }
 0x248   : > { %902 = vmax.xlane.f32.xlu2 %v901_v32  ;;  %1869 = vmax.xlane.f32.xlu1 %v1868_v62 }
 0x249   : > { %908 = vmax.xlane.f32.xlu0 %v907_v7  ;;  %v866_v27 = vpop.f32.mrf.mxu3  ;;  %v1407_v20 = vsel %vm876_vm2, %v6352_v55, -inf  ;;  %v2267_v7 = vpop.permute.xlu2 %2266 }
 0x24a   : > { %v6355_v60 = vadd.f32 %v866_v27, %v6248_v21  ;;  %v661_v21 = vld [vmem:[%s8587_s5 + $0x60] sm:$0xff] }
 0x24c   : > { %v1364_v3 = vpop.f32.mrf.mxu1  ;;  %v1779_v58 = vpop.f32.mrf.mxu0  ;;  %v913_v45 = vsel %vm876_vm2, %v6355_v60, -inf }
 0x24d   : > { %v6358_v33 = vadd.f32 %v1779_v58, %v6349_v37  ;;  %v6370_v44 = vadd.f32 %v1364_v3, %v6188_v30 }
 0x24f   : > { %8632 = vst [vmem:[#allocation10_spill] sm:$0xff] %v6358_v33  ;;  %v1871_v17 = vsel %vm876_vm2, %v6358_v33, -inf  ;;  %v1410_v27 = vsel %vm876_vm2, %v6370_v44, -inf }
 0x250   : > { %1872 = vmax.xlane.f32.xlu2 %v1871_v17  ;;  %1408 = vmax.xlane.f32.xlu1 %v1407_v20  ;;  %v6382_v17 = vld [vmem:[%s8587_s5 + $0xb8] sm:$0xff] }
 0x251   : > { %914 = vmax.xlane.f32.xlu0 %v913_v45  ;;  %v868_v2 = vpop.f32.mrf.mxu3  ;;  %8633 = vst [vmem:[#allocation11_spill] sm:$0xff] %v6382_v17 }
 0x252   : > { %v6423_v33 = vadd.f32 %v868_v2, %v6207_v18 }
 0x254   : > { %v1367_v32 = vpop.f32.mrf.mxu1  ;;  %v1781_v20 = vpop.f32.mrf.mxu0 }
 0x255   : > { %v6372_v62 = vadd.f32 %v1367_v32, %v661_v21  ;;  %v6385_v3 = vadd.f32 %v1781_v20, %v6382_v17  ;;  %v6402_v20 = vpop.permute.xlu2 %1668 }
 0x256   : > { %8634 = vst [vmem:[#allocation12_spill] sm:$0xff] %v6402_v20 }
 0x257   : > { %4955 = vmatmul.msk.bf16.gmra.mxu1 %vm741_vm1, %v2267_v7  ;;  %v1413_v58 = vsel %vm876_vm2, %v6372_v62, -inf  ;;  %v1874_v21 = vsel %vm876_vm2, %v6385_v3, -inf }
 0x258   : > { %1411 = vmax.xlane.f32.xlu1 %v1410_v27  ;;  %1414 = vmax.xlane.f32.xlu2 %v1413_v58  ;;  %v6397_v27 = vadd.f32 %v863_v10, %v6212_v52  ;;  %v6411_v52 = vpop.permute.xlu1 %1591 }
 0x259   : > { %v871_v30 = vpop.f32.mrf.mxu3 }
 0x25a   : > { %v6388_v45 = vadd.f32 %v871_v30, %v6228_v43  ;;  %v910_v43 = vsel %vm876_vm2, %v6397_v27, -inf }
 0x25c   : > { %v919_v32 = vsel %vm876_vm2, %v6388_v45, -inf }
 0x260   : > { %1875 = vmax.xlane.f32.xlu1 %v1874_v21  ;;  %920 = vmax.xlane.f32.xlu2 %v919_v32  ;;  %v662_v21 = vld [vmem:[%s8587_s5 + $0x68] sm:$0xff]  ;;  %v1369_v32 = vpop.f32.mrf.mxu1  ;;  %v6420_v13 = vpop.permute.xlu1 %2071 }
 0x261   : > { %v873_v7 = vpop.f32.mrf.mxu3  ;;  %v6413_v10 = vadd.f32 %v1369_v32, %v662_v21 }
 0x262   : > { %v6400_v58 = vadd.f32 %v873_v7, %v6280_v54  ;;  %v6415_v54 = vpop.permute.xlu0 %1666 }
 0x263   : > { %8635 = vst [vmem:[#allocation13_spill] sm:$0xff] %v6415_v54  ;;  %v1416_v36 = vsel %vm876_vm2, %v6413_v10, -inf }
 0x264   : > { %v922_v30 = vsel %vm876_vm2, %v6400_v58, -inf }
 0x268   : > { %911 = vmax.xlane.f32.xlu1 %v910_v43  ;;  %923 = vmax.xlane.f32.xlu2 %v922_v30 }
 0x26b   : > { %v1379_v7 = vpop.xlane.xlu2 %1378 }
 0x26c   : > { %v1425_v53 = vsub.f32 %v6131_v0, %v1379_v7  ;;  %v916_v0 = vsel %vm876_vm2, %v6423_v33, -inf }
 0x26e   : > { %v1441_v17 = vmul.f32 1.442695, %v1425_v53 }
 0x270   : > { %1417 = vmax.xlane.f32.xlu1 %v1416_v36  ;;  %5221 = vpow2.f32 %v1441_v17 }
 0x273   : > { %v1382_v43 = vpop.xlane.xlu0 %1381  ;;  %v879_v30 = vpop.xlane.xlu2 %878 }
 0x274   : > { %v1426_v21 = vsub.f32 %v6151_v1, %v1382_v43  ;;  %v925_v32 = vsub.f32 %v6148_v57, %v879_v30 }
 0x276   : > { %v1443_v54 = vmul.f32 1.442695, %v1426_v21  ;;  %v941_v47 = vmul.f32 1.442695, %v925_v32  ;;  %v6429_v7 = vpop.eup %5221 }
 0x277   : > { %v1473_v43 = vsel %vm876_vm2, %v6429_v7, 0.0 }
 0x278   : > { %5223 = vpow2.f32 %v1443_v54  ;;  %917 = vmax.xlane.f32.xlu1 %v916_v0 }
 0x279   : > { %5225 = vpow2.f32 %v941_v47 }
 0x27b   : > { %v882_v36 = vpop.xlane.xlu0 %881  ;;  %v1385_v53 = vpop.xlane.xlu1 %1384 }
 0x27c   : > { %v926_v18 = vsub.f32 %v6170_v50, %v882_v36  ;;  %v1427_v57 = vsub.f32 %v6173_v48, %v1385_v53 }
 0x27e   : > { %v6432_v2 = vpop.eup %5223  ;;  %v943_v1 = vmul.f32 1.442695, %v926_v18  ;;  %v1445_v50 = vmul.f32 1.442695, %v1427_v57 }
 0x27f   : > { %v6435_v17 = vpop.eup %5225  ;;  %v1476_v54 = vsel %vm876_vm2, %v6432_v2, 0.0 }
 0x280   : > { %5227 = vpow2.f32 %v943_v1  ;;  %v973_v47 = vsel %vm876_vm2, %v6435_v17, 0.0  ;;  %1474 = vadd.xlane.f32.xlu1 %v1473_v43  ;;  %1477 = vadd.xlane.f32.xlu2 %v1476_v54 }
 0x281   : > { %974 = vadd.xlane.f32.xlu0 %v973_v47  ;;  %5229 = vpow2.f32 %v1445_v50 }
 0x283   : > { %v1388_v30 = vpop.xlane.xlu2 %1387  ;;  %v885_v21 = vpop.xlane.xlu1 %884 }
 0x284   : > { %v927_v48 = vsub.f32 %v6191_v41, %v885_v21  ;;  %v1428_v36 = vsub.f32 %v6196_v39, %v1388_v30 }
 0x286   : > { %v6444_v32 = vpop.eup %5227  ;;  %v945_v0 = vmul.f32 1.442695, %v927_v48  ;;  %v1447_v18 = vmul.f32 1.442695, %v1428_v36 }
 0x287   : > { %v976_v53 = vsel %vm876_vm2, %v6444_v32, 0.0  ;;  %v6449_v43 = vpop.eup %5229 }
 0x288   : > { %977 = vadd.xlane.f32.xlu1 %v976_v53  ;;  %5231 = vpow2.f32 %v945_v0  ;;  %8636 = vst [vmem:[#allocation14_spill] sm:$0xff] %v6449_v43  ;;  %v1479_v41 = vsel %vm876_vm2, %v6449_v43, 0.0  ;;  %v894_v53 = vpop.xlane.xlu0 %893 }
 0x289   : > { %5233 = vpow2.f32 %v1447_v18 }
 0x28b   : > { %v888_v1 = vpop.xlane.xlu2 %887 }
 0x28c   : > { %v928_v57 = vsub.f32 %v6218_v61, %v888_v1 }
 0x28e   : > { %v947_v54 = vmul.f32 1.442695, %v928_v57  ;;  %v6452_v47 = vpop.eup %5231 }
 0x28f   : > { %v979_v39 = vsel %vm876_vm2, %v6452_v47, 0.0  ;;  %v6459_v21 = vpop.eup %5233 }
 0x290   : > { %5235 = vpow2.f32 %v947_v54  ;;  %1480 = vadd.xlane.f32.xlu1 %v1479_v41  ;;  %980 = vadd.xlane.f32.xlu2 %v979_v39  ;;  %8637 = vst [vmem:[#allocation15_spill] sm:$0xff] %v6459_v21  ;;  %v1482_v36 = vsel %vm876_vm2, %v6459_v21, 0.0  ;;  %v897_v41 = vpop.xlane.xlu1 %896 }
 0x293   : > { %v1855_v50 = vpop.xlane.xlu2 %1854 }
 0x294   : > { %v1901_v30 = vsub.f32 %v6241_v4, %v1855_v50 }
 0x296   : > { %v6461_v48 = vpop.eup %5235  ;;  %v1917_v61 = vmul.f32 1.442695, %v1901_v30 }
 0x297   : > { %v982_v0 = vsel %vm876_vm2, %v6461_v48, 0.0 }
 0x298   : > { %5237 = vpow2.f32 %v1917_v61  ;;  %983 = vadd.xlane.f32.xlu0 %v982_v0  ;;  %1483 = vadd.xlane.f32.xlu2 %v1482_v36  ;;  %v930_v36 = vsub.f32 %v6215_v5, %v894_v53 }
 0x29b   : > { %v891_v18 = vpop.xlane.xlu2 %890 }
 0x29c   : > { %v929_v1 = vsub.f32 %v6251_v38, %v891_v18  ;;  %v951_v18 = vmul.f32 1.442695, %v930_v36 }
 0x29e   : > { %v6468_v57 = vpop.eup %5237  ;;  %v949_v4 = vmul.f32 1.442695, %v929_v1 }
 0x29f   : > { %8638 = vst [vmem:[#allocation16_spill] sm:$0xff] %v6468_v57  ;;  %v1949_v54 = vsel %vm876_vm2, %v6468_v57, 0.0 }
 0x2a0   : > { %5239 = vpow2.f32 %v949_v4  ;;  %1950 = vadd.xlane.f32.xlu1 %v1949_v54 }
 0x2a3   : > { %v6472_v39 = vpop.xlane.xlu0 %1860  ;;  %v1858_v50 = vpop.xlane.xlu2 %1857 }
 0x2a4   : > { %v1902_v30 = vsub.f32 %v6268_v16, %v1858_v50  ;;  %v931_v16 = vsub.f32 %v6231_v29, %v897_v41 }
 0x2a6   : > { %v6475_v61 = vpop.eup %5239  ;;  %v1919_v0 = vmul.f32 1.442695, %v1902_v30  ;;  %v953_v53 = vmul.f32 1.442695, %v931_v16 }
 0x2a7   : > { %v985_v38 = vsel %vm876_vm2, %v6475_v61, 0.0 }
 0x2a8   : > { %986 = vadd.xlane.f32.xlu0 %v985_v38  ;;  %5241 = vpow2.f32 %v1919_v0 }
 0x2a9   : > { %5243 = vpow2.f32 %v951_v18 }
 0x2ab   : > { %v900_v1 = vpop.xlane.xlu2 %899  ;;  %v6480_v4 = vpop.xlane.xlu1 %1863 }
 0x2ac   : > { %v932_v54 = vsub.f32 %v6288_v35, %v900_v1  ;;  %v1403_v57 = vpop.xlane.xlu0 %1402 }
 0x2ad   : > { %v1433_v38 = vsub.f32 %v6291_v51, %v1403_v57 }
 0x2ae   : > { %v955_v43 = vmul.f32 1.442695, %v932_v54  ;;  %v6483_v21 = vpop.eup %5241 }
 0x2af   : > { %8639 = vst [vmem:[#allocation17_spill] sm:$0xff] %v6483_v21  ;;  %v1952_v5 = vsel %vm876_vm2, %v6483_v21, 0.0  ;;  %v6488_v0 = vpop.eup %5243  ;;  %v1457_v41 = vmul.f32 1.442695, %v1433_v38 }
 0x2b0   : > { %5245 = vpow2.f32 %v955_v43  ;;  %1953 = vadd.xlane.f32.xlu0 %v1952_v5  ;;  %v988_v43 = vsel %vm876_vm2, %v6488_v0, 0.0 }
 0x2b1   : > { %5247 = vpow2.f32 %v953_v53 }
 0x2b3   : > { %v1406_v50 = vpop.xlane.xlu1 %1405  ;;  %v6508_v5 = vpop.xlane.xlu2 %1866 }
 0x2b4   : > { %v906_v30 = vpop.xlane.xlu0 %905 }
 0x2b5   : > { %v934_v36 = vsub.f32 %v6310_v11, %v906_v30 }
 0x2b6   : > { %v6491_v35 = vpop.eup %5245 }
 0x2b7   : > { %v959_v18 = vmul.f32 1.442695, %v934_v36  ;;  %v994_v29 = vsel %vm876_vm2, %v6491_v35, 0.0  ;;  %v6500_v11 = vpop.eup %5247 }
 0x2b8   : > { %995 = vadd.xlane.f32.xlu2 %v994_v29  ;;  %989 = vadd.xlane.f32.xlu0 %v988_v43  ;;  %v991_v57 = vsel %vm876_vm2, %v6500_v11, 0.0 }
 0x2b9   : > { %5249 = vpow2.f32 %v959_v18 }
 0x2ba   : > { %5251 = vpow2.f32 %v1457_v41 }
 0x2bb   : > { %v6498_v1 = vpop.xlane.xlu1 %1869  ;;  %v903_v41 = vpop.xlane.xlu2 %902 }
 0x2bc   : > { %v909_v54 = vpop.xlane.xlu0 %908 }
 0x2bf   : > { %v6502_v16 = vpop.eup %5249 }
 0x2c0   : > { %8640 = vst [vmem:[#allocation18_spill] sm:$0xff] %v6502_v16  ;;  %v1000_v51 = vsel %vm876_vm2, %v6502_v16, 0.0  ;;  %992 = vadd.xlane.f32.xlu0 %v991_v57  ;;  %v6512_v36 = vpop.eup %5251 }
 0x2c1   : > { %1001 = vadd.xlane.f32.xlu1 %v1000_v51  ;;  %8641 = vst [vmem:[#allocation19_spill] sm:$0xff] %v6512_v36  ;;  %v1497_v29 = vsel %vm876_vm2, %v6512_v36, 0.0 }
 0x2c3   : > { %v6510_v53 = vpop.xlane.xlu1 %1408 }
 0x2c4   : > { %v915_v30 = vpop.xlane.xlu0 %914 }
 0x2c5   : > { %v937_v38 = vsub.f32 %v6355_v60, %v915_v30  ;;  %v6527_v60 = vpop.xlane.xlu2 %1872 }
 0x2c6   : > { %8643 = vst [vmem:[#allocation21_spill] sm:$0xff] %v6527_v60  ;;  %v1434_v60 = vsub.f32 %v6313_v12, %v1406_v50 }
 0x2c7   : > { %v965_v18 = vmul.f32 1.442695, %v937_v38 }
 0x2c8   : > { %1498 = vadd.xlane.f32.xlu0 %v1497_v29  ;;  %v1459_v37 = vmul.f32 1.442695, %v1434_v60 }
 0x2c9   : > { %5253 = vpow2.f32 %v965_v18 }
 0x2cb   : > { %v6517_v43 = vpop.xlane.xlu1 %1411 }
 0x2cd   : > { %v6530_v29 = vpop.xlane.xlu2 %1414 }
 0x2cf   : > { %v6519_v51 = vpop.eup %5253 }
 0x2d0   : > { %8642 = vst [vmem:[#allocation20_spill] sm:$0xff] %v6519_v51  ;;  %v1009_v57 = vsel %vm876_vm2, %v6519_v51, 0.0  ;;  %2069 = vrot.lane.b32.xlu2 %v5903_v22, %s5607_s30  ;;  %v933_v51 = vsub.f32 %v6330_v15, %v903_v41 }
 0x2d1   : > { %1010 = vadd.xlane.f32.xlu1 %v1009_v57 }
 0x2d3   : > { %v6525_v21 = vpop.xlane.xlu1 %1875 }
 0x2d5   : > { %v6539_v22 = vpop.xlane.xlu2 %920 }
 0x2db   : > { %v912_v30 = vpop.xlane.xlu1 %911 }
 0x2dc   : > { %v936_v38 = vsub.f32 %v6397_v27, %v912_v30  ;;  %v957_v27 = vmul.f32 1.442695, %v933_v51  ;;  %v935_v51 = vsub.f32 %v6333_v24, %v909_v54 }
 0x2dd   : > { %v924_v41 = vpop.xlane.xlu2 %923 }
 0x2de   : > { %v963_v18 = vmul.f32 1.442695, %v936_v38  ;;  %v961_v50 = vmul.f32 1.442695, %v935_v51 }
 0x2e0   : > { %5255 = vpow2.f32 %v963_v18 }
 0x2e1   : > { %5257 = vpow2.f32 %v957_v27 }
 0x2e3   : > { %v6532_v36 = vpop.xlane.xlu1 %1417 }
 0x2e6   : > { %v6534_v20 = vpop.eup %5255 }
 0x2e7   : > { %8644 = vst [vmem:[#allocation22_spill] sm:$0xff] %v6534_v20  ;;  %v1006_v57 = vsel %vm876_vm2, %v6534_v20, 0.0 }
 0x2e8   : > { %1007 = vadd.xlane.f32.xlu0 %v1006_v57  ;;  %v6547_v57 = vpop.eup %5257 }
 0x2e9   : > { %v997_v12 = vsel %vm876_vm2, %v6547_v57, 0.0 }
 0x2ea   : > { %2067 = vrot.lane.b32.xlu1 %v5905_v25, %s5607_s30  ;;  %v2240_v25 = vpop.f32.mrf.mxu0 }
 0x2eb   : > { %v918_v30 = vpop.xlane.xlu1 %917 }
 0x2ec   : > { %v938_v38 = vsub.f32 %v6423_v33, %v918_v30 }
 0x2ee   : > { %v967_v18 = vmul.f32 1.442695, %v938_v38 }
 0x2f0   : > { %5259 = vpow2.f32 %v967_v18 }
 0x2f3   : > { %v6545_v15 = vpop.xlane.xlu1 %1474  ;;  %v6556_v30 = vpop.xlane.xlu2 %1477 }
 0x2f4   : > { %v975_v20 = vpop.xlane.xlu0 %974 }
 0x2f5   : > { %5261 = vrcp.f32 %v975_v20 }
 0x2f6   : > { %v6549_v16 = vpop.eup %5259  ;;  %5263 = vpow2.f32 %v1459_v37 }
 0x2f7   : > { %8645 = vst [vmem:[#allocation23_spill] sm:$0xff] %v6549_v16  ;;  %v1012_v33 = vsel %vm876_vm2, %v6549_v16, 0.0 }
 0x2f8   : > { %1013 = vadd.xlane.f32.xlu0 %v1012_v33 }
 0x2f9   : > { %998 = vadd.xlane.f32.xlu2 %v997_v12 }
 0x2fb   : > { %v978_v60 = vpop.xlane.xlu1 %977  ;;  %v5262_v27 = vpop.eup %5261 }
 0x2fc   : > { %5265 = vrcp.f32 %v978_v60  ;;  %v6558_v38 = vpop.eup %5263  ;;  %v1037_v37 = vmul.f32 %v5262_v27, %v6435_v17  ;;  %v1833_v17 = vpop.f32.mrf.mxu1 }
 0x2fd   : > { %8646 = vst [vmem:[#allocation24_spill] sm:$0xff] %v6558_v38  ;;  %5267 = vpow2.f32 %v961_v50  ;;  %v1500_v24 = vsel %vm876_vm2, %v6558_v38, 0.0 }
 0x2fe   : > { %v1053_v18 = vpack.c.bf16 %v1037_v37, %v1037_v37  ;;  %v6573_v37 = vld [vmem:[%s8587_s5 + $0xc0] sm:$0xff] }
 0x300   : > { %v1077_v60 = vunpack.c.l.b16 %v1053_v18 }
 0x301   : > { %1501 = vadd.xlane.f32.xlu2 %v1500_v24  ;;  %v940_v24 = vsub.f32 %v6400_v58, %v924_v41  ;;  %v6582_v58 = vadd.f32 %v2240_v25, %v6573_v37  ;;  %v939_v41 = vsub.f32 %v6388_v45, %v6539_v22 }
 0x302   : > { %v5266_v20 = vpop.eup %5265 }
 0x303   : > { %v1038_v54 = vmul.f32 %v5266_v20, %v6444_v32  ;;  %v981_v33 = vpop.xlane.xlu2 %980  ;;  %v6564_v51 = vpop.eup %5267  ;;  %v6576_v20 = vadd.f32 %v1833_v17, %v6236_v40  ;;  %v969_v25 = vmul.f32 1.442695, %v939_v41  ;;  %v2329_v22 = vsel %vm876_vm2, %v6582_v58, -inf }
 0x304   : > { %5269 = vrcp.f32 %v981_v33  ;;  %v1003_v50 = vsel %vm876_vm2, %v6564_v51, 0.0 }
 0x305   : > { %v1054_v12 = vpack.c.bf16 %v1038_v54, %v1038_v54  ;;  %v1877_v40 = vsel %vm876_vm2, %v6576_v20, -inf }
 0x307   : > { %v1078_v16 = vunpack.c.l.b16 %v1054_v12  ;;  %v1435_v12 = vsub.f32 %v6352_v55, %v6510_v53  ;;  %v1436_v53 = vsub.f32 %v6370_v44, %v6517_v43 }
 0x309   : > { %1004 = vadd.xlane.f32.xlu2 %v1003_v50  ;;  %v1085_v27 = vpack.c.b16 %v1078_v16, %v1077_v60  ;;  %v971_v16 = vmul.f32 1.442695, %v940_v24  ;;  %v1461_v24 = vmul.f32 1.442695, %v1435_v12 }
 0x30a   : > { %v5270_v32 = vpop.eup %5269 }
 0x30b   : > { %v984_v38 = vpop.xlane.xlu0 %983  ;;  %4908 = vmatmul.msk.bf16.vlgmr.msra.gmra.mxu2 %vm876_vm2, %v1085_v27  ;;  %v1039_v54 = vmul.f32 %v5270_v32, %v6452_v47 }
 0x30c   : > { %5271 = vrcp.f32 %v984_v38  ;;  %1617 = vmatpush.bf16.msra.mxu2 %v6193_v23  ;;  %1664 = vrot.lane.b32.xlu0 %v6071_v46, %s5606_s28  ;;  %v6593_v23 = vld [vmem:[%s8587_s5 + $0xc8] sm:$0xff]  ;;  %v2242_v38 = vpop.f32.mrf.mxu0 }
 0x30d   : > { %5273 = vpow2.f32 %v971_v16  ;;  %v1055_v47 = vpack.c.bf16 %v1039_v54, %v1039_v54  ;;  %v1463_v16 = vmul.f32 1.442695, %v1436_v53 }
 0x30e   : > { %5275 = vpow2.f32 %v969_v25  ;;  %v6628_v25 = vpop.xlane.xlu2 %1483 }
 0x30f   : > { %v1079_v60 = vunpack.c.l.b16 %v1055_v47  ;;  %5277 = vpow2.f32 %v1461_v24 }
 0x310   : > { %1618 = vmatpush.bf16.msra.mxu2 %v6090_v49  ;;  %v6599_v49 = vadd.f32 %v2242_v38, %v6593_v23  ;;  %5279 = vpow2.f32 %v1463_v16  ;;  %v1904_v38 = vsub.f32 %v6294_v19, %v6480_v4 }
 0x311   : > { %1878 = vmax.xlane.f32.xlu2 %v1877_v40  ;;  %v1835_v40 = vpop.f32.mrf.mxu1 }
 0x312   : > { %v5272_v18 = vpop.eup %5271  ;;  %v1923_v44 = vmul.f32 1.442695, %v1904_v38  ;;  %v6636_v4 = vadd.f32 %v1835_v40, %v6260_v63 }
 0x313   : > { %v1040_v45 = vmul.f32 %v5272_v18, %v6461_v48  ;;  %v6604_v17 = vpop.eup %5273  ;;  %v2332_v48 = vsel %vm876_vm2, %v6599_v49, -inf }
 0x314   : > { %2330 = vmax.xlane.f32.xlu1 %v2329_v22  ;;  %1619 = vmatpush.bf16.msra.mxu2 %v6411_v52  ;;  %v1018_v52 = vsel %vm876_vm2, %v6604_v17, 0.0  ;;  %v6612_v55 = vpop.eup %5275 }
 0x315   : > { %v1056_v33 = vpack.c.bf16 %v1040_v45, %v1040_v45  ;;  %v6620_v54 = vpop.eup %5277 }
 0x316   : > { %v1503_v18 = vsel %vm876_vm2, %v6620_v54, 0.0  ;;  %v6626_v43 = vpop.eup %5279 }
 0x317   : > { %v1080_v50 = vunpack.c.l.b16 %v1056_v33  ;;  %v1506_v33 = vsel %vm876_vm2, %v6626_v43, 0.0 }
 0x318   : > { %1620 = vmatpush.bf16.msra.mxu2 %v6394_v14  ;;  %v1015_v14 = vsel %vm876_vm2, %v6612_v55, 0.0 }
 0x319   : > { %2333 = vmax.xlane.f32.xlu2 %v2332_v48  ;;  %v1086_v27 = vpack.c.b16 %v1080_v50, %v1079_v60  ;;  %v6630_v47 = vpop.f32.mrf.mxu1 }
 0x31b   : > { %v987_v32 = vpop.xlane.xlu0 %986  ;;  %4909 = vmatmul.msk.bf16.gmra.mxu2 %vm876_vm2, %v1086_v27 }
 0x31c   : > { %1019 = vadd.xlane.f32.xlu1 %v1018_v52  ;;  %5281 = vrcp.f32 %v987_v32  ;;  %v1880_v32 = vsel %vm876_vm2, %v6636_v4, -inf }
 0x321   : > { %1016 = vadd.xlane.f32.xlu2 %v1015_v14  ;;  %v1840_v14 = vpop.f32.mrf.mxu1 }
 0x322   : > { %v5282_v45 = vpop.eup %5281  ;;  %v6648_v40 = vadd.f32 %v1840_v14, %v6285_v34 }
 0x323   : > { %v6618_v41 = vpop.xlane.xlu0 %1953  ;;  %v1041_v19 = vmul.f32 %v5282_v45, %v6475_v61 }
 0x325   : > { %v1057_v27 = vpack.c.bf16 %v1041_v19, %v1041_v19 }
 0x327   : > { %v1081_v52 = vunpack.c.l.b16 %v1057_v27  ;;  %v6672_v27 = vld [vmem:[%s8587_s5 + $0xd8] sm:$0xff] }
 0x329   : > { %1504 = vadd.xlane.f32.xlu2 %v1503_v18 }
 0x32b   : > { %v990_v22 = vpop.xlane.xlu0 %989  ;;  %v996_v60 = vpop.xlane.xlu2 %995 }
 0x32c   : > { %5283 = vrcp.f32 %v990_v22  ;;  %v1886_v22 = vsel %vm876_vm2, %v6648_v40, -inf }
 0x32d   : > { %5285 = vpow2.f32 %v1923_v44  ;;  %v2245_v44 = vpop.f32.mrf.mxu0 }
 0x331   : > { %1507 = vadd.xlane.f32.xlu2 %v1506_v33  ;;  %v6658_v33 = vld [vmem:[%s8587_s5 + $0xd0] sm:$0xff] }
 0x332   : > { %v5284_v12 = vpop.eup %5283  ;;  %v6661_v34 = vadd.f32 %v2245_v44, %v6658_v33 }
 0x333   : > { %v993_v50 = vpop.xlane.xlu0 %992  ;;  %v1042_v48 = vmul.f32 %v5284_v12, %v6488_v0  ;;  %v6639_v24 = vpop.eup %5285 }
 0x334   : > { %5287 = vrcp.f32 %v993_v50  ;;  %v1958_v63 = vsel %vm876_vm2, %v6639_v24, 0.0  ;;  %v6663_v12 = vpop.xlane.xlu1 %1480  ;;  %v1437_v50 = vsub.f32 %v6372_v62, %v6530_v29  ;;  %v1905_v29 = vsub.f32 %v6316_v6, %v6508_v5 }
 0x335   : > { %2065 = vrot.lane.b32.xlu1 %v5916_v28, %s5607_s30  ;;  %v1058_v61 = vpack.c.bf16 %v1042_v48, %v1042_v48  ;;  %5289 = vrcp.f32 %v996_v60  ;;  %v6696_v5 = vadd.f32 %v6630_v47, %v6265_v9 }
 0x336   : > { %1881 = vmax.xlane.f32.xlu0 %v1880_v32  ;;  %v2247_v32 = vpop.f32.mrf.mxu0  ;;  %v1925_v14 = vmul.f32 1.442695, %v1905_v29 }
 0x337   : > { %v1082_v53 = vunpack.c.l.b16 %v1058_v61 }
 0x339   : > { %1959 = vadd.xlane.f32.xlu2 %v1958_v63  ;;  %v1087_v0 = vpack.c.b16 %v1082_v53, %v1081_v52  ;;  %v1465_v63 = vmul.f32 1.442695, %v1437_v50  ;;  %v6677_v52 = vadd.f32 %v2247_v32, %v6672_v27 }
 0x33a   : > { %v5288_v16 = vpop.eup %5287 }
 0x33b   : > { %4910 = vmatmul.msk.bf16.gmra.mxu2 %vm876_vm2, %v1087_v0  ;;  %v5290_v38 = vpop.eup %5289  ;;  %v1043_v18 = vmul.f32 %v5288_v16, %v6500_v11  ;;  %5291 = vpow2.f32 %v1465_v63  ;;  %v2338_v53 = vsel %vm876_vm2, %v6677_v52, -inf  ;;  %v6738_v63 = vpop.xlane.xlu0 %1498 }
 0x33c   : > { %v1044_v45 = vmul.f32 %v5290_v38, %v6491_v35  ;;  %v2335_v35 = vsel %vm876_vm2, %v6661_v34, -inf  ;;  %v6679_v62 = vpop.xlane.xlu1 %1950  ;;  %v1906_v38 = vsub.f32 %v6336_v31, %v6498_v1  ;;  %5293 = vpow2.f32 %v1925_v14 }
 0x33d   : > { %v1059_v19 = vpack.c.bf16 %v1043_v18, %v1043_v18  ;;  %v6690_v18 = vpop.f32.mrf.mxu1  ;;  %v1908_v31 = vsub.f32 %v6385_v3, %v6525_v21  ;;  %v1883_v1 = vsel %vm876_vm2, %v6696_v5, -inf }
 0x33e   : > { %v1060_v60 = vpack.c.bf16 %v1044_v45, %v1044_v45  ;;  %v1927_v6 = vmul.f32 1.442695, %v1906_v38 }
 0x33f   : > { %v1083_v11 = vunpack.c.l.b16 %v1059_v19 }
 0x340   : > { %v1084_v48 = vunpack.c.l.b16 %v1060_v60  ;;  %5295 = vpow2.f32 %v1927_v6  ;;  %v2070_v60 = vpop.permute.xlu2 %2069  ;;  %v8650_v6 = vld [vmem:[#allocation18_spill] sm:$0xff] }
 0x341   : > { %1887 = vmax.xlane.f32.xlu2 %v1886_v22  ;;  %v6686_v16 = vpop.eup %5291  ;;  %v2250_v22 = vpop.f32.mrf.mxu0  ;;  %5297 = vrcp.f32 %v6556_v30  ;;  %v1438_v30 = vsub.f32 %v6413_v10, %v6532_v36 }
 0x342   : > { %v1088_v61 = vpack.c.b16 %v1084_v48, %v1083_v11  ;;  %v1509_v44 = vsel %vm876_vm2, %v6686_v16, 0.0  ;;  %v6702_v19 = vpop.eup %5293  ;;  %v1931_v11 = vmul.f32 1.442695, %v1908_v31  ;;  %5299 = vrcp.f32 %v6545_v15 }
 0x343   : > { %8647 = vst [vmem:[#allocation25_spill] sm:$0xff] %v6702_v19  ;;  %v1961_v9 = vsel %vm876_vm2, %v6702_v19, 0.0  ;;  %v1467_v38 = vmul.f32 1.442695, %v1438_v30 }
 0x344   : > { %v1002_v0 = vpop.xlane.xlu1 %1001  ;;  %5301 = vpow2.f32 %v1931_v11 }
 0x345   : > { %v1845_v47 = vpop.f32.mrf.mxu1  ;;  %5303 = vrcp.f32 %v1002_v0 }
 0x346   : > { %v6713_v50 = vpop.eup %5295  ;;  %v6718_v3 = vadd.f32 %v1845_v47, %v6327_v8 }
 0x347   : > { %8648 = vst [vmem:[#allocation26_spill] sm:$0xff] %v6713_v50  ;;  %v1964_v48 = vsel %vm876_vm2, %v6713_v50, 0.0 }
 0x348   : > { %v1892_v8 = vsel %vm876_vm2, %v6718_v3, -inf }
 0x349   : > { %2336 = vmax.xlane.f32.xlu2 %v2335_v35 }
 0x34a   : > { %1662 = vrot.lane.b32.xlu0 %v6081_v42, %s5606_s28 }
 0x34b   : > { %4911 = vmatmul.msk.bf16.gmra.mxu2 %vm876_vm2, %v1088_v61 }
 0x34c   : > { %v6698_v45 = vpop.xlane.xlu1 %1010 }
 0x34d   : > { %v1848_v0 = vpop.f32.mrf.mxu1 }
 0x351   : > { %2339 = vmax.xlane.f32.xlu2 %v2338_v53 }
 0x359   : > { %1510 = vadd.xlane.f32.xlu2 %v1509_v44 }
 0x35b   : > { %4918 = vmatmul.msk.bf16.vlgmr.msrb.gmra.mxu2 %vm741_vm1, %v5978_v56  ;;  %v1903_v56 = vsub.f32 %v6271_v26, %v6472_v39  ;;  %v6727_v26 = vld [vmem:[%s8587_s5 + $0xe0] sm:$0xff]  ;;  %v5298_v39 = vpop.eup %5297 }
 0x35c   : > { %2093 = vmatpush.bf16.msrb.mxu2 %v6420_v13  ;;  %v6715_v13 = vpop.f32.mrf.mxu0  ;;  %v2068_v21 = vpop.permute.xlu1 %2067  ;;  %v6732_v15 = vadd.f32 %v2250_v22, %v6727_v26  ;;  %v1538_v44 = vmul.f32 %v5298_v39, %v6432_v2 }
 0x35d   : > { %v1921_v35 = vmul.f32 1.442695, %v1903_v56  ;;  %v5300_v32 = vpop.eup %5299 }
 0x35e   : > { %v6736_v61 = vpop.eup %5301  ;;  %v1537_v22 = vmul.f32 %v5300_v32, %v6429_v7  ;;  %v2341_v10 = vsel %vm876_vm2, %v6732_v15, -inf  ;;  %v1554_v7 = vpack.c.bf16 %v1538_v44, %v1538_v44 }
 0x35f   : > { %1884 = vmax.xlane.f32.xlu1 %v1883_v1  ;;  %5305 = vpow2.f32 %v1921_v35  ;;  %8649 = vst [vmem:[#allocation27_spill] sm:$0xff] %v6736_v61  ;;  %v5304_v53 = vpop.eup %5303  ;;  %v6754_v1 = vld [vmem:[%s8587_s5 + $0xf0] sm:$0xff]  ;;  %v1008_v35 = vpop.xlane.xlu0 %1007 }
 0x360   : > { %2094 = vmatpush.bf16.msrb.mxu2 %v2070_v60  ;;  %v1046_v31 = vmul.f32 %v5304_v53, %v8650_v6  ;;  %v8651_v60 = vld [vmem:[#allocation9_spill] sm:$0xff]  ;;  %v1578_v30 = vunpack.c.l.b16 %v1554_v7 }
 0x361   : > { %1962 = vadd.xlane.f32.xlu2 %v1961_v9  ;;  %v6757_v2 = vadd.f32 %v1848_v0, %v8651_v60  ;;  %v1553_v9 = vpack.c.bf16 %v1537_v22, %v1537_v22  ;;  %v6774_v53 = vld [vmem:[%s8587_s5 + $0xf8] sm:$0xff] }
 0x363   : > { %v1895_v39 = vsel %vm876_vm2, %v6757_v2, -inf  ;;  %v1577_v32 = vunpack.c.l.b16 %v1553_v9  ;;  %v8652_v9 = vld [vmem:[#allocation12_spill] sm:$0xff] }
 0x364   : > { %2095 = vmatpush.bf16.msrb.mxu2 %v2068_v21  ;;  %v2255_v14 = vpop.f32.mrf.mxu0  ;;  %v1062_v21 = vpack.c.bf16 %v1046_v31, %v1046_v31 }
 0x365   : > { %v6746_v36 = vpop.eup %5305  ;;  %v6762_v11 = vadd.f32 %v2255_v14, %v6754_v1 }
 0x366   : > { %v1955_v56 = vsel %vm876_vm2, %v6746_v36, 0.0  ;;  %v1163_v0 = vunpack.c.l.b16 %v1062_v21 }
 0x367   : > { %1965 = vadd.xlane.f32.xlu1 %v1964_v48 }
 0x369   : > { %1893 = vmax.xlane.f32.xlu2 %v1892_v8 }
 0x36b   : > { %4919 = vmatmul.msk.bf16.gmra.mxu2 %vm741_vm1, %v5982_v59  ;;  %v1970_v59 = vsel %vm876_vm2, %v6736_v61, 0.0  ;;  %v1014_v7 = vpop.xlane.xlu0 %1013 }
 0x36c   : > { %v999_v29 = vpop.xlane.xlu2 %998  ;;  %v2257_v14 = vpop.f32.mrf.mxu0 }
 0x36d   : > { %5307 = vrcp.f32 %v999_v29  ;;  %v6781_v44 = vadd.f32 %v2257_v14, %v6774_v53  ;;  %v8657_v14 = vld [vmem:[#allocation21_spill] sm:$0xff] }
 0x36e   : > { %5309 = vpow2.f32 %v1467_v38  ;;  %v2347_v38 = vsel %vm876_vm2, %v6762_v11, -inf }
 0x36f   : > { %2342 = vmax.xlane.f32.xlu1 %v2341_v10  ;;  %5311 = vrcp.f32 %v6628_v25 }
 0x370   : > { %5313 = vrcp.f32 %v6663_v12  ;;  %v1585_v12 = vpack.c.b16 %v1578_v30, %v1577_v32  ;;  %v8656_v32 = vld [vmem:[#allocation22_spill] sm:$0xff] }
 0x371   : > { %1971 = vadd.xlane.f32.xlu2 %v1970_v59  ;;  %5315 = vrcp.f32 %v1008_v35  ;;  %v8654_v35 = vld [vmem:[#allocation8_spill] sm:$0xff] }
 0x373   : > { %v5308_v47 = vpop.eup %5307 }
 0x374   : > { %v1045_v48 = vmul.f32 %v5308_v47, %v6547_v57  ;;  %v6765_v8 = vpop.xlane.xlu2 %1501  ;;  %1956 = vadd.xlane.f32.xlu0 %v1955_v56  ;;  %v6776_v57 = vpop.eup %5309  ;;  %v2350_v47 = vsel %vm876_vm2, %v6781_v44, -inf  ;;  %v8653_v56 = vld [vmem:[#allocation15_spill] sm:$0xff] }
 0x375   : > { %v5312_v10 = vpop.eup %5311  ;;  %v1512_v6 = vsel %vm876_vm2, %v6776_v57, 0.0 }
 0x376   : > { %v1061_v29 = vpack.c.bf16 %v1045_v48, %v1045_v48  ;;  %v5314_v31 = vpop.eup %5313  ;;  %v1540_v21 = vmul.f32 %v5312_v10, %v8653_v56  ;;  %v6793_v48 = vadd.f32 %v6690_v18, %v8654_v35  ;;  %v6805_v18 = vld [vmem:[%s8587_s5 + $0xe8] sm:$0xff] }
 0x377   : > { %1896 = vmax.xlane.f32.xlu1 %v1895_v39  ;;  %v5316_v60 = vpop.eup %5315  ;;  %v8655_v39 = vld [vmem:[#allocation14_spill] sm:$0xff]  ;;  %v6810_v35 = vadd.f32 %v6715_v13, %v6805_v18 }
 0x378   : > { %v1162_v25 = vunpack.c.l.b16 %v1061_v29  ;;  %v1539_v30 = vmul.f32 %v5314_v31, %v8655_v39  ;;  %v1048_v29 = vmul.f32 %v5316_v60, %v8656_v32 }
 0x379   : > { %2348 = vmax.xlane.f32.xlu2 %v2347_v38  ;;  %v8659_v38 = vld [vmem:[#allocation13_spill] sm:$0xff] }
 0x37a   : > { %v1170_v22 = vpack.c.b16 %v1163_v0, %v1162_v25  ;;  %v8658_v0 = vld [vmem:[#allocation10_spill] sm:$0xff]  ;;  %v1555_v10 = vpack.c.bf16 %v1539_v30, %v1539_v30  ;;  %v1064_v60 = vpack.c.bf16 %v1048_v29, %v1048_v29 }
 0x37b   : > { %4924 = vmatmul.msk.bf16.vlgmr.msra.gmra.mxu2 %vm876_vm2, %v1585_v12  ;;  %v1907_v25 = vsub.f32 %v8658_v0, %v8657_v14  ;;  %v1556_v12 = vpack.c.bf16 %v1540_v21, %v1540_v21 }
 0x37c   : > { %v1005_v59 = vpop.xlane.xlu2 %1004  ;;  %1513 = vadd.xlane.f32.xlu0 %v1512_v6  ;;  %4912 = vmatmul.msk.bf16.vlgmr.msra.gmra.mxu3 %vm876_vm2, %v1170_v22  ;;  %v1889_v6 = vsel %vm876_vm2, %v6793_v48, -inf  ;;  %v1579_v30 = vunpack.c.l.b16 %v1555_v10  ;;  %v1165_v0 = vunpack.c.l.b16 %v1064_v60 }
 0x37d   : > { %5317 = vrcp.f32 %v1005_v59  ;;  %1690 = vmatpush.bf16.msra.mxu3 %v8652_v9  ;;  %v1580_v56 = vunpack.c.l.b16 %v1556_v12  ;;  %v8660_v12 = vld [vmem:[#allocation23_spill] sm:$0xff] }
 0x37e   : > { %v1665_v9 = vpop.permute.xlu0 %1664  ;;  %5319 = vrcp.f32 %v1014_v7  ;;  %v2344_v7 = vsel %vm876_vm2, %v6810_v35, -inf }
 0x37f   : > { %2351 = vmax.xlane.f32.xlu1 %v2350_v47  ;;  %v1929_v47 = vmul.f32 1.442695, %v1907_v25  ;;  %5321 = vrcp.f32 %v6698_v45  ;;  %v1586_v29 = vpack.c.b16 %v1580_v56, %v1579_v30 }
 0x381   : > { %1691 = vmatpush.bf16.msra.mxu3 %v8659_v38  ;;  %5323 = vpow2.f32 %v1929_v47 }
 0x383   : > { %v5318_v22 = vpop.eup %5317 }
 0x384   : > { %v1879_v59 = vpop.xlane.xlu2 %1878  ;;  %1890 = vmax.xlane.f32.xlu0 %v1889_v6  ;;  %v1047_v31 = vmul.f32 %v5318_v22, %v6564_v51  ;;  %v5320_v38 = vpop.eup %5319  ;;  %v8662_v6 = vld [vmem:[#allocation20_spill] sm:$0xff] }
 0x385   : > { %1692 = vmatpush.bf16.msra.mxu3 %v1665_v9  ;;  %v5322_v45 = vpop.eup %5321  ;;  %v1909_v60 = vsub.f32 %v6576_v20, %v1879_v59 }
 0x386   : > { %v1063_v21 = vpack.c.bf16 %v1047_v31, %v1047_v31  ;;  %v1049_v10 = vmul.f32 %v5322_v45, %v8662_v6 }
 0x387   : > { %v2331_v39 = vpop.xlane.xlu1 %2330  ;;  %v6819_v22 = vpop.eup %5323 }
 0x388   : > { %v2377_v32 = vsub.f32 %v6582_v58, %v2331_v39  ;;  %v1164_v14 = vunpack.c.l.b16 %v1063_v21  ;;  %v1050_v58 = vmul.f32 %v5320_v38, %v8660_v12  ;;  %8661 = vst [vmem:[#allocation18_spill] sm:$0xff] %v6819_v22  ;;  %v1967_v47 = vsel %vm876_vm2, %v6819_v22, 0.0  ;;  %v1850_v21 = vpop.f32.mrf.mxu1 }
 0x38a   : > { %v2393_v51 = vmul.f32 1.442695, %v2377_v32  ;;  %v1171_v25 = vpack.c.b16 %v1165_v0, %v1164_v14  ;;  %v1066_v56 = vpack.c.bf16 %v1050_v58, %v1050_v58  ;;  %v1065_v32 = vpack.c.bf16 %v1049_v10, %v1049_v10  ;;  %v8664_v0 = vld [vmem:[#allocation11_spill] sm:$0xff] }
 0x38b   : > { %4925 = vmatmul.msk.bf16.gmra.mxu2 %vm876_vm2, %v1586_v29  ;;  %v1933_v14 = vmul.f32 1.442695, %v1909_v60 }
 0x38c   : > { %5325 = vpow2.f32 %v2393_v51  ;;  %v2334_v13 = vpop.xlane.xlu2 %2333  ;;  %2345 = vmax.xlane.f32.xlu0 %v2344_v7  ;;  %4913 = vmatmul.msk.bf16.gmra.mxu3 %vm876_vm2, %v1171_v25  ;;  %v6830_v51 = vadd.f32 %v1850_v21, %v8664_v0  ;;  %v1167_v29 = vunpack.c.l.b16 %v1066_v56  ;;  %v1166_v59 = vunpack.c.l.b16 %v1065_v32 }
 0x38d   : > { %v2378_v25 = vsub.f32 %v6599_v49, %v2334_v13 }
 0x38e   : > { %v6832_v20 = vpop.f32.mrf.mxu2  ;;  %v1898_v7 = vsel %vm876_vm2, %v6830_v51, -inf  ;;  %v1172_v38 = vpack.c.b16 %v1167_v29, %v1166_v59 }
 0x38f   : > { %v1020_v30 = vpop.xlane.xlu1 %1019  ;;  %8665 = vst [vmem:[#allocation12_spill] sm:$0xff] %v6832_v20  ;;  %v2395_v58 = vmul.f32 1.442695, %v2378_v25  ;;  %v8669_v25 = vld [vmem:[#allocation2_spill] sm:$0xff] }
 0x392   : > { %v6822_v31 = vpop.eup %5325 }
 0x393   : > { %8663 = vst [vmem:[#allocation9_spill] sm:$0xff] %v6822_v31  ;;  %v2425_v9 = vsel %vm876_vm2, %v6822_v31, 0.0 }
 0x394   : > { %2426 = vadd.xlane.f32.xlu1 %v2425_v9  ;;  %v1017_v39 = vpop.xlane.xlu2 %1016  ;;  %1968 = vadd.xlane.f32.xlu0 %v1967_v47 }
 0x395   : > { %5327 = vrcp.f32 %v1017_v39 }
 0x396   : > { %5329 = vrcp.f32 %v1020_v30  ;;  %v6842_v9 = vpop.f32.mrf.mxu2 }
 0x397   : > { %5331 = vpow2.f32 %v1933_v14  ;;  %8666 = vst [vmem:[#allocation15_spill] sm:$0xff] %v6842_v9 }
 0x398   : > { %5333 = vpow2.f32 %v2395_v58 }
 0x39b   : > { %v5328_v45 = vpop.eup %5327 }
 0x39c   : > { %1899 = vmax.xlane.f32.xlu0 %v1898_v7  ;;  %4914 = vmatmul.msk.bf16.gmra.mxu3 %vm876_vm2, %v1172_v38  ;;  %v5330_v12 = vpop.eup %5329  ;;  %v1051_v6 = vmul.f32 %v5328_v45, %v6612_v55  ;;  %v1505_v32 = vpop.xlane.xlu2 %1504 }
 0x39d   : > { %v6839_v10 = vpop.eup %5331  ;;  %v1052_v60 = vmul.f32 %v5330_v12, %v6604_v17 }
 0x39e   : > { %v1973_v49 = vsel %vm876_vm2, %v6839_v10, 0.0  ;;  %v1067_v13 = vpack.c.bf16 %v1051_v6, %v1051_v6  ;;  %v6846_v39 = vpop.eup %5333  ;;  %v6851_v59 = vpop.f32.mrf.mxu2  ;;  %v8671_v6 = vld [vmem:[#allocation7_spill] sm:$0xff] }
 0x39f   : > { %v1068_v47 = vpack.c.bf16 %v1052_v60, %v1052_v60  ;;  %8667 = vst [vmem:[#allocation8_spill] sm:$0xff] %v6846_v39  ;;  %v2428_v17 = vsel %vm876_vm2, %v6846_v39, 0.0 }
 0x3a0   : > { %v1168_v21 = vunpack.c.l.b16 %v1067_v13  ;;  %8668 = vst [vmem:[#allocation14_spill] sm:$0xff] %v6851_v59  ;;  %v8672_v13 = vld [vmem:[#allocation24_spill] sm:$0xff] }
 0x3a1   : > { %v1169_v55 = vunpack.c.l.b16 %v1068_v47 }
 0x3a3   : > { %v1173_v0 = vpack.c.b16 %v1169_v55, %v1168_v21  ;;  %v8674_v21 = vld [vmem:[#allocation19_spill] sm:$0xff] }
 0x3a4   : > { %1974 = vadd.xlane.f32.xlu0 %v1973_v49  ;;  %v1508_v38 = vpop.xlane.xlu2 %1507 }
 0x3a6   : > { %v6861_v45 = vpop.f32.mrf.mxu2 }
 0x3a7   : > { %v2066_v56 = vpop.permute.xlu1 %2065  ;;  %8670 = vst [vmem:[#allocation22_spill] sm:$0xff] %v6861_v45  ;;  %v8681_v45 = vld [vmem:[#allocation5_spill] sm:$0xff] }
 0x3a8   : > { %2096 = vmatpush.bf16.msrb.mxu2 %v2066_v56 }
 0x3a9   : > { %v1882_v30 = vpop.xlane.xlu0 %1881 }
 0x3aa   : > { %v1910_v14 = vsub.f32 %v6636_v4, %v1882_v30 }
 0x3ac   : > { %v1935_v29 = vmul.f32 1.442695, %v1910_v14  ;;  %2429 = vadd.xlane.f32.xlu0 %v2428_v17  ;;  %4915 = vmatmul.msk.bf16.gmra.mxu3 %vm876_vm2, %v1173_v0  ;;  %v6866_v49 = vpop.xlane.xlu2 %1959 }
 0x3ad   : > { %2547 = vrot.lane.b32.xlu1 %v8669_v25, %s5610_s17 }
 0x3ae   : > { %5335 = vpow2.f32 %v1935_v29 }
 0x3af   : > { %5337 = vrcp.f32 %v6765_v8 }
 0x3b0   : > { %5339 = vrcp.f32 %v6738_v63 }
 0x3b1   : > { %5341 = vrcp.f32 %v1508_v38 }
 0x3b2   : > { %5343 = vrcp.f32 %v1505_v32 }
 0x3b4   : > { %v6856_v7 = vpop.eup %5335  ;;  %v6874_v17 = vpop.xlane.xlu2 %1887 }
 0x3b5   : > { %v1976_v4 = vsel %vm876_vm2, %v6856_v7, 0.0  ;;  %v5338_v12 = vpop.eup %5337 }
 0x3b6   : > { %1977 = vadd.xlane.f32.xlu2 %v1976_v4  ;;  %v5340_v60 = vpop.eup %5339  ;;  %v1546_v47 = vmul.f32 %v5338_v12, %v8672_v13 }
 0x3b7   : > { %v1545_v8 = vmul.f32 %v5340_v60, %v8674_v21  ;;  %v5342_v25 = vpop.eup %5341 }
 0x3b8   : > { %v1562_v30 = vpack.c.bf16 %v1546_v47, %v1546_v47  ;;  %v5344_v4 = vpop.eup %5343  ;;  %v1548_v12 = vmul.f32 %v5342_v25, %v6626_v43  ;;  %v5575_v43 = vld [vmem:[%s8587_s5 + $0x60] sm:$0xff] }
 0x3b9   : > { %v1561_v55 = vpack.c.bf16 %v1545_v8, %v1545_v8 }
 0x3ba   : > { %v1651_v14 = vunpack.c.l.b16 %v1562_v30  ;;  %v1564_v38 = vpack.c.bf16 %v1548_v12, %v1548_v12  ;;  %v5576_v12 = vld [vmem:[%s8587_s5 + $0x68] sm:$0xff] }
 0x3bb   : > { %v1650_v0 = vunpack.c.l.b16 %v1561_v55 }
 0x3bc   : > { %v1663_v58 = vpop.permute.xlu0 %1662  ;;  %4923 = vmatmul.msk.bf16.vlgmr.msrb.gmra.mxu3 %vm741_vm1, %v8671_v6  ;;  %v1547_v6 = vmul.f32 %v5344_v4, %v6620_v54  ;;  %v6881_v60 = vpop.xlane.xlu2 %2336  ;;  %v1653_v32 = vunpack.c.l.b16 %v1564_v38 }
 0x3bd   : > { %1693 = vmatpush.bf16.msra.mxu3 %v1663_v58  ;;  %v1658_v29 = vpack.c.b16 %v1651_v14, %v1650_v0 }
 0x3be   : > { %v6869_v56 = vpop.f32.mrf.mxu2  ;;  %v1563_v13 = vpack.c.bf16 %v1547_v6, %v1547_v6 }
 0x3bf   : > { %8673 = vst [vmem:[#allocation21_spill] sm:$0xff] %v6869_v56 }
 0x3c0   : > { %v1652_v21 = vunpack.c.l.b16 %v1563_v13  ;;  %v663_v13 = vld [vmem:[%s8587_s5 + $0x70] sm:$0xff] }
 0x3c2   : > { %v1659_v8 = vpack.c.b16 %v1653_v32, %v1652_v21 }
 0x3c4   : > { %v6885_v30 = vpop.xlane.xlu2 %2339 }
 0x3c6   : > { %v6872_v63 = vpop.f32.mrf.mxu2 }
 0x3c7   : > { %8675 = vst [vmem:[#allocation10_spill] sm:$0xff] %v6872_v63 }
 0x3cc   : > { %4928 = vmatmul.msk.bf16.vlgmr.msra.gmra.mxu3 %vm876_vm2, %v1658_v29  ;;  %v1511_v0 = vpop.xlane.xlu2 %1510 }
 0x3cd   : > { %5345 = vrcp.f32 %v1511_v0 }
 0x3ce   : > { %v6878_v58 = vpop.f32.mrf.mxu2 }
 0x3cf   : > { %8676 = vst [vmem:[#allocation13_spill] sm:$0xff] %v6878_v58 }
 0x3d2   : > { %v6895_v29 = vpop.xlane.xlu1 %1884 }
 0x3d6   : > { %v6883_v47 = vpop.f32.mrf.mxu2 }
 0x3d7   : > { %8677 = vst [vmem:[#allocation23_spill] sm:$0xff] %v6883_v47 }
 0x3dc   : > { %4929 = vmatmul.msk.bf16.gmra.mxu3 %vm876_vm2, %v1659_v8  ;;  %v5346_v8 = vpop.eup %5345 }
 0x3dd   : > { %v1549_v0 = vmul.f32 %v5346_v8, %v6686_v16 }
 0x3de   : > { %v1298_v55 = vpop.f32.mrf.mxu2 }
 0x3df   : > { %v6891_v14 = vadd.f32 %v5575_v43, %v1298_v55  ;;  %v6911_v43 = vpop.xlane.xlu1 %1965 }
 0x3e1   : > { %v1389_v54 = vsel %vm876_vm2, %v6891_v14, -inf }
 0x3e2   : > { %1390 = vmax.xlane.f32.xlu2 %v1389_v54 }
 0x3e6   : > { %v1300_v25 = vpop.f32.mrf.mxu2 }
 0x3e7   : > { %v6897_v4 = vpop.xlane.xlu0 %1956  ;;  %v6902_v6 = vadd.f32 %v5576_v12, %v1300_v25  ;;  %v664_v25 = vld [vmem:[%s8587_s5 + $0x78] sm:$0xff]  ;;  %v6926_v59 = vpop.xlane.xlu1 %2342 }
 0x3e9   : > { %v1392_v38 = vsel %vm876_vm2, %v6902_v6, -inf }
 0x3ea   : > { %1393 = vmax.xlane.f32.xlu2 %v1392_v38  ;;  %v1565_v38 = vpack.c.bf16 %v1549_v0, %v1549_v0 }
 0x3ec   : > { %v1654_v16 = vunpack.c.l.b16 %v1565_v38 }
 0x3ee   : > { %v1303_v32 = vpop.f32.mrf.mxu2 }
 0x3ef   : > { %v1514_v21 = vpop.xlane.xlu0 %1513  ;;  %v6909_v55 = vadd.f32 %v1303_v32, %v663_v13 }
 0x3f0   : > { %5347 = vrcp.f32 %v1514_v21 }
 0x3f1   : > { %v1395_v54 = vsel %vm876_vm2, %v6909_v55, -inf }
 0x3f2   : > { %1396 = vmax.xlane.f32.xlu0 %v1395_v54 }
 0x3f6   : > { %v5348_v12 = vpop.eup %5347  ;;  %v1305_v47 = vpop.f32.mrf.mxu2 }
 0x3f7   : > { %v1550_v58 = vmul.f32 %v5348_v12, %v6776_v57  ;;  %v6920_v32 = vadd.f32 %v1305_v47, %v664_v25  ;;  %v6922_v56 = vpop.xlane.xlu0 %1890  ;;  %v6931_v57 = vpop.xlane.xlu2 %1962 }
 0x3f8   : > { %8679 = vst [vmem:[#allocation11_spill] sm:$0xff] %v6931_v57  ;;  %v6937_v12 = vpop.xlane.xlu1 %1896 }
 0x3f9   : > { %v1566_v21 = vpack.c.bf16 %v1550_v58, %v1550_v58  ;;  %v1398_v63 = vsel %vm876_vm2, %v6920_v32, -inf  ;;  %v8680_v58 = vld [vmem:[#allocation6_spill] sm:$0xff] }
 0x3fa   : > { %1399 = vmax.xlane.f32.xlu1 %v1398_v63 }
 0x3fb   : > { %v1655_v8 = vunpack.c.l.b16 %v1566_v21 }
 0x3fd   : > { %v1660_v54 = vpack.c.b16 %v1655_v8, %v1654_v16 }
 0x3ff   : > { %4930 = vmatmul.msk.bf16.gmra.mxu3 %vm876_vm2, %v1660_v54  ;;  %v6929_v0 = vpop.f32.mrf.mxu3  ;;  %v6933_v47 = vpop.xlane.xlu0 %2345 }
 0x400   : > { %8678 = vst [vmem:[#allocation20_spill] sm:$0xff] %v6929_v0  ;;  %v6943_v38 = vpop.xlane.xlu2 %1893  ;;  %v6947_v16 = vpop.xlane.xlu1 %2351 }
 0x402   : > { %2144 = vrot.lane.b32.xlu2 %v8680_v58, %s5607_s30 }
 0x406   : > { %2142 = vrot.lane.b32.xlu0 %v8681_v45, %s5607_s30 }
 0x407   : > { %v6941_v63 = vpop.f32.mrf.mxu3  ;;  %v6945_v21 = vpop.xlane.xlu0 %1968 }
 0x408   : > { %8682 = vst [vmem:[#allocation2_spill] sm:$0xff] %v6941_v63  ;;  %v6951_v54 = vpop.xlane.xlu2 %1971  ;;  %v6953_v0 = vpop.xlane.xlu1 %2426 }
 0x409   : > { %8683 = vst [vmem:[#allocation7_spill] sm:$0xff] %v6945_v21 }
 0x40a   : > { %8685 = vst [vmem:[#allocation19_spill] sm:$0xff] %v6951_v54 }
 0x40b   : > { %8686 = vst [vmem:[#allocation6_spill] sm:$0xff] %v6953_v0 }
 0x40f   : > { %v6949_v8 = vpop.f32.mrf.mxu3  ;;  %v6955_v20 = vpop.xlane.xlu0 %1899 }
 0x410   : > { %8684 = vst [vmem:[#allocation24_spill] sm:$0xff] %v6949_v8  ;;  %v6961_v63 = vpop.xlane.xlu2 %2348 }
 0x417   : > { %v6957_v9 = vpop.f32.mrf.mxu3  ;;  %v1975_v39 = vpop.xlane.xlu0 %1974 }
 0x418   : > { %8687 = vst [vmem:[#allocation28_spill] sm:$0xff] %v6957_v9  ;;  %5349 = vrcp.f32 %v1975_v39 }
 0x41e   : > { %v5350_v8 = vpop.eup %5349 }
 0x41f   : > { %v2548_v31 = vpop.permute.xlu1 %2547  ;;  %v6959_v45 = vpop.f32.mrf.mxu3  ;;  %v2021_v54 = vmul.f32 %v5350_v8, %v6839_v10 }
 0x420   : > { %8688 = vst [vmem:[#allocation29_spill] sm:$0xff] %v6959_v45  ;;  %2569 = vmatpush.bf16.msra.mxu2 %v2548_v31 }
 0x421   : > { %v2037_v19 = vpack.c.bf16 %v2021_v54, %v2021_v54 }
 0x423   : > { %v6969_v45 = vunpack.c.l.b16 %v2037_v19 }
 0x427   : > { %v6963_v61 = vpop.f32.mrf.mxu3 }
 0x428   : > { %8689 = vst [vmem:[#allocation30_spill] sm:$0xff] %v6963_v61 }
 0x429   : > { %v1978_v22 = vpop.xlane.xlu2 %1977 }
 0x42a   : > { %5351 = vrcp.f32 %v1978_v22 }
 0x42f   : > { %v6966_v21 = vpop.f32.mrf.mxu3 }
 0x430   : > { %v5352_v0 = vpop.eup %5351  ;;  %8690 = vst [vmem:[#allocation31_spill] sm:$0xff] %v6966_v21 }
 0x431   : > { %v2022_v9 = vmul.f32 %v5352_v0, %v6856_v7  ;;  %v6986_v0 = vpop.xlane.xlu0 %2429 }
 0x433   : > { %v2038_v50 = vpack.c.bf16 %v2022_v9, %v2022_v9 }
 0x435   : > { %v6971_v31 = vunpack.c.l.b16 %v2038_v50 }
 0x437   : > { %v6975_v61 = vpop.f32.mrf.mxu3 }
 0x43f   : > { %v1372_v57 = vpop.f32.mrf.mxu3 }
 0x440   : > { %v6977_v22 = vadd.f32 %v1372_v57, %v663_v13 }
 0x442   : > { %v1419_v10 = vsel %vm876_vm2, %v6977_v22, -inf }
 0x443   : > { %1420 = vmax.xlane.f32.xlu1 %v1419_v10 }
 0x447   : > { %v1374_v8 = vpop.f32.mrf.mxu3 }
 0x448   : > { %v6981_v54 = vadd.f32 %v1374_v8, %v664_v25 }
 0x44a   : > { %v1422_v19 = vsel %vm876_vm2, %v6981_v54, -inf }
 0x44b   : > { %1423 = vmax.xlane.f32.xlu0 %v1422_v19 }
 0x455   : > { %v1391_v50 = vpop.xlane.xlu2 %1390 }
 0x456   : > { %v1429_v9 = vsub.f32 %v6891_v14, %v1391_v50 }
 0x458   : > { %v1449_v7 = vmul.f32 1.442695, %v1429_v9 }
 0x45a   : > { %5353 = vpow2.f32 %v1449_v7 }
 0x45d   : > { %v1394_v13 = vpop.xlane.xlu2 %1393 }
 0x45e   : > { %v1430_v57 = vsub.f32 %v6902_v6, %v1394_v13 }
 0x460   : > { %v6989_v39 = vpop.eup %5353  ;;  %v1451_v10 = vmul.f32 1.442695, %v1430_v57 }
 0x461   : > { %v1485_v25 = vsel %vm876_vm2, %v6989_v39, 0.0 }
 0x462   : > { %5355 = vpow2.f32 %v1451_v10  ;;  %1486 = vadd.xlane.f32.xlu1 %v1485_v25 }
 0x465   : > { %v1397_v8 = vpop.xlane.xlu0 %1396  ;;  %v2145_v19 = vpop.permute.xlu2 %2144 }
 0x466   : > { %v1431_v21 = vsub.f32 %v6909_v55, %v1397_v8  ;;  %2166 = vmatpush.bf16.msrb.mxu3 %v2145_v19  ;;  %v8691_v8 = vld [vmem:[#allocation4_spill] sm:$0xff]  ;;  %v2309_v19 = vpop.f32.mrf.mxu1 }
 0x468   : > { %v6994_v14 = vpop.eup %5355  ;;  %v1453_v50 = vmul.f32 1.442695, %v1431_v21 }
 0x469   : > { %v1488_v9 = vsel %vm876_vm2, %v6994_v14, 0.0 }
 0x46a   : > { %5357 = vpow2.f32 %v1453_v50  ;;  %1489 = vadd.xlane.f32.xlu1 %v1488_v9  ;;  %v2379_v50 = vsub.f32 %v6661_v34, %v6881_v60 }
 0x46d   : > { %v1400_v6 = vpop.xlane.xlu1 %1399 }
 0x46e   : > { %v1432_v7 = vsub.f32 %v6920_v32, %v1400_v6  ;;  %v8692_v32 = vld [vmem:[#allocation3_spill] sm:$0xff]  ;;  %v2311_v9 = vpop.f32.mrf.mxu1  ;;  %v2397_v6 = vmul.f32 1.442695, %v2379_v50  ;;  %v2382_v50 = vsub.f32 %v6810_v35, %v6933_v47 }
 0x470   : > { %v6999_v13 = vpop.eup %5357  ;;  %v1455_v57 = vmul.f32 1.442695, %v1432_v7  ;;  %v7020_v7 = vadd.f32 %v2311_v9, %v6593_v23  ;;  %v7031_v23 = vadd.f32 %v2309_v19, %v6573_v37 }
 0x471   : > { %v1491_v10 = vsel %vm876_vm2, %v6999_v13, 0.0 }
 0x472   : > { %5359 = vpow2.f32 %v1455_v57  ;;  %1492 = vadd.xlane.f32.xlu0 %v1491_v10  ;;  %v1911_v57 = vsub.f32 %v6696_v5, %v6895_v29  ;;  %v1913_v5 = vsub.f32 %v6793_v48, %v6922_v56 }
 0x473   : > { %5361 = vpow2.f32 %v2397_v6  ;;  %v2381_v6 = vsub.f32 %v6732_v15, %v6926_v59 }
 0x474   : > { %v1937_v10 = vmul.f32 1.442695, %v1911_v57 }
 0x476   : > { %5363 = vpow2.f32 %v1937_v10  ;;  %v2403_v10 = vmul.f32 1.442695, %v2382_v50 }
 0x478   : > { %v7003_v55 = vpop.eup %5359  ;;  %v2143_v25 = vpop.permute.xlu0 %2142 }
 0x479   : > { %2167 = vmatpush.bf16.msrb.mxu3 %v2143_v25  ;;  %v1494_v21 = vsel %vm876_vm2, %v7003_v55, 0.0  ;;  %v2356_v25 = vsel %vm876_vm2, %v7020_v7, -inf  ;;  %v7028_v34 = vpop.eup %5361 }
 0x47a   : > { %1495 = vadd.xlane.f32.xlu2 %v1494_v21  ;;  %v2314_v21 = vpop.f32.mrf.mxu1  ;;  %v2431_v29 = vsel %vm876_vm2, %v7028_v34, 0.0 }
 0x47b   : > { %v7044_v37 = vadd.f32 %v2314_v21, %v6658_v33  ;;  %v1915_v21 = vsub.f32 %v6757_v2, %v6937_v12 }
 0x47d   : > { %v2359_v33 = vsel %vm876_vm2, %v7044_v37, -inf }
 0x482   : > { %v2316_v19 = vpop.f32.mrf.mxu1 }
 0x483   : > { %2543 = vrot.lane.b32.xlu1 %v8691_v8, %s5610_s17  ;;  %v7037_v8 = vpop.eup %5363 }
 0x484   : > { %v1979_v48 = vsel %vm876_vm2, %v7037_v8, 0.0 }
 0x486   : > { %2140 = vrot.lane.b32.xlu0 %v6071_v46, %s5607_s30 }
 0x48a   : > { %v7061_v47 = vpop.f32.mrf.mxu1 }
 0x48b   : > { %2138 = vrot.lane.b32.xlu1 %v6081_v42, %s5607_s30 }
 0x492   : > { %2545 = vrot.lane.b32.xlu2 %v8692_v32, %s5610_s17  ;;  %v2353_v32 = vsel %vm876_vm2, %v7031_v23, -inf }
 0x493   : > { %2541 = vrot.lane.b32.xlu1 %v5916_v28, %s5610_s17  ;;  %v1912_v28 = vsub.f32 %v6648_v40, %v6874_v17  ;;  %v2380_v40 = vsub.f32 %v6677_v52, %v6885_v30  ;;  %v1941_v17 = vmul.f32 1.442695, %v1913_v5  ;;  %v1945_v5 = vmul.f32 1.442695, %v1915_v21 }
 0x495   : > { %v1939_v60 = vmul.f32 1.442695, %v1912_v28  ;;  %v2399_v56 = vmul.f32 1.442695, %v2380_v40 }
 0x497   : > { %5365 = vpow2.f32 %v1939_v60  ;;  %v1914_v60 = vsub.f32 %v6718_v3, %v6943_v38  ;;  %v2384_v3 = vsub.f32 %v6781_v44, %v6947_v16 }
 0x498   : > { %5367 = vpow2.f32 %v1941_v17 }
 0x499   : > { %5369 = vpow2.f32 %v2399_v56  ;;  %v1943_v40 = vmul.f32 1.442695, %v1914_v60  ;;  %v2383_v56 = vsub.f32 %v6762_v11, %v6961_v63 }
 0x49b   : > { %v2405_v16 = vmul.f32 1.442695, %v2383_v56 }
 0x49d   : > { %v7050_v52 = vpop.eup %5365 }
 0x49e   : > { %v7059_v35 = vpop.eup %5367 }
 0x49f   : > { %v7065_v28 = vpop.eup %5369  ;;  %v1985_v15 = vsel %vm876_vm2, %v7059_v35, 0.0 }
 0x4a0   : > { %v2434_v2 = vsel %vm876_vm2, %v7065_v28, 0.0 }
 0x4b0   : > { %2357 = vmax.xlane.f32.xlu0 %v2356_v25  ;;  %v1982_v25 = vsel %vm876_vm2, %v7050_v52, 0.0 }
 0x4b6   : > { %v1421_v17 = vpop.xlane.xlu1 %1420 }
 0x4b8   : > { %2432 = vadd.xlane.f32.xlu0 %v2431_v29 }
 0x4bb   : > { %2354 = vmax.xlane.f32.xlu2 %v2353_v32  ;;  %v7080_v32 = vadd.f32 %v2316_v19, %v6672_v27 }
 0x4bd   : > { %1980 = vadd.xlane.f32.xlu1 %v1979_v48  ;;  %v2321_v48 = vpop.f32.mrf.mxu1  ;;  %v2362_v44 = vsel %vm876_vm2, %v7080_v32, -inf }
 0x4be   : > { %v1424_v9 = vpop.xlane.xlu0 %1423 }
 0x4bf   : > { %v1440_v30 = vsub.f32 %v6981_v54, %v1424_v9  ;;  %v2401_v54 = vmul.f32 1.442695, %v2381_v6  ;;  %v1439_v9 = vsub.f32 %v6977_v22, %v1421_v17 }
 0x4c0   : > { %2360 = vmax.xlane.f32.xlu0 %v2359_v33  ;;  %v7098_v33 = vadd.f32 %v2321_v48, %v6805_v18 }
 0x4c1   : > { %v1471_v57 = vmul.f32 1.442695, %v1440_v30  ;;  %v2407_v30 = vmul.f32 1.442695, %v2384_v3  ;;  %v1469_v11 = vmul.f32 1.442695, %v1439_v9 }
 0x4c3   : > { %5371 = vpow2.f32 %v1471_v57  ;;  %1983 = vadd.xlane.f32.xlu2 %v1982_v25 }
 0x4c4   : > { %5373 = vpow2.f32 %v2403_v10  ;;  %v2368_v10 = vsel %vm876_vm2, %v7098_v33, -inf }
 0x4c5   : > { %5375 = vpow2.f32 %v2401_v54  ;;  %v2324_v57 = vpop.f32.mrf.mxu1 }
 0x4c6   : > { %5377 = vpow2.f32 %v1945_v5 }
 0x4c7   : > { %5379 = vpow2.f32 %v1943_v40 }
 0x4c8   : > { %1986 = vadd.xlane.f32.xlu0 %v1985_v15  ;;  %5381 = vpow2.f32 %v2407_v30 }
 0x4c9   : > { %v7069_v59 = vpop.eup %5371  ;;  %5383 = vpow2.f32 %v2405_v16 }
 0x4ca   : > { %v1518_v29 = vsel %vm876_vm2, %v7069_v59, 0.0  ;;  %v7077_v12 = vpop.eup %5373 }
 0x4cb   : > { %1519 = vadd.xlane.f32.xlu1 %v1518_v29  ;;  %2435 = vadd.xlane.f32.xlu2 %v2434_v2  ;;  %v7084_v38 = vpop.eup %5375  ;;  %v2440_v50 = vsel %vm876_vm2, %v7077_v12, 0.0  ;;  %v1916_v29 = vsub.f32 %v6830_v51, %v6955_v20  ;;  %v7126_v51 = vadd.f32 %v7061_v47, %v6727_v26 }
 0x4cc   : > { %v2437_v27 = vsel %vm876_vm2, %v7084_v38, 0.0  ;;  %v7095_v19 = vpop.eup %5377 }
 0x4cd   : > { %v7100_v6 = vpop.eup %5379  ;;  %v1991_v22 = vsel %vm876_vm2, %v7095_v19, 0.0  ;;  %v2326_v3 = vpop.f32.mrf.mxu1  ;;  %v1947_v56 = vmul.f32 1.442695, %v1916_v29  ;;  %v7143_v29 = vadd.f32 %v2324_v57, %v6754_v1 }
 0x4ce   : > { %v1988_v25 = vsel %vm876_vm2, %v7100_v6, 0.0  ;;  %v7108_v18 = vpop.eup %5381  ;;  %v7129_v20 = vadd.f32 %v2326_v3, %v6774_v53 }
 0x4cf   : > { %v7110_v54 = vpop.eup %5383  ;;  %v2446_v5 = vsel %vm876_vm2, %v7108_v18, 0.0  ;;  %v2371_v3 = vsel %vm876_vm2, %v7143_v29, -inf }
 0x4d0   : > { %2441 = vadd.xlane.f32.xlu0 %v2440_v50  ;;  %v2443_v40 = vsel %vm876_vm2, %v7110_v54, 0.0  ;;  %v2374_v16 = vsel %vm876_vm2, %v7129_v20, -inf }
 0x4d3   : > { %2438 = vadd.xlane.f32.xlu1 %v2437_v27  ;;  %2363 = vmax.xlane.f32.xlu2 %v2362_v44 }
 0x4d5   : > { %v1487_v63 = vpop.xlane.xlu1 %1486 }
 0x4d6   : > { %5385 = vrcp.f32 %v1487_v63 }
 0x4d7   : > { %5387 = vpow2.f32 %v1469_v11  ;;  %v2365_v11 = vsel %vm876_vm2, %v7126_v51, -inf }
 0x4d8   : > { %1992 = vadd.xlane.f32.xlu0 %v1991_v22 }
 0x4db   : > { %2369 = vmax.xlane.f32.xlu1 %v2368_v10  ;;  %1989 = vadd.xlane.f32.xlu2 %v1988_v25 }
 0x4dc   : > { %v5386_v15 = vpop.eup %5385 }
 0x4dd   : > { %v1490_v21 = vpop.xlane.xlu1 %1489  ;;  %v7112_v60 = vpop.eup %5387  ;;  %v1541_v2 = vmul.f32 %v5386_v15, %v6989_v39 }
 0x4de   : > { %5389 = vrcp.f32 %v1490_v21  ;;  %v1515_v17 = vsel %vm876_vm2, %v7112_v60, 0.0 }
 0x4df   : > { %v1557_v30 = vpack.c.bf16 %v1541_v2, %v1541_v2 }
 0x4e0   : > { %2447 = vadd.xlane.f32.xlu0 %v2446_v5 }
 0x4e1   : > { %v1581_v27 = vunpack.c.l.b16 %v1557_v30 }
 0x4e3   : > { %2444 = vadd.xlane.f32.xlu1 %v2443_v40  ;;  %1516 = vadd.xlane.f32.xlu2 %v1515_v17 }
 0x4e4   : > { %v5390_v48 = vpop.eup %5389 }
 0x4e5   : > { %v1493_v50 = vpop.xlane.xlu0 %1492  ;;  %v1542_v9 = vmul.f32 %v5390_v48, %v6994_v14 }
 0x4e6   : > { %5391 = vrcp.f32 %v1493_v50  ;;  %v8694_v50 = vld [vmem:[#allocation16_spill] sm:$0xff] }
 0x4e7   : > { %v1558_v39 = vpack.c.bf16 %v1542_v9, %v1542_v9  ;;  %5393 = vpow2.f32 %v1947_v56 }
 0x4e9   : > { %v1582_v44 = vunpack.c.l.b16 %v1558_v39 }
 0x4eb   : > { %2375 = vmax.xlane.f32.xlu1 %v2374_v16  ;;  %2366 = vmax.xlane.f32.xlu2 %v2365_v11  ;;  %v1587_v14 = vpack.c.b16 %v1582_v44, %v1581_v27 }
 0x4ec   : > { %v5392_v26 = vpop.eup %5391 }
 0x4ed   : > { %v1496_v63 = vpop.xlane.xlu2 %1495  ;;  %4926 = vmatmul.msk.bf16.gmra.mxu2 %vm876_vm2, %v1587_v14  ;;  %v7136_v53 = vpop.eup %5393  ;;  %v1543_v47 = vmul.f32 %v5392_v26, %v6999_v13 }
 0x4ee   : > { %5395 = vrcp.f32 %v1496_v63  ;;  %v1994_v22 = vsel %vm876_vm2, %v7136_v53, 0.0 }
 0x4ef   : > { %v1559_v5 = vpack.c.bf16 %v1543_v47, %v1543_v47  ;;  %5397 = vrcp.f32 %v6618_v41  ;;  %v8693_v41 = vld [vmem:[#allocation17_spill] sm:$0xff] }
 0x4f0   : > { %5399 = vrcp.f32 %v6679_v62 }
 0x4f1   : > { %v1583_v40 = vunpack.c.l.b16 %v1559_v5  ;;  %5401 = vrcp.f32 %v6897_v4  ;;  %v8695_v4 = vld [vmem:[#allocation11_spill] sm:$0xff] }
 0x4f2   : > { %5403 = vrcp.f32 %v6866_v49 }
 0x4f3   : > { %1995 = vadd.xlane.f32.xlu2 %v1994_v22  ;;  %5405 = vrcp.f32 %v6911_v43 }
 0x4f4   : > { %v5396_v10 = vpop.eup %5395  ;;  %5407 = vrcp.f32 %v8695_v4 }
 0x4f5   : > { %v2546_v25 = vpop.permute.xlu2 %2545  ;;  %v2544_v21 = vpop.permute.xlu1 %2543  ;;  %v1544_v15 = vmul.f32 %v5396_v10, %v7003_v55 }
 0x4f6   : > { %2570 = vmatpush.bf16.msra.mxu2 %v2546_v25  ;;  %v5398_v48 = vpop.eup %5397 }
 0x4f7   : > { %v1560_v2 = vpack.c.bf16 %v1544_v15, %v1544_v15  ;;  %v5400_v57 = vpop.eup %5399  ;;  %v2014_v56 = vmul.f32 %v5398_v48, %v8693_v41  ;;  %v8696_v15 = vld [vmem:[#allocation26_spill] sm:$0xff] }
 0x4f8   : > { %v2141_v13 = vpop.permute.xlu0 %2140  ;;  %v2013_v62 = vmul.f32 %v5400_v57, %v8694_v50  ;;  %v5402_v11 = vpop.eup %5401 }
 0x4f9   : > { %2168 = vmatpush.bf16.msrb.mxu3 %v2141_v13  ;;  %v1584_v17 = vunpack.c.l.b16 %v1560_v2  ;;  %v2030_v9 = vpack.c.bf16 %v2014_v56, %v2014_v56  ;;  %v5404_v14 = vpop.eup %5403  ;;  %v2015_v63 = vmul.f32 %v5402_v11, %v6746_v36  ;;  %v8697_v2 = vld [vmem:[#allocation25_spill] sm:$0xff] }
 0x4fa   : > { %2571 = vmatpush.bf16.msra.mxu2 %v2544_v21  ;;  %v2029_v30 = vpack.c.bf16 %v2013_v62, %v2013_v62  ;;  %v2016_v26 = vmul.f32 %v5404_v14, %v6639_v24  ;;  %v5406_v49 = vpop.eup %5405 }
 0x4fb   : > { %2372 = vmax.xlane.f32.xlu2 %v2371_v3  ;;  %v1588_v55 = vpack.c.b16 %v1584_v17, %v1583_v40  ;;  %v2054_v27 = vunpack.c.l.b16 %v2030_v9  ;;  %v2031_v47 = vpack.c.bf16 %v2015_v63, %v2015_v63  ;;  %v5408_v21 = vpop.eup %5407  ;;  %v2018_v5 = vmul.f32 %v5406_v49, %v8696_v15  ;;  %v8698_v3 = vld [vmem:[#allocation7_spill] sm:$0xff] }
 0x4fc   : > { %v2053_v44 = vunpack.c.l.b16 %v2029_v30  ;;  %v2017_v13 = vmul.f32 %v5408_v21, %v8697_v2  ;;  %5409 = vrcp.f32 %v8698_v3  ;;  %v8700_v30 = vld [vmem:[#allocation18_spill] sm:$0xff] }
 0x4fd   : > { %4927 = vmatmul.msk.bf16.gmra.mxu2 %vm876_vm2, %v1588_v55  ;;  %v2139_v1 = vpop.permute.xlu1 %2138  ;;  %v2055_v22 = vunpack.c.l.b16 %v2031_v47  ;;  %v2034_v36 = vpack.c.bf16 %v2018_v5, %v2018_v5  ;;  %v8699_v55 = vld [vmem:[#allocation19_spill] sm:$0xff] }
 0x4fe   : > { %2169 = vmatpush.bf16.msrb.mxu3 %v2139_v1  ;;  %v2061_v16 = vpack.c.b16 %v2054_v27, %v2053_v44  ;;  %v2033_v17 = vpack.c.bf16 %v2017_v13, %v2017_v13  ;;  %5411 = vrcp.f32 %v8699_v55 }
 0x4ff   : > { %v2058_v48 = vunpack.c.l.b16 %v2034_v36 }
 0x500   : > { %v2057_v1 = vunpack.c.l.b16 %v2033_v17 }
 0x502   : > { %v2063_v41 = vpack.c.b16 %v2058_v48, %v2057_v1  ;;  %v5410_v56 = vpop.eup %5409  ;;  %v8704_v1 = vld [vmem:[#allocation9_spill] sm:$0xff] }
 0x504   : > { %2620 = vrot.lane.b32.xlu1 %v8680_v58, %s5610_s17  ;;  %v2032_v58 = vpack.c.bf16 %v2016_v26, %v2016_v26  ;;  %v5412_v50 = vpop.eup %5411 }
 0x505   : > { %v2542_v39 = vpop.permute.xlu1 %2541 }
 0x506   : > { %2572 = vmatpush.bf16.msra.mxu2 %v2542_v39  ;;  %v2056_v10 = vunpack.c.l.b16 %v2032_v58 }
 0x508   : > { %v2062_v25 = vpack.c.b16 %v2056_v10, %v2055_v22  ;;  %v8702_v22 = vld [vmem:[#allocation6_spill] sm:$0xff] }
 0x50d   : > { %4940 = vmatmul.msk.bf16.vlgmr.msrb.gmra.mxu2 %vm876_vm2, %v2061_v16  ;;  %v8701_v16 = vld [vmem:[#allocation27_spill] sm:$0xff] }
 0x50e   : > { %v2020_v11 = vmul.f32 %v5412_v50, %v8701_v16 }
 0x510   : > { %v2036_v58 = vpack.c.bf16 %v2020_v11, %v2020_v11  ;;  %v7201_v11 = vpop.f32.mrf.mxu2 }
 0x512   : > { %v2060_v21 = vunpack.c.l.b16 %v2036_v58 }
 0x51d   : > { %4941 = vmatmul.msk.bf16.gmra.mxu2 %vm876_vm2, %v2062_v25 }
 0x523   : > { %v2358_v40 = vpop.xlane.xlu0 %2357 }
 0x524   : > { %v2386_v24 = vsub.f32 %v7020_v7, %v2358_v40  ;;  %v2019_v7 = vmul.f32 %v5410_v56, %v8700_v30 }
 0x526   : > { %v2411_v43 = vmul.f32 1.442695, %v2386_v24  ;;  %v2035_v63 = vpack.c.bf16 %v2019_v7, %v2019_v7 }
 0x528   : > { %5413 = vpow2.f32 %v2411_v43  ;;  %v2059_v25 = vunpack.c.l.b16 %v2035_v63  ;;  %v8703_v43 = vld [vmem:[#allocation8_spill] sm:$0xff] }
 0x52a   : > { %v2064_v2 = vpack.c.b16 %v2060_v21, %v2059_v25  ;;  %v7211_v21 = vpop.f32.mrf.mxu2 }
 0x52b   : > { %v2433_v57 = vpop.xlane.xlu0 %2432 }
 0x52d   : > { %4942 = vmatmul.msk.bf16.gmra.mxu2 %vm876_vm2, %v2063_v41 }
 0x52e   : > { %v7168_v62 = vpop.eup %5413  ;;  %v2355_v9 = vpop.xlane.xlu2 %2354 }
 0x52f   : > { %v2385_v39 = vsub.f32 %v7031_v23, %v2355_v9  ;;  %v2452_v27 = vsel %vm876_vm2, %v7168_v62, 0.0 }
 0x530   : > { %2453 = vadd.xlane.f32.xlu2 %v2452_v27  ;;  %v1981_v44 = vpop.xlane.xlu1 %1980 }
 0x531   : > { %v2409_v14 = vmul.f32 1.442695, %v2385_v39  ;;  %5415 = vrcp.f32 %v1981_v44 }
 0x533   : > { %5417 = vpow2.f32 %v2409_v14  ;;  %v2361_v26 = vpop.xlane.xlu0 %2360 }
 0x534   : > { %v2387_v47 = vsub.f32 %v7044_v37, %v2361_v26  ;;  %5419 = vrcp.f32 %v8702_v22 }
 0x535   : > { %5421 = vrcp.f32 %v6986_v0 }
 0x536   : > { %v2413_v23 = vmul.f32 1.442695, %v2387_v47  ;;  %v1984_v4 = vpop.xlane.xlu2 %1983 }
 0x537   : > { %v5416_v10 = vpop.eup %5415  ;;  %5423 = vrcp.f32 %v1984_v4 }
 0x538   : > { %5425 = vpow2.f32 %v2413_v23  ;;  %v2023_v15 = vmul.f32 %v5416_v10, %v7037_v8 }
 0x539   : > { %v7178_v49 = vpop.eup %5417 }
 0x53a   : > { %v2449_v5 = vsel %vm876_vm2, %v7178_v49, 0.0  ;;  %v5420_v37 = vpop.eup %5419  ;;  %v2039_v40 = vpack.c.bf16 %v2023_v15, %v2023_v15 }
 0x53b   : > { %2450 = vadd.xlane.f32.xlu0 %v2449_v5  ;;  %v5422_v13 = vpop.eup %5421  ;;  %v2489_v41 = vmul.f32 %v5420_v37, %v8704_v1  ;;  %v7197_v44 = vpop.xlane.xlu0 %1986 }
 0x53c   : > { %v2490_v55 = vmul.f32 %v5422_v13, %v8703_v43  ;;  %v7191_v56 = vunpack.c.l.b16 %v2039_v40  ;;  %v1627_v43 = vpop.f32.mrf.mxu2 }
 0x53d   : > { %v5424_v36 = vpop.eup %5423  ;;  %4943 = vmatmul.msk.bf16.gmra.mxu2 %vm876_vm2, %v2064_v2 }
 0x53e   : > { %v7184_v0 = vpop.eup %5425  ;;  %v2024_v24 = vmul.f32 %v5424_v36, %v7050_v52  ;;  %v2436_v17 = vpop.xlane.xlu2 %2435  ;;  %v2506_v9 = vpack.c.bf16 %v2490_v55, %v2490_v55  ;;  %v2505_v52 = vpack.c.bf16 %v2489_v41, %v2489_v41 }
 0x53f   : > { %v1520_v3 = vpop.xlane.xlu1 %1519  ;;  %v2455_v8 = vsel %vm876_vm2, %v7184_v0, 0.0  ;;  %5427 = vrcp.f32 %v2436_v17 }
 0x540   : > { %v2040_v48 = vpack.c.bf16 %v2024_v24, %v2024_v24  ;;  %2456 = vadd.xlane.f32.xlu1 %v2455_v8  ;;  %v2530_v27 = vunpack.c.l.b16 %v2506_v9  ;;  %5429 = vrcp.f32 %v2433_v57  ;;  %v2529_v16 = vunpack.c.l.b16 %v2505_v52  ;;  %v8705_v57 = vld [vmem:[#allocation5_spill] sm:$0xff] }
 0x541   : > { %5431 = vrcp.f32 %v1520_v3 }
 0x542   : > { %v7193_v50 = vunpack.c.l.b16 %v2040_v48  ;;  %v2537_v14 = vpack.c.b16 %v2530_v27, %v2529_v16 }
 0x543   : > { %v2442_v4 = vpop.xlane.xlu0 %2441 }
 0x544   : > { %v2135_v30 = vpack.c.b16 %v7193_v50, %v7191_v56 }
 0x545   : > { %v5428_v63 = vpop.eup %5427 }
 0x546   : > { %v2364_v7 = vpop.xlane.xlu2 %2363  ;;  %v5430_v26 = vpop.eup %5429  ;;  %v2492_v22 = vmul.f32 %v5428_v63, %v7065_v28 }
 0x547   : > { %v2439_v39 = vpop.xlane.xlu1 %2438  ;;  %v5432_v37 = vpop.eup %5431  ;;  %v2388_v48 = vsub.f32 %v7080_v32, %v2364_v7 }
 0x548   : > { %2616 = vrot.lane.b32.xlu2 %v6071_v46, %s5610_s17  ;;  %v2491_v46 = vmul.f32 %v5430_v26, %v7028_v34  ;;  %v2508_v25 = vpack.c.bf16 %v2492_v22, %v2492_v22 }
 0x54a   : > { %v2507_v15 = vpack.c.bf16 %v2491_v46, %v2491_v46  ;;  %v2532_v2 = vunpack.c.l.b16 %v2508_v25 }
 0x54b   : > { %v7220_v36 = vpop.xlane.xlu0 %1992 }
 0x54c   : > { %v2531_v34 = vunpack.c.l.b16 %v2507_v15 }
 0x54d   : > { %4956 = vmatmul.msk.bf16.vlgmr.msra.gmra.mxu2 %vm876_vm2, %v2537_v14 }
 0x54e   : > { %v7204_v47 = vpop.xlane.xlu2 %1989  ;;  %v2538_v40 = vpack.c.b16 %v2532_v2, %v2531_v34 }
 0x54f   : > { %v2370_v58 = vpop.xlane.xlu1 %2369  ;;  %2618 = vrot.lane.b32.xlu0 %v8705_v57, %s5610_s17 }
 0x550   : > { %v2390_v23 = vsub.f32 %v7098_v33, %v2370_v58  ;;  %v1552_v33 = vmul.f32 %v5432_v37, %v7069_v59 }
 0x552   : > { %v2419_v10 = vmul.f32 1.442695, %v2390_v23 }
 0x553   : > { %v2448_v26 = vpop.xlane.xlu0 %2447 }
 0x554   : > { %5433 = vpow2.f32 %v2419_v10 }
 0x555   : > { %5435 = vrcp.f32 %v2439_v39  ;;  %v2415_v39 = vmul.f32 1.442695, %v2388_v48 }
 0x556   : > { %v1517_v5 = vpop.xlane.xlu2 %1516 }
 0x557   : > { %5437 = vrcp.f32 %v1517_v5  ;;  %2614 = vrot.lane.b32.xlu0 %v6081_v42, %s5610_s17  ;;  %v1568_v42 = vpack.c.bf16 %v1552_v33, %v1552_v33  ;;  %v2445_v16 = vpop.xlane.xlu1 %2444  ;;  %v5094_v33 = vpack.i.bf16 %v7211_v21, %v7201_v11 }
 0x558   : > { %5439 = vrcp.f32 %v2442_v4  ;;  %v1695_v4 = vpop.f32.mrf.mxu3 }
 0x559   : > { %v1657_v9 = vunpack.c.l.b16 %v1568_v42  ;;  %5441 = vrcp.f32 %v2445_v16 }
 0x55a   : > { %v7215_v28 = vpop.eup %5433  ;;  %5443 = vpow2.f32 %v2415_v39 }
 0x55b   : > { %v2464_v13 = vsel %vm876_vm2, %v7215_v28, 0.0  ;;  %v5436_v24 = vpop.eup %5435  ;;  %5445 = vrcp.f32 %v2448_v26 }
 0x55c   : > { %2465 = vadd.xlane.f32.xlu1 %v2464_v13  ;;  %v2493_v59 = vmul.f32 %v5436_v24, %v7084_v38 }
 0x55d   : > { %v5438_v17 = vpop.eup %5437  ;;  %4957 = vmatmul.msk.bf16.gmra.mxu2 %vm876_vm2, %v2538_v40 }
 0x55e   : > { %v5440_v3 = vpop.eup %5439  ;;  %v1551_v55 = vmul.f32 %v5438_v17, %v7112_v60  ;;  %v2367_v8 = vpop.xlane.xlu2 %2366  ;;  %v2509_v27 = vpack.c.bf16 %v2493_v59, %v2493_v59 }
 0x55f   : > { %v2494_v41 = vmul.f32 %v5440_v3, %v7077_v12  ;;  %v1629_v60 = vpop.f32.mrf.mxu2  ;;  %v5442_v12 = vpop.eup %5441  ;;  %v2389_v25 = vsub.f32 %v7126_v51, %v2367_v8  ;;  %v8706_v51 = vpack.c.b16 %v6971_v31, %v6969_v45 }
 0x560   : > { %v1567_v1 = vpack.c.bf16 %v1551_v55, %v1551_v55  ;;  %v2533_v32 = vunpack.c.l.b16 %v2509_v27  ;;  %v7230_v22 = vpop.eup %5443  ;;  %v2376_v57 = vpop.xlane.xlu1 %2375  ;;  %v2495_v10 = vmul.f32 %v5442_v12, %v7110_v54  ;;  %v5109_v42 = vpack.i.bf16 %v1629_v60, %v1627_v43 }
 0x561   : > { %v2510_v63 = vpack.c.bf16 %v2494_v41, %v2494_v41  ;;  %v5446_v23 = vpop.eup %5445  ;;  %v2458_v37 = vsel %vm876_vm2, %v7230_v22, 0.0  ;;  %v2417_v40 = vmul.f32 1.442695, %v2389_v25  ;;  %v1697_v11 = vpop.f32.mrf.mxu3 }
 0x562   : > { %v1656_v52 = vunpack.c.l.b16 %v1567_v1  ;;  %v2496_v2 = vmul.f32 %v5446_v23, %v7108_v18  ;;  %v2511_v13 = vpack.c.bf16 %v2495_v10, %v2495_v10  ;;  %v2392_v18 = vsub.f32 %v7129_v20, %v2376_v57 }
 0x563   : > { %v2534_v38 = vunpack.c.l.b16 %v2510_v63 }
 0x564   : > { %v1661_v14 = vpack.c.b16 %v1657_v9, %v1656_v52  ;;  %v2512_v54 = vpack.c.bf16 %v2496_v2, %v2496_v2  ;;  %v2535_v24 = vunpack.c.l.b16 %v2511_v13  ;;  %v2423_v8 = vmul.f32 1.442695, %v2392_v18 }
 0x565   : > { %v2539_v7 = vpack.c.b16 %v2534_v38, %v2533_v32 }
 0x566   : > { %v7227_v58 = vpop.xlane.xlu2 %1995  ;;  %4931 = vmatmul.msk.bf16.gmra.mxu3 %vm876_vm2, %v1661_v14  ;;  %v2536_v21 = vunpack.c.l.b16 %v2512_v54 }
 0x568   : > { %v2540_v45 = vpack.c.b16 %v2536_v21, %v2535_v24 }
 0x569   : > { %v1700_v59 = vpop.f32.mrf.mxu3 }
 0x56d   : > { %4958 = vmatmul.msk.bf16.gmra.mxu2 %vm876_vm2, %v2539_v7 }
 0x56e   : > { %v2373_v46 = vpop.xlane.xlu2 %2372 }
 0x56f   : > { %v2391_v15 = vsub.f32 %v7143_v29, %v2373_v46 }
 0x570   : > { %v1632_v5 = vpop.f32.mrf.mxu2 }
 0x571   : > { %v2421_v34 = vmul.f32 1.442695, %v2391_v15  ;;  %2459 = vadd.xlane.f32.xlu2 %v2458_v37  ;;  %v1702_v14 = vpop.f32.mrf.mxu3 }
 0x572   : > { %v5169_v23 = vpack.i.bf16 %v1702_v14, %v1700_v59 }
 0x573   : > { %5447 = vpow2.f32 %v2421_v34 }
 0x574   : > { %5449 = vpow2.f32 %v2417_v40 }
 0x575   : > { %5095 = vrot.lane.b32.xlu1 %v5094_v33, %s5609_s16  ;;  %5451 = vrcp.f32 %v7204_v47 }
 0x576   : > { %4944 = vmatmul.msk.bf16.vlgmr.msrb.gmra.mxu3 %vm876_vm2, %v8706_v51  ;;  %v2621_v29 = vpop.permute.xlu1 %2620  ;;  %5453 = vpow2.f32 %v2423_v8 }
 0x577   : > { %2642 = vmatpush.bf16.msra.mxu3 %v2621_v29  ;;  %5455 = vrcp.f32 %v7197_v44 }
 0x578   : > { %v1634_v17 = vpop.f32.mrf.mxu2  ;;  %5457 = vrcp.f32 %v7227_v58 }
 0x579   : > { %v7247_v3 = vpop.eup %5447  ;;  %v5124_v43 = vpack.i.bf16 %v1634_v17, %v1632_v5  ;;  %5459 = vrcp.f32 %v7220_v36  ;;  %v1705_v60 = vpop.f32.mrf.mxu3 }
 0x57a   : > { %v2467_v55 = vsel %vm876_vm2, %v7247_v3, 0.0  ;;  %v7252_v31 = vpop.eup %5449 }
 0x57b   : > { %2468 = vadd.xlane.f32.xlu2 %v2467_v55  ;;  %v2461_v48 = vsel %vm876_vm2, %v7252_v31, 0.0  ;;  %v5452_v1 = vpop.eup %5451 }
 0x57c   : > { %v7260_v41 = vpop.eup %5453  ;;  %v2026_v9 = vmul.f32 %v5452_v1, %v7100_v6  ;;  %v5154_v6 = vpack.i.bf16 %v1697_v11, %v1695_v4 }
 0x57d   : > { %5110 = vrot.lane.b32.xlu1 %v5109_v42, %s5609_s16  ;;  %4959 = vmatmul.msk.bf16.gmra.mxu2 %vm876_vm2, %v2540_v45  ;;  %v5456_v47 = vpop.eup %5455  ;;  %v2470_v44 = vsel %vm876_vm2, %v7260_v41, 0.0 }
 0x57e   : > { %v2025_v27 = vmul.f32 %v5456_v47, %v7059_v35  ;;  %v2042_v16 = vpack.c.bf16 %v2026_v9, %v2026_v9  ;;  %v5458_v32 = vpop.eup %5457 }
 0x57f   : > { %v5460_v35 = vpop.eup %5459  ;;  %v2028_v38 = vmul.f32 %v5458_v32, %v7136_v53 }
 0x580   : > { %v1637_v20 = vpop.f32.mrf.mxu2  ;;  %v2041_v63 = vpack.c.bf16 %v2025_v27, %v2025_v27  ;;  %v2131_v56 = vunpack.c.l.b16 %v2042_v16  ;;  %v2027_v58 = vmul.f32 %v5460_v35, %v7095_v19 }
 0x581   : > { %2462 = vadd.xlane.f32.xlu0 %v2461_v48  ;;  %v2044_v36 = vpack.c.bf16 %v2028_v38, %v2028_v38  ;;  %v1707_v46 = vpop.f32.mrf.mxu3 }
 0x582   : > { %v2043_v57 = vpack.c.bf16 %v2027_v58, %v2027_v58  ;;  %v5184_v25 = vpack.i.bf16 %v1707_v46, %v1705_v60 }
 0x583   : > { %v2133_v4 = vunpack.c.l.b16 %v2044_v36 }
 0x584   : > { %v2132_v15 = vunpack.c.l.b16 %v2043_v57 }
 0x585   : > { %5125 = vrot.lane.b32.xlu1 %v5124_v43, %s5609_s16 }
 0x586   : > { %4945 = vmatmul.msk.bf16.gmra.mxu3 %vm876_vm2, %v2135_v30  ;;  %v2130_v30 = vunpack.c.l.b16 %v2041_v63  ;;  %v2137_v5 = vpack.c.b16 %v2133_v4, %v2132_v15 }
 0x588   : > { %v1639_v52 = vpop.f32.mrf.mxu2  ;;  %v2136_v26 = vpack.c.b16 %v2131_v56, %v2130_v30 }
 0x589   : > { %v5139_v39 = vpack.i.bf16 %v1639_v52, %v1637_v20  ;;  %2471 = vadd.xlane.f32.xlu0 %v2470_v44 }
 0x58d   : > { %5140 = vrot.lane.b32.xlu1 %v5139_v39, %s5609_s16 }
 0x590   : > { %v2098_v50 = vpop.f32.mrf.mxu2 }
 0x595   : > { %5155 = vrot.lane.b32.xlu1 %v5154_v6, %s5609_s16 }
 0x596   : > { %4946 = vmatmul.msk.bf16.gmra.mxu3 %vm876_vm2, %v2136_v26 }
 0x598   : > { %v2100_v7 = vpop.f32.mrf.mxu2 }
 0x599   : > { %v5099_v12 = vpack.i.bf16 %v2100_v7, %v2098_v50 }
 0x59b   : > { %5100 = vrot.lane.b32.xlu2 %v5099_v12, %s5608_s15 }
 0x59d   : > { %5170 = vrot.lane.b32.xlu1 %v5169_v23, %s5609_s16 }
 0x5a0   : > { %v2103_v10 = vpop.f32.mrf.mxu2 }
 0x5a3   : > { %v2454_v19 = vpop.xlane.xlu2 %2453 }
 0x5a5   : > { %5185 = vrot.lane.b32.xlu1 %v5184_v25, %s5609_s16 }
 0x5a6   : > { %4947 = vmatmul.msk.bf16.gmra.mxu3 %vm876_vm2, %v2137_v5 }
 0x5a8   : > { %v2105_v53 = vpop.f32.mrf.mxu2 }
 0x5a9   : > { %v5114_v43 = vpack.i.bf16 %v2105_v53, %v2103_v10 }
 0x5ab   : > { %v2617_v17 = vpop.permute.xlu2 %2616 }
 0x5ae   : > { %v2451_v2 = vpop.xlane.xlu0 %2450 }
 0x5af   : > { %5461 = vrcp.f32 %v2451_v2 }
 0x5b0   : > { %v2108_v37 = vpop.f32.mrf.mxu2  ;;  %5463 = vrcp.f32 %v2454_v19 }
 0x5b5   : > { %v5462_v33 = vpop.eup %5461 }
 0x5b6   : > { %v5464_v13 = vpop.eup %5463  ;;  %v2497_v40 = vmul.f32 %v5462_v33, %v7178_v49 }
 0x5b7   : > { %v2498_v51 = vmul.f32 %v5464_v13, %v7168_v62  ;;  %v2457_v62 = vpop.xlane.xlu1 %2456 }
 0x5b8   : > { %v2110_v34 = vpop.f32.mrf.mxu2  ;;  %v2513_v24 = vpack.c.bf16 %v2497_v40, %v2497_v40  ;;  %5465 = vrcp.f32 %v2457_v62 }
 0x5b9   : > { %v2514_v18 = vpack.c.bf16 %v2498_v51, %v2498_v51  ;;  %v5129_v52 = vpack.i.bf16 %v2110_v34, %v2108_v37 }
 0x5ba   : > { %v2602_v11 = vunpack.c.l.b16 %v2513_v24 }
 0x5bb   : > { %v2603_v42 = vunpack.c.l.b16 %v2514_v18 }
 0x5bd   : > { %v2610_v8 = vpack.c.b16 %v2603_v42, %v2602_v11 }
 0x5be   : > { %v5466_v1 = vpop.eup %5465 }
 0x5bf   : > { %v2499_v47 = vmul.f32 %v5466_v1, %v7184_v0 }
 0x5c0   : > { %v2113_v54 = vpop.f32.mrf.mxu2 }
 0x5c1   : > { %v2619_v29 = vpop.permute.xlu0 %2618  ;;  %v2515_v16 = vpack.c.bf16 %v2499_v47, %v2499_v47 }
 0x5c2   : > { %2643 = vmatpush.bf16.msra.mxu3 %v2619_v29 }
 0x5c3   : > { %v2604_v50 = vunpack.c.l.b16 %v2515_v16 }
 0x5c6   : > { %2644 = vmatpush.bf16.msra.mxu3 %v2617_v17 }
 0x5c8   : > { %v2115_v21 = vpop.f32.mrf.mxu2 }
 0x5c9   : > { %v2615_v55 = vpop.permute.xlu0 %2614  ;;  %v5144_v26 = vpack.i.bf16 %v2115_v21, %v2113_v54 }
 0x5ca   : > { %2645 = vmatpush.bf16.msra.mxu3 %v2615_v55  ;;  %v5060_v55 = vld [vmem:[%s8585_s3 + $0x10] sm:$0xff] }
 0x5cd   : > { %4960 = vmatmul.msk.bf16.vlgmr.msra.gmra.mxu3 %vm876_vm2, %v2610_v8  ;;  %v5059_v8 = vld [vmem:[%s8585_s3 + $0x8] sm:$0xff] }
 0x5cf   : > { %v2466_v14 = vpop.xlane.xlu1 %2465 }
 0x5d0   : > { %v2574_v45 = vpop.f32.mrf.mxu2 }
 0x5d8   : > { %v2576_v20 = vpop.f32.mrf.mxu2 }
 0x5d9   : > { %v5104_v49 = vpack.i.bf16 %v2576_v20, %v2574_v45  ;;  %v5058_v20 = vld [vmem:[%s8585_s3] sm:$0xff] }
 0x5db   : > { %5105 = vrot.lane.b32.xlu0 %v5104_v49, %s5605_s26 }
 0x5e0   : > { %v2579_v48 = vpop.f32.mrf.mxu2 }
 0x5e3   : > { %5115 = vrot.lane.b32.xlu0 %v5114_v43, %s5608_s15 }
 0x5e4   : > { %v2460_v59 = vpop.xlane.xlu2 %2459 }
 0x5e5   : > { %5467 = vrcp.f32 %v2460_v59 }
 0x5e6   : > { %5469 = vrcp.f32 %v2466_v14 }
 0x5e8   : > { %v2581_v9 = vpop.f32.mrf.mxu2 }
 0x5e9   : > { %v5119_v44 = vpack.i.bf16 %v2581_v9, %v2579_v48  ;;  %v1710_v39 = vpop.f32.mrf.mxu3  ;;  %v5096_v48 = vpop.permute.xlu1 %5095 }
 0x5ea   : > { %v5098_v59 = vunpack.i.h.bf16 %v5096_v48  ;;  %v5097_v1 = vunpack.i.l.bf16 %v5096_v48 }
 0x5eb   : > { %v5468_v27 = vpop.eup %5467  ;;  %5120 = vrot.lane.b32.xlu2 %v5119_v44, %s5605_s26  ;;  %5130 = vrot.lane.b32.xlu0 %v5129_v52, %s5608_s15  ;;  %v8707_v44 = vld [vmem:[#allocation15_spill] sm:$0xff] }
 0x5ec   : > { %v2500_v63 = vmul.f32 %v5468_v27, %v7230_v22  ;;  %v5470_v38 = vpop.eup %5469  ;;  %v8708_v27 = vld [vmem:[#allocation12_spill] sm:$0xff] }
 0x5ed   : > { %v2502_v22 = vmul.f32 %v5470_v38, %v7215_v28  ;;  %v2859_v16 = vsel %vm741_vm1, %v8708_v27, %v5097_v1 }
 0x5ee   : > { %v2516_v56 = vpack.c.bf16 %v2500_v63, %v2500_v63  ;;  %v2469_v57 = vpop.xlane.xlu2 %2468 }
 0x5ef   : > { %v2518_v36 = vpack.c.bf16 %v2502_v22, %v2502_v22 }
 0x5f0   : > { %v2605_v6 = vunpack.c.l.b16 %v2516_v56  ;;  %v2584_v30 = vpop.f32.mrf.mxu2 }
 0x5f1   : > { %v1712_v0 = vpop.f32.mrf.mxu3  ;;  %v2607_v25 = vunpack.c.l.b16 %v2518_v36  ;;  %v8709_v36 = vld [vmem:[#allocation22_spill] sm:$0xff] }
 0x5f2   : > { %v5199_v32 = vpack.i.bf16 %v1712_v0, %v1710_v39  ;;  %v2611_v60 = vpack.c.b16 %v2605_v6, %v2604_v50  ;;  %v2860_v39 = vsel %vm741_vm1, %v8707_v44, %v5098_v59  ;;  %v8713_v59 = vld [vmem:[#allocation23_spill] sm:$0xff] }
 0x5f3   : > { %5145 = vrot.lane.b32.xlu0 %v5144_v26, %s5608_s15 }
 0x5f4   : > { %v2463_v35 = vpop.xlane.xlu0 %2462  ;;  %5200 = vrot.lane.b32.xlu1 %v5199_v32, %s5609_s16  ;;  %4961 = vmatmul.msk.bf16.gmra.mxu3 %vm876_vm2, %v2611_v60  ;;  %v5111_v32 = vpop.permute.xlu1 %5110 }
 0x5f5   : > { %5471 = vrcp.f32 %v2463_v35  ;;  %v5113_v35 = vunpack.i.h.bf16 %v5111_v32  ;;  %v5112_v38 = vunpack.i.l.bf16 %v5111_v32 }
 0x5f6   : > { %v5101_v43 = vpop.permute.xlu2 %5100 }
 0x5f7   : > { %v5103_v47 = vunpack.i.h.bf16 %v5101_v43  ;;  %v5102_v9 = vunpack.i.l.bf16 %v5101_v43 }
 0x5f8   : > { %v2586_v7 = vpop.f32.mrf.mxu2 }
 0x5f9   : > { %v2171_v12 = vpop.f32.mrf.mxu3  ;;  %v5134_v23 = vpack.i.bf16 %v2586_v7, %v2584_v30  ;;  %v2875_v56 = vsel %vm526_vm0, %v2859_v16, %v5102_v9  ;;  %v2876_v50 = vsel %vm526_vm0, %v2860_v39, %v5103_v47  ;;  %v8714_v47 = vld [vmem:[#allocation13_spill] sm:$0xff] }
 0x5fb   : > { %v5472_v58 = vpop.eup %5471  ;;  %5135 = vrot.lane.b32.xlu2 %v5134_v23, %s5605_s26 }
 0x5fc   : > { %v2501_v46 = vmul.f32 %v5472_v58, %v7252_v31  ;;  %v2472_v4 = vpop.xlane.xlu0 %2471 }
 0x5fd   : > { %5473 = vrcp.f32 %v2472_v4 }
 0x5fe   : > { %v2517_v10 = vpack.c.bf16 %v2501_v46, %v2501_v46  ;;  %5475 = vrcp.f32 %v2469_v57  ;;  %v2862_v57 = vsel %vm741_vm1, %v8709_v36, %v5113_v35  ;;  %v8710_v46 = vld [vmem:[#allocation14_spill] sm:$0xff] }
 0x5ff   : > { %v2861_v4 = vsel %vm741_vm1, %v8710_v46, %v5112_v38  ;;  %v8715_v36 = vld [vmem:[#allocation2_spill] sm:$0xff]  ;;  %v8716_v46 = vld [vmem:[#allocation20_spill] sm:$0xff] }
 0x600   : > { %v2606_v15 = vunpack.c.l.b16 %v2517_v10  ;;  %v2589_v5 = vpop.f32.mrf.mxu2 }
 0x601   : > { %v2173_v53 = vpop.f32.mrf.mxu3 }
 0x602   : > { %v5159_v37 = vpack.i.bf16 %v2173_v53, %v2171_v12  ;;  %v2612_v28 = vpack.c.b16 %v2607_v25, %v2606_v15 }
 0x603   : > { %v5474_v2 = vpop.eup %5473 }
 0x604   : > { %5160 = vrot.lane.b32.xlu0 %v5159_v37, %s5608_s15  ;;  %4962 = vmatmul.msk.bf16.gmra.mxu3 %vm876_vm2, %v2612_v28  ;;  %v5476_v19 = vpop.eup %5475  ;;  %v2504_v31 = vmul.f32 %v5474_v2, %v7260_v41  ;;  %v5126_v2 = vpop.permute.xlu1 %5125 }
 0x605   : > { %v2503_v34 = vmul.f32 %v5476_v19, %v7247_v3  ;;  %v5061_v3 = vld [vmem:[%s8585_s3 + $0x18] sm:$0xff] }
 0x606   : > { %v2520_v54 = vpack.c.bf16 %v2504_v31, %v2504_v31  ;;  %2980 = vmatpush.bf16.msra.mxu0 %v5061_v3  ;;  %v5128_v31 = vunpack.i.h.bf16 %v5126_v2 }
 0x607   : > { %v2519_v51 = vpack.c.bf16 %v2503_v34, %v2503_v34  ;;  %v5127_v34 = vunpack.i.l.bf16 %v5126_v2  ;;  %v7369_v2 = vld [vmem:[%s8586_s4] ss:$0 sm:$0xff] }
 0x608   : > { %v2591_v33 = vpop.f32.mrf.mxu2  ;;  %v2609_v29 = vunpack.c.l.b16 %v2520_v54  ;;  %v8711_v54 = vld [vmem:[#allocation10_spill] sm:$0xff] }
 0x609   : > { %v5149_v13 = vpack.i.bf16 %v2591_v33, %v2589_v5  ;;  %v2176_v40 = vpop.f32.mrf.mxu3  ;;  %v2608_v24 = vunpack.c.l.b16 %v2519_v51  ;;  %v2864_v51 = vsel %vm741_vm1, %v8711_v54, %v5128_v31 }
 0x60a   : > { %2981 = vmatpush.bf16.msra.mxu0 %v5060_v55 }
 0x60b   : > { %5150 = vrot.lane.b32.xlu2 %v5149_v13, %s5605_s26  ;;  %v2613_v11 = vpack.c.b16 %v2609_v29, %v2608_v24  ;;  %v8712_v29 = vld [vmem:[#allocation21_spill] sm:$0xff] }
 0x60c   : > { %v2863_v24 = vsel %vm741_vm1, %v8712_v29, %v5127_v34  ;;  %v5141_v55 = vpop.permute.xlu1 %5140 }
 0x60e   : > { %2982 = vmatpush.bf16.msra.mxu0 %v5059_v8 }
 0x611   : > { %v2178_v18 = vpop.f32.mrf.mxu3 }
 0x612   : > { %v5174_v17 = vpack.i.bf16 %v2178_v18, %v2176_v40  ;;  %2983 = vmatpush.bf16.msra.mxu0 %v5058_v20  ;;  %v5142_v20 = vunpack.i.l.bf16 %v5141_v55 }
 0x614   : > { %5175 = vrot.lane.b32.xlu0 %v5174_v17, %s5608_s15  ;;  %4963 = vmatmul.msk.bf16.gmra.mxu3 %vm876_vm2, %v2613_v11  ;;  %v2865_v9 = vsel %vm741_vm1, %v8714_v47, %v5142_v20  ;;  %v5156_v35 = vpop.permute.xlu1 %5155 }
 0x619   : > { %v2181_v41 = vpop.f32.mrf.mxu3 }
 0x621   : > { %v2183_v21 = vpop.f32.mrf.mxu3 }
 0x622   : > { %v5189_v42 = vpack.i.bf16 %v2183_v21, %v2181_v41 }
 0x624   : > { %5190 = vrot.lane.b32.xlu0 %v5189_v42, %s5608_s15 }
 0x629   : > { %v2186_v45 = vpop.f32.mrf.mxu3 }
 0x631   : > { %v2188_v49 = vpop.f32.mrf.mxu3 }
 0x632   : > { %v5204_v62 = vpack.i.bf16 %v2188_v49, %v2186_v45  ;;  %v5143_v45 = vunpack.i.h.bf16 %v5141_v55 }
 0x634   : > { %5205 = vrot.lane.b32.xlu0 %v5204_v62, %s5608_s15  ;;  %v2866_v1 = vsel %vm741_vm1, %v8713_v59, %v5143_v45  ;;  %s8439_s15 = scalar_lea.vmem %s8596_s14, %s4865_s24 }
 0x645   : > { %v5121_v23 = vpop.permute.xlu2 %5120 }
 0x646   : > { %v5123_v15 = vunpack.i.h.bf16 %v5121_v23  ;;  %v5122_v5 = vunpack.i.l.bf16 %v5121_v23 }
 0x64d   : > { %v5106_v52 = vpop.permute.xlu0 %5105 }
 0x64e   : > { %v5108_v14 = vunpack.i.h.bf16 %v5106_v52  ;;  %v5107_v63 = vunpack.i.l.bf16 %v5106_v52 }
 0x650   : > { %v2892_v6 = vsel %vm2891_vm3, %v2875_v56, %v5107_v63  ;;  %v2893_v30 = vsel %vm2891_vm3, %v2876_v50, %v5108_v14  ;;  %v2647_v26 = vpop.f32.mrf.mxu3 }
 0x651   : > { %v2908_v0 = vpack.c.bf16 %v2893_v30, %v2892_v6 }
 0x653   : > { %4980 = vmatmul.msk.bf16.vlgmr.msra.gmra.mxu0 %vm876_vm2, %v2908_v0 }
 0x655   : > { %v5116_v60 = vpop.permute.xlu0 %5115  ;;  %v5136_v40 = vpop.permute.xlu2 %5135 }
 0x656   : > { %v5118_v22 = vunpack.i.h.bf16 %v5116_v60  ;;  %v5117_v7 = vunpack.i.l.bf16 %v5116_v60  ;;  %v5138_v11 = vunpack.i.h.bf16 %v5136_v40  ;;  %v5137_v3 = vunpack.i.l.bf16 %v5136_v40 }
 0x658   : > { %v2649_v12 = vpop.f32.mrf.mxu3  ;;  %v2877_v10 = vsel %vm526_vm0, %v2861_v4, %v5117_v7  ;;  %v2878_v25 = vsel %vm526_vm0, %v2862_v57, %v5118_v22  ;;  %v5158_v22 = vunpack.i.h.bf16 %v5156_v35  ;;  %v5157_v7 = vunpack.i.l.bf16 %v5156_v35 }
 0x659   : > { %v5164_v58 = vpack.i.bf16 %v2649_v12, %v2647_v26  ;;  %v2894_v53 = vsel %vm2891_vm3, %v2877_v10, %v5122_v5  ;;  %v2895_v37 = vsel %vm2891_vm3, %v2878_v25, %v5123_v15 }
 0x65a   : > { %v2909_v28 = vpack.c.bf16 %v2895_v37, %v2894_v53  ;;  %v2868_v57 = vsel %vm741_vm1, %v8715_v36, %v5158_v22  ;;  %v2867_v4 = vsel %vm741_vm1, %v8716_v46, %v5157_v7 }
 0x65b   : > { %5165 = vrot.lane.b32.xlu2 %v5164_v58, %s5605_s26 }
 0x65d   : > { %v5131_v19 = vpop.permute.xlu0 %5130 }
 0x65e   : > { %v5133_v33 = vunpack.i.h.bf16 %v5131_v19  ;;  %v5132_v13 = vunpack.i.l.bf16 %v5131_v19 }
 0x660   : > { %v2879_v18 = vsel %vm526_vm0, %v2863_v24, %v5132_v13  ;;  %v2880_v17 = vsel %vm526_vm0, %v2864_v51, %v5133_v33  ;;  %v5171_v33 = vpop.permute.xlu1 %5170 }
 0x661   : > { %v2896_v41 = vsel %vm2891_vm3, %v2879_v18, %v5137_v3  ;;  %v2897_v21 = vsel %vm2891_vm3, %v2880_v17, %v5138_v11  ;;  %v5173_v54 = vunpack.i.h.bf16 %v5171_v33  ;;  %v5172_v51 = vunpack.i.l.bf16 %v5171_v33  ;;  %v8717_v3 = vld [vmem:[#allocation28_spill] sm:$0xff] }
 0x662   : > { %v2910_v42 = vpack.c.bf16 %v2897_v21, %v2896_v41  ;;  %v8718_v21 = vld [vmem:[#allocation24_spill] sm:$0xff] }
 0x663   : > { %4981 = vmatmul.msk.bf16.gmra.mxu0 %vm876_vm2, %v2909_v28  ;;  %v2870_v41 = vsel %vm741_vm1, %v8717_v3, %v5173_v54  ;;  %v5611_v3 = vmov 32.0  }
 0x664   : > { %5477 = vrcp.f32 %v5611_v3 }
 0x665   : > { %v5146_v8 = vpop.permute.xlu0 %5145  ;;  %v5151_v49 = vpop.permute.xlu2 %5150 }
 0x666   : > { %v5148_v62 = vunpack.i.h.bf16 %v5146_v8  ;;  %v5147_v48 = vunpack.i.l.bf16 %v5146_v8  ;;  %v5153_v52 = vunpack.i.h.bf16 %v5151_v49  ;;  %v5152_v44 = vunpack.i.l.bf16 %v5151_v49 }
 0x668   : > { %v2881_v39 = vsel %vm526_vm0, %v2865_v9, %v5147_v48  ;;  %v2882_v27 = vsel %vm526_vm0, %v2866_v1, %v5148_v62  ;;  %v5186_v47 = vpop.permute.xlu1 %5185 }
 0x669   : > { %v2898_v16 = vsel %vm2891_vm3, %v2881_v39, %v5152_v44  ;;  %v2899_v14 = vsel %vm2891_vm3, %v2882_v27, %v5153_v52  ;;  %v5188_v44 = vunpack.i.h.bf16 %v5186_v47  ;;  %v5187_v39 = vunpack.i.l.bf16 %v5186_v47 }
 0x66a   : > { %v2911_v50 = vpack.c.bf16 %v2899_v14, %v2898_v16 }
 0x670   : > { %v5201_v36 = vpop.permute.xlu1 %5200 }
 0x673   : > { %4982 = vmatmul.msk.bf16.gmra.mxu0 %vm876_vm2, %v2910_v42  ;;  %v2869_v42 = vsel %vm741_vm1, %v8718_v21, %v5172_v51 }
 0x676   : > { %v5161_v38 = vpop.permute.xlu0 %5160 }
 0x677   : > { %v2652_v43 = vpop.f32.mrf.mxu3  ;;  %v5163_v12 = vunpack.i.h.bf16 %v5161_v38  ;;  %v5162_v23 = vunpack.i.l.bf16 %v5161_v38 }
 0x679   : > { %v2883_v15 = vsel %vm526_vm0, %v2867_v4, %v5162_v23  ;;  %v2884_v5 = vsel %vm526_vm0, %v2868_v57, %v5163_v12  ;;  %v5203_v4 = vunpack.i.h.bf16 %v5201_v36 }
 0x67f   : > { %v2654_v63 = vpop.f32.mrf.mxu3 }
 0x680   : > { %v5179_v56 = vpack.i.bf16 %v2654_v63, %v2652_v43 }
 0x682   : > { %5180 = vrot.lane.b32.xlu2 %v5179_v56, %s5605_s26 }
 0x683   : > { %4983 = vmatmul.msk.bf16.gmra.mxu0 %vm876_vm2, %v2911_v50  ;;  %v8719_v50 = vld [vmem:[#allocation30_spill] sm:$0xff] }
 0x686   : > { %v5176_v13 = vpop.permute.xlu0 %5175 }
 0x687   : > { %v2657_v6 = vpop.f32.mrf.mxu3  ;;  %v5178_v24 = vunpack.i.h.bf16 %v5176_v13  ;;  %v5177_v18 = vunpack.i.l.bf16 %v5176_v13 }
 0x689   : > { %v2885_v45 = vsel %vm526_vm0, %v2869_v42, %v5177_v18  ;;  %v2886_v20 = vsel %vm526_vm0, %v2870_v41, %v5178_v24  ;;  %v5478_v41 = vpop.eup %5477 }
 0x68a   : > { %v3076_v21 = vmul.f32 32.0, %v5478_v41  ;;  %vm3080_vm4 = vweird.f32 %v5478_v41 }
 0x68c   : > { %v3077_v42 = vsub.f32 1.0, %v3076_v21 }
 0x68f   : > { %v2659_v30 = vpop.f32.mrf.mxu3 }
 0x690   : > { %v5194_v26 = vpack.i.bf16 %v2659_v30, %v2657_v6  ;;  %v2872_v6 = vsel %vm741_vm1, %v8719_v50, %v5188_v44  ;;  %v8720_v30 = vld [vmem:[#allocation29_spill] sm:$0xff] }
 0x692   : > { %5195 = vrot.lane.b32.xlu2 %v5194_v26, %s5605_s26  ;;  %v2871_v26 = vsel %vm741_vm1, %v8720_v30, %v5187_v39 }
 0x696   : > { %v5191_v9 = vpop.permute.xlu0 %5190 }
 0x697   : > { %v2662_v0 = vpop.f32.mrf.mxu3  ;;  %v5193_v16 = vunpack.i.h.bf16 %v5191_v9  ;;  %v5192_v14 = vunpack.i.l.bf16 %v5191_v9 }
 0x699   : > { %v2888_v35 = vsel %vm526_vm0, %v2872_v6, %v5193_v16 }
 0x69f   : > { %v2664_v32 = vpop.f32.mrf.mxu3 }
 0x6a0   : > { %v5209_v60 = vpack.i.bf16 %v2664_v32, %v2662_v0 }
 0x6a2   : > { %5210 = vrot.lane.b32.xlu2 %v5209_v60, %s5605_s26  ;;  %v2887_v60 = vsel %vm526_vm0, %v2871_v26, %v5192_v14 }
 0x6a6   : > { %v5206_v57 = vpop.permute.xlu0 %5205 }
 0x6b5   : > { %v5166_v58 = vpop.permute.xlu2 %5165 }
 0x6b6   : > { %v5168_v10 = vunpack.i.h.bf16 %v5166_v58  ;;  %v5167_v25 = vunpack.i.l.bf16 %v5166_v58 }
 0x6b8   : > { %v2900_v53 = vsel %vm2891_vm3, %v2883_v15, %v5167_v25  ;;  %v2901_v37 = vsel %vm2891_vm3, %v2884_v5, %v5168_v10  ;;  %v5202_v10 = vunpack.i.l.bf16 %v5201_v36  ;;  %v5208_v15 = vunpack.i.h.bf16 %v5206_v57 }
 0x6b9   : > { %v2912_v28 = vpack.c.bf16 %v2901_v37, %v2900_v53  ;;  %v5207_v5 = vunpack.i.l.bf16 %v5206_v57 }
 0x6bb   : > { %4984 = vmatmul.msk.bf16.gmra.mxu0 %vm876_vm2, %v2912_v28  ;;  %v2874_v28 = vsel %vm741_vm1, %v6975_v61, %v5203_v4 }
 0x6bc   : > { %v2890_v54 = vsel %vm526_vm0, %v2874_v28, %v5208_v15 }
 0x6d0   : > { %v2985_v19 = vpop.f32.mrf.mxu0 }
 0x6d1   : > { %v7372_v31 = vadd.f32 %v7369_v2, %v2985_v19  ;;  %v8721_v19 = vld [vmem:[#allocation31_spill] sm:$0xff] }
 0x6d3   : > { %v3027_v34 = vsel %vm526_vm0, %v7372_v31, 0.0 }
 0x6d4   : > { %3028 = vadd.xlane.f32.xlu1 %v3027_v34  ;;  %v2873_v34 = vsel %vm741_vm1, %v8721_v19, %v5202_v10 }
 0x6d8   : > { %v2987_v40 = vpop.f32.mrf.mxu0 }
 0x6d9   : > { %v7377_v29 = vadd.f32 %v7369_v2, %v2987_v40  ;;  %v2889_v40 = vsel %vm526_vm0, %v2873_v34, %v5207_v5 }
 0x6db   : > { %v3030_v17 = vsel %vm526_vm0, %v7377_v29, 0.0 }
 0x6dc   : > { %v5181_v11 = vpop.permute.xlu2 %5180  ;;  %3031 = vadd.xlane.f32.xlu0 %v3030_v17 }
 0x6dd   : > { %v5183_v55 = vunpack.i.h.bf16 %v5181_v11  ;;  %v5182_v8 = vunpack.i.l.bf16 %v5181_v11 }
 0x6df   : > { %v2902_v49 = vsel %vm2891_vm3, %v2885_v45, %v5182_v8  ;;  %v2903_v62 = vsel %vm2891_vm3, %v2886_v20, %v5183_v55  ;;  %v3078_v55 = vmul.f32 %v5478_v41, %v3077_v42 }
 0x6e0   : > { %v2913_v48 = vpack.c.bf16 %v2903_v62, %v2902_v49  ;;  %v2990_v43 = vpop.f32.mrf.mxu0 }
 0x6e1   : > { %v7390_v59 = vadd.f32 %v7369_v2, %v2990_v43  ;;  %v3079_v8 = vadd.f32 %v5478_v41, %v3078_v55 }
 0x6e2   : > { %4985 = vmatmul.msk.bf16.gmra.mxu0 %vm876_vm2, %v2913_v48 }
 0x6e3   : > { %v3033_v1 = vsel %vm526_vm0, %v7390_v59, 0.0  ;;  %v7433_v20 = vsel %vm3080_vm4, %v5478_v41, %v3079_v8  ;;  %v5063_v8 = vld [vmem:[%s8590_s8 + $0x8] sm:$0xff] }
 0x6e4   : > { %3034 = vadd.xlane.f32.xlu2 %v3033_v1  ;;  %3498 = vmatpush.bf16.msra.mxu1 %v5063_v8 }
 0x6e8   : > { %v2992_v52 = vpop.f32.mrf.mxu0 }
 0x6e9   : > { %v7396_v27 = vadd.f32 %v7369_v2, %v2992_v52 }
 0x6eb   : > { %v3036_v63 = vsel %vm526_vm0, %v7396_v27, 0.0 }
 0x6ec   : > { %v5196_v56 = vpop.permute.xlu2 %5195  ;;  %3037 = vadd.xlane.f32.xlu1 %v3036_v63 }
 0x6ed   : > { %v5198_v0 = vunpack.i.h.bf16 %v5196_v56  ;;  %v5197_v32 = vunpack.i.l.bf16 %v5196_v56 }
 0x6ef   : > { %v2904_v38 = vsel %vm2891_vm3, %v2887_v60, %v5197_v32  ;;  %v2905_v22 = vsel %vm2891_vm3, %v2888_v35, %v5198_v0 }
 0x6f0   : > { %v2914_v7 = vpack.c.bf16 %v2905_v22, %v2904_v38  ;;  %v2995_v12 = vpop.f32.mrf.mxu0 }
 0x6f1   : > { %v7409_v23 = vadd.f32 %v7369_v2, %v2995_v12 }
 0x6f2   : > { %4986 = vmatmul.msk.bf16.gmra.mxu0 %vm876_vm2, %v2914_v7 }
 0x6f3   : > { %v3039_v58 = vsel %vm526_vm0, %v7409_v23, 0.0 }
 0x6f4   : > { %3040 = vadd.xlane.f32.xlu0 %v3039_v58 }
 0x6f8   : > { %v2997_v46 = vpop.f32.mrf.mxu0 }
 0x6f9   : > { %v7415_v25 = vadd.f32 %v7369_v2, %v2997_v46 }
 0x6fb   : > { %v3042_v53 = vsel %vm526_vm0, %v7415_v25, 0.0 }
 0x6fc   : > { %v5211_v37 = vpop.permute.xlu2 %5210  ;;  %3043 = vadd.xlane.f32.xlu2 %v3042_v53 }
 0x6fd   : > { %v5213_v33 = vunpack.i.h.bf16 %v5211_v37  ;;  %v5212_v13 = vunpack.i.l.bf16 %v5211_v37 }
 0x6ff   : > { %v2906_v51 = vsel %vm2891_vm3, %v2889_v40, %v5212_v13  ;;  %v2907_v24 = vsel %vm2891_vm3, %v2890_v54, %v5213_v33 }
 0x700   : > { %v2915_v18 = vpack.c.bf16 %v2907_v24, %v2906_v51  ;;  %v3000_v17 = vpop.f32.mrf.mxu0 }
 0x701   : > { %v7428_v11 = vadd.f32 %v7369_v2, %v3000_v17 }
 0x702   : > { %4987 = vmatmul.msk.bf16.gmra.mxu0 %vm876_vm2, %v2915_v18 }
 0x703   : > { %v3045_v61 = vsel %vm526_vm0, %v7428_v11, 0.0 }
 0x704   : > { %3046 = vadd.xlane.f32.xlu2 %v3045_v61 }
 0x708   : > { %v3002_v45 = vpop.f32.mrf.mxu0 }
 0x709   : > { %v7444_v44 = vadd.f32 %v7369_v2, %v3002_v45 }
 0x70b   : > { %v3048_v14 = vsel %vm526_vm0, %v7444_v44, 0.0 }
 0x738   : > { %v3005_v1 = vpop.f32.mrf.mxu0 }
 0x739   : > { %v7456_v6 = vadd.f32 %v7369_v2, %v3005_v1 }
 0x73b   : > { %v3051_v0 = vsel %vm526_vm0, %v7456_v6, 0.0 }
 0x740   : > { %v3007_v63 = vpop.f32.mrf.mxu0 }
 0x741   : > { %v7468_v38 = vadd.f32 %v7369_v2, %v3007_v63 }
 0x743   : > { %v3054_v7 = vsel %vm526_vm0, %v7468_v38, 0.0 }
 0x747   : > { %v3029_v49 = vpop.xlane.xlu1 %3028 }
 0x748   : > { %v3082_v62 = vmul.f32 %v7433_v20, %v3029_v49  ;;  %v5062_v49 = vld [vmem:[%s8590_s8] sm:$0xff] }
 0x749   : > { %3499 = vmatpush.bf16.msra.mxu1 %v5062_v49 }
 0x74a   : > { %v7437_v48 = vsub.f32 %v7372_v31, %v3082_v62 }
 0x74c   : > { %v3114_v43 = vmul.f32 %v7437_v48, %v7437_v48 }
 0x74e   : > { %v3130_v47 = vsel %vm526_vm0, %v3114_v43, 0.0 }
 0x74f   : > { %v3032_v9 = vpop.xlane.xlu0 %3031  ;;  %3131 = vadd.xlane.f32.xlu1 %v3130_v47 }
 0x750   : > { %v3083_v52 = vmul.f32 %v7433_v20, %v3032_v9 }
 0x752   : > { %v7447_v39 = vsub.f32 %v7377_v29, %v3083_v52 }
 0x754   : > { %v3115_v31 = vmul.f32 %v7447_v39, %v7447_v39 }
 0x756   : > { %v3133_v16 = vsel %vm526_vm0, %v3115_v31, 0.0 }
 0x757   : > { %v3035_v56 = vpop.xlane.xlu2 %3034  ;;  %3134 = vadd.xlane.f32.xlu0 %v3133_v16  ;;  %3049 = vadd.xlane.f32.xlu1 %v3048_v14 }
 0x758   : > { %v3084_v50 = vmul.f32 %v7433_v20, %v3035_v56 }
 0x75a   : > { %v7459_v29 = vsub.f32 %v7390_v59, %v3084_v50 }
 0x75c   : > { %v3116_v30 = vmul.f32 %v7459_v29, %v7459_v29 }
 0x75e   : > { %v3136_v26 = vsel %vm526_vm0, %v3116_v30, 0.0 }
 0x75f   : > { %v3010_v32 = vpop.f32.mrf.mxu0  ;;  %3137 = vadd.xlane.f32.xlu0 %v3136_v26  ;;  %3052 = vadd.xlane.f32.xlu1 %v3051_v0  ;;  %v3038_v60 = vpop.xlane.xlu1 %3037 }
 0x760   : > { %v3085_v35 = vmul.f32 %v7433_v20, %v3038_v60  ;;  %v7480_v46 = vadd.f32 %v7369_v2, %v3010_v32 }
 0x762   : > { %v7471_v59 = vsub.f32 %v7396_v27, %v3085_v35  ;;  %v3057_v10 = vsel %vm526_vm0, %v7480_v46, 0.0 }
 0x764   : > { %v3117_v22 = vmul.f32 %v7471_v59, %v7471_v59 }
 0x766   : > { %v3139_v12 = vsel %vm526_vm0, %v3117_v22, 0.0 }
 0x767   : > { %3055 = vadd.xlane.f32.xlu0 %v3054_v7  ;;  %v3041_v58 = vpop.xlane.xlu0 %3040  ;;  %3140 = vadd.xlane.f32.xlu2 %v3139_v12  ;;  %v3012_v57 = vpop.f32.mrf.mxu0 }
 0x768   : > { %v3086_v36 = vmul.f32 %v7433_v20, %v3041_v58  ;;  %v7492_v37 = vadd.f32 %v7369_v2, %v3012_v57 }
 0x76a   : > { %v7483_v27 = vsub.f32 %v7409_v23, %v3086_v36  ;;  %v3060_v33 = vsel %vm526_vm0, %v7492_v37, 0.0 }
 0x76c   : > { %v3118_v4 = vmul.f32 %v7483_v27, %v7483_v27 }
 0x76e   : > { %v3142_v15 = vsel %vm526_vm0, %v3118_v4, 0.0 }
 0x76f   : > { %v3044_v5 = vpop.xlane.xlu2 %3043  ;;  %3058 = vadd.xlane.f32.xlu0 %v3057_v10  ;;  %3143 = vadd.xlane.f32.xlu2 %v3142_v15  ;;  %v3015_v23 = vpop.f32.mrf.mxu0 }
 0x770   : > { %v3087_v53 = vmul.f32 %v7433_v20, %v3044_v5  ;;  %v7504_v54 = vadd.f32 %v7369_v2, %v3015_v23 }
 0x772   : > { %v7495_v28 = vsub.f32 %v7415_v25, %v3087_v53  ;;  %v3063_v17 = vsel %vm526_vm0, %v7504_v54, 0.0 }
 0x774   : > { %v3119_v19 = vmul.f32 %v7495_v28, %v7495_v28 }
 0x776   : > { %v3145_v34 = vsel %vm526_vm0, %v3119_v19, 0.0 }
 0x777   : > { %v3047_v13 = vpop.xlane.xlu2 %3046  ;;  %3146 = vadd.xlane.f32.xlu1 %v3145_v34  ;;  %3061 = vadd.xlane.f32.xlu2 %v3060_v33  ;;  %v3017_v24 = vpop.f32.mrf.mxu0 }
 0x778   : > { %v3088_v40 = vmul.f32 %v7433_v20, %v3047_v13  ;;  %v7515_v61 = vadd.f32 %v7369_v2, %v3017_v24 }
 0x77a   : > { %v7507_v25 = vsub.f32 %v7428_v11, %v3088_v40  ;;  %v3066_v3 = vsel %vm526_vm0, %v7515_v61, 0.0 }
 0x77c   : > { %v3120_v51 = vmul.f32 %v7507_v25, %v7507_v25 }
 0x77e   : > { %v3148_v18 = vsel %vm526_vm0, %v3120_v51, 0.0 }
 0x77f   : > { %3149 = vadd.xlane.f32.xlu1 %v3148_v18  ;;  %3064 = vadd.xlane.f32.xlu2 %v3063_v17  ;;  %v3020_v41 = vpop.f32.mrf.mxu0 }
 0x780   : > { %v7520_v11 = vadd.f32 %v7369_v2, %v3020_v41 }
 0x782   : > { %v3069_v21 = vsel %vm526_vm0, %v7520_v11, 0.0 }
 0x787   : > { %3067 = vadd.xlane.f32.xlu1 %v3066_v3  ;;  %v3022_v4 = vpop.f32.mrf.mxu0 }
 0x788   : > { %v7556_v40 = vadd.f32 %v7369_v2, %v3022_v4 }
 0x78f   : > { %3070 = vadd.xlane.f32.xlu1 %v3069_v21 }
 0x7c2   : > { %v3132_v42 = vpop.xlane.xlu1 %3131 }
 0x7c3   : > { %v3178_v55 = vmul.f32 %v3132_v42, %v7433_v20 }
 0x7c5   : > { %v3194_v45 = vadd.f32 1e-05, %v3178_v55  ;;  %v3072_v55 = vsel %vm526_vm0, %v7556_v40, 0.0 }
 0x7c7   : > { %5479 = vrsqrt.f32 %v3194_v45  ;;  %vm3216_vm6 = vweird.f32 %v3194_v45 }
 0x7ca   : > { %v3135_v62 = vpop.xlane.xlu0 %3134  ;;  %v3050_v43 = vpop.xlane.xlu1 %3049 }
 0x7cb   : > { %v3179_v1 = vmul.f32 %v3135_v62, %v7433_v20  ;;  %v3089_v47 = vmul.f32 %v7433_v20, %v3050_v43 }
 0x7cd   : > { %v5480_v9 = vpop.eup %5479  ;;  %v3195_v52 = vadd.f32 1e-05, %v3179_v1  ;;  %v7534_v31 = vsub.f32 %v7444_v44, %v3089_v47 }
 0x7ce   : > { %v3211_v16 = vmul.f32 %v5480_v9, %v3194_v45  ;;  %vm3217_vm5 = vweird.f32 %v5480_v9 }
 0x7cf   : > { %5481 = vrsqrt.f32 %v3195_v52  ;;  %v3121_v14 = vmul.f32 %v7534_v31, %v7534_v31  ;;  %vm3218_vm7 = vmor %vm3216_vm6, %vm3217_vm5  ;;  %vm3226_vm9 = vweird.f32 %v3195_v52 }
 0x7d0   : > { %v3212_v63 = vmul.f32 %v5480_v9, %v3211_v16 }
 0x7d1   : > { %v3151_v56 = vsel %vm526_vm0, %v3121_v14, 0.0 }
 0x7d2   : > { %v3213_v50 = vmul.f32 0.5, %v3212_v63  ;;  %v3138_v30 = vpop.xlane.xlu0 %3137  ;;  %3152 = vadd.xlane.f32.xlu0 %v3151_v56  ;;  %v3053_v26 = vpop.xlane.xlu1 %3052 }
 0x7d3   : > { %v3180_v0 = vmul.f32 %v3138_v30, %v7433_v20  ;;  %v3090_v32 = vmul.f32 %v7433_v20, %v3053_v26  ;;  %v5578_v26 = vld [vmem:[%s5715_s27 + $0x8] sm:$0xff] }
 0x7d4   : > { %v3214_v60 = vsub.f32 1.5, %v3213_v50  ;;  %v5577_v50 = vld [vmem:[%s5715_s27] sm:$0xff] }
 0x7d5   : > { %v5482_v44 = vpop.eup %5481  ;;  %v3196_v35 = vadd.f32 1e-05, %v3180_v0  ;;  %v7542_v22 = vsub.f32 %v7456_v6, %v3090_v32  ;;  %v7550_v6 = vld [vmem:[%s8588_s6] ss:$0 sm:$0xff] }
 0x7d6   : > { %v3215_v7 = vmul.f32 %v5480_v9, %v3214_v60  ;;  %v3221_v12 = vmul.f32 %v5482_v44, %v3195_v52  ;;  %vm3227_vm8 = vweird.f32 %v5482_v44 }
 0x7d7   : > { %5483 = vrsqrt.f32 %v3196_v35  ;;  %v3122_v58 = vmul.f32 %v7542_v22, %v7542_v22  ;;  %vm3228_vm10 = vmor %vm3226_vm9, %vm3227_vm8  ;;  %vm3236_vm12 = vweird.f32 %v3196_v35 }
 0x7d8   : > { %v3219_v36 = vsel %vm3218_vm7, %v5480_v9, %v3215_v7  ;;  %v3222_v57 = vmul.f32 %v5482_v44, %v3221_v12 }
 0x7d9   : > { %v3154_v10 = vsel %vm526_vm0, %v3122_v58, 0.0  ;;  %v3370_v23 = vmul.f32 %v3219_v36, %v7437_v48  ;;  %v7564_v48 = vld [vmem:[%s8589_s7] ss:$0 sm:$0xff] }
 0x7da   : > { %v3223_v15 = vmul.f32 0.5, %v3222_v57  ;;  %v3056_v5 = vpop.xlane.xlu0 %3055  ;;  %v3141_v53 = vpop.xlane.xlu2 %3140  ;;  %3155 = vadd.xlane.f32.xlu0 %v3154_v10 }
 0x7db   : > { %v3091_v19 = vmul.f32 %v7433_v20, %v3056_v5  ;;  %v3181_v34 = vmul.f32 %v3141_v53, %v7433_v20  ;;  %v3389_v3 = vmul.f32 %v7550_v6, %v3370_v23 }
 0x7dc   : > { %v3224_v33 = vsub.f32 1.5, %v3223_v15 }
 0x7dd   : > { %v5484_v13 = vpop.eup %5483  ;;  %v7559_v51 = vsub.f32 %v7468_v38, %v3091_v19  ;;  %v3197_v24 = vadd.f32 1e-05, %v3181_v34  ;;  %v3408_v62 = vadd.f32 %v7564_v48, %v3389_v3 }
 0x7de   : > { %v3225_v18 = vmul.f32 %v5482_v44, %v3224_v33  ;;  %v3231_v17 = vmul.f32 %v5484_v13, %v3196_v35  ;;  %vm3237_vm11 = vweird.f32 %v5484_v13 }
 0x7df   : > { %5485 = vrsqrt.f32 %v3197_v24  ;;  %v3123_v2 = vmul.f32 %v7559_v51, %v7559_v51  ;;  %v7582_v30 = vadd.f32 %v5577_v50, %v3408_v62  ;;  %vm3238_vm13 = vmor %vm3236_vm12, %vm3237_vm11  ;;  %vm3246_vm15 = vweird.f32 %v3197_v24  ;;  %v5579_v62 = vld [vmem:[%s5715_s27 + $0x10] sm:$0xff] }
 0x7e0   : > { %v3229_v41 = vsel %vm3228_vm10, %v5482_v44, %v3225_v18  ;;  %v3232_v21 = vmul.f32 %v5484_v13, %v3231_v17 }
 0x7e1   : > { %v3371_v38 = vmul.f32 %v3229_v41, %v7447_v39  ;;  %v3157_v42 = vsel %vm526_vm0, %v3123_v2, 0.0 }
 0x7e2   : > { %v3233_v8 = vmul.f32 0.5, %v3232_v21  ;;  %v3059_v45 = vpop.xlane.xlu0 %3058  ;;  %3158 = vadd.xlane.f32.xlu2 %v3157_v42  ;;  %v3144_v49 = vpop.xlane.xlu2 %3143  ;;  %3073 = vadd.xlane.f32.xlu0 %v3072_v55 }
 0x7e3   : > { %v3390_v43 = vmul.f32 %v7550_v6, %v3371_v38  ;;  %v3092_v1 = vmul.f32 %v7433_v20, %v3059_v45  ;;  %v3182_v39 = vmul.f32 %v3144_v49, %v7433_v20 }
 0x7e4   : > { %v3234_v47 = vsub.f32 1.5, %v3233_v8 }
 0x7e5   : > { %v5486_v9 = vpop.eup %5485  ;;  %v3409_v52 = vadd.f32 %v7564_v48, %v3390_v43  ;;  %v7579_v16 = vsub.f32 %v7480_v46, %v3092_v1  ;;  %v3198_v14 = vadd.f32 1e-05, %v3182_v39  ;;  %v5580_v1 = vld [vmem:[%s5715_s27 + $0x18] sm:$0xff] }
 0x7e6   : > { %v3235_v63 = vmul.f32 %v5484_v13, %v3234_v47  ;;  %v3241_v56 = vmul.f32 %v5486_v9, %v3197_v24  ;;  %vm3247_vm14 = vweird.f32 %v5486_v9 }
 0x7e7   : > { %v7585_v0 = vadd.f32 %v5578_v26, %v3409_v52  ;;  %5487 = vrsqrt.f32 %v3198_v14  ;;  %v3124_v32 = vmul.f32 %v7579_v16, %v7579_v16  ;;  %vm3248_vm1 = vmor %vm3246_vm15, %vm3247_vm14  ;;  %vm3256_vm3 = vweird.f32 %v3198_v14 }
 0x7e8   : > { %v3239_v60 = vsel %vm3238_vm13, %v5484_v13, %v3235_v63  ;;  %v3242_v44 = vmul.f32 %v5486_v9, %v3241_v56 }
 0x7e9   : > { %v3160_v46 = vsel %vm526_vm0, %v3124_v32, 0.0  ;;  %v3440_v7 = vpack.c.bf16 %v7585_v0, %v7582_v30  ;;  %v3372_v36 = vmul.f32 %v3239_v60, %v7459_v29 }
 0x7ea   : > { %v3243_v35 = vmul.f32 0.5, %v3242_v44  ;;  %3161 = vadd.xlane.f32.xlu2 %v3160_v46  ;;  %v3062_v12 = vpop.xlane.xlu2 %3061  ;;  %v3147_v58 = vpop.xlane.xlu1 %3146 }
 0x7eb   : > { %v3093_v57 = vmul.f32 %v7433_v20, %v3062_v12  ;;  %v3183_v4 = vmul.f32 %v3147_v58, %v7433_v20  ;;  %4996 = vmatmul.msk.bf16.vlgmr.msra.gmra.mxu1 %vm526_vm0, %v3440_v7  ;;  %v3391_v34 = vmul.f32 %v7550_v6, %v3372_v36 }
 0x7ec   : > { %v3244_v10 = vsub.f32 1.5, %v3243_v35 }
 0x7ed   : > { %v5488_v15 = vpop.eup %5487  ;;  %v7597_v5 = vsub.f32 %v7492_v37, %v3093_v57  ;;  %v3199_v53 = vadd.f32 1e-05, %v3183_v4  ;;  %v3410_v21 = vadd.f32 %v7564_v48, %v3391_v34 }
 0x7ee   : > { %v3245_v23 = vmul.f32 %v5486_v9, %v3244_v10  ;;  %v3251_v19 = vmul.f32 %v5488_v15, %v3198_v14  ;;  %vm3257_vm2 = vweird.f32 %v5488_v15 }
 0x7ef   : > { %5489 = vrsqrt.f32 %v3199_v53  ;;  %v3125_v29 = vmul.f32 %v7597_v5, %v7597_v5  ;;  %vm3258_vm4 = vmor %vm3256_vm3, %vm3257_vm2  ;;  %v7614_v43 = vadd.f32 %v5579_v62, %v3410_v21  ;;  %vm3266_vm6 = vweird.f32 %v3199_v53 }
 0x7f0   : > { %v3249_v33 = vsel %vm3248_vm1, %v5486_v9, %v3245_v23  ;;  %v3252_v13 = vmul.f32 %v5488_v15, %v3251_v19 }
 0x7f1   : > { %v3373_v18 = vmul.f32 %v3249_v33, %v7471_v59  ;;  %v3163_v17 = vsel %vm526_vm0, %v3125_v29, 0.0 }
 0x7f2   : > { %v3253_v3 = vmul.f32 0.5, %v3252_v13  ;;  %3164 = vadd.xlane.f32.xlu1 %v3163_v17  ;;  %v3065_v37 = vpop.xlane.xlu2 %3064  ;;  %v3150_v2 = vpop.xlane.xlu1 %3149 }
 0x7f3   : > { %v3392_v24 = vmul.f32 %v7550_v6, %v3373_v18  ;;  %v3094_v41 = vmul.f32 %v7433_v20, %v3065_v37 }
 0x7f4   : > { %v3254_v38 = vsub.f32 1.5, %v3253_v3 }
 0x7f5   : > { %v5490_v42 = vpop.eup %5489  ;;  %v7608_v55 = vsub.f32 %v7504_v54, %v3094_v41  ;;  %v3411_v59 = vadd.f32 %v7564_v48, %v3392_v24 }
 0x7f6   : > { %v3255_v8 = vmul.f32 %v5488_v15, %v3254_v38  ;;  %v3261_v45 = vmul.f32 %v5490_v42, %v3199_v53  ;;  %vm3267_vm5 = vweird.f32 %v5490_v42  ;;  %v5582_v53 = vld [vmem:[%s5715_s27 + $0x28] sm:$0xff] }
 0x7f7   : > { %v3126_v49 = vmul.f32 %v7608_v55, %v7608_v55  ;;  %v7617_v39 = vadd.f32 %v5580_v1, %v3411_v59  ;;  %vm3268_vm7 = vmor %vm3266_vm6, %vm3267_vm5 }
 0x7f8   : > { %v3259_v47 = vsel %vm3258_vm4, %v5488_v15, %v3255_v8  ;;  %v3262_v9 = vmul.f32 %v5490_v42, %v3261_v45  ;;  %v5581_v15 = vld [vmem:[%s5715_s27 + $0x20] sm:$0xff] }
 0x7f9   : > { %v3166_v54 = vsel %vm526_vm0, %v3126_v49, 0.0  ;;  %v3441_v52 = vpack.c.bf16 %v7617_v39, %v7614_v43  ;;  %v3374_v56 = vmul.f32 %v3259_v47, %v7483_v27 }
 0x7fa   : > { %v3263_v63 = vmul.f32 0.5, %v3262_v9  ;;  %3167 = vadd.xlane.f32.xlu0 %v3166_v54  ;;  %v3068_v14 = vpop.xlane.xlu1 %3067 }
 0x7fb   : > { %v3095_v50 = vmul.f32 %v7433_v20, %v3068_v14  ;;  %4997 = vmatmul.msk.bf16.gmra.mxu1 %vm526_vm0, %v3441_v52  ;;  %v3393_v44 = vmul.f32 %v7550_v6, %v3374_v56 }
 0x7fc   : > { %v3264_v26 = vsub.f32 1.5, %v3263_v63 }
 0x7fd   : > { %v7626_v32 = vsub.f32 %v7515_v61, %v3095_v50  ;;  %v3412_v36 = vadd.f32 %v7564_v48, %v3393_v44 }
 0x7fe   : > { %v3265_v60 = vmul.f32 %v5490_v42, %v3264_v26 }
 0x7ff   : > { %v3127_v46 = vmul.f32 %v7626_v32, %v7626_v32 }
 0x800   : > { %v3269_v27 = vsel %vm3268_vm7, %v5490_v42, %v3265_v60 }
 0x801   : > { %v3375_v7 = vmul.f32 %v3269_v27, %v7495_v28  ;;  %v3169_v35 = vsel %vm526_vm0, %v3127_v46, 0.0  ;;  %v7643_v28 = vadd.f32 %v5581_v15, %v3412_v36 }
 0x802   : > { %3170 = vadd.xlane.f32.xlu2 %v3169_v35  ;;  %v3071_v12 = vpop.xlane.xlu1 %3070 }
 0x803   : > { %v3394_v61 = vmul.f32 %v7550_v6, %v3375_v7  ;;  %v3096_v58 = vmul.f32 %v7433_v20, %v3071_v12 }
 0x805   : > { %v7637_v57 = vsub.f32 %v7520_v11, %v3096_v58  ;;  %v3413_v4 = vadd.f32 %v7564_v48, %v3394_v61  ;;  %v3184_v11 = vmul.f32 %v3150_v2, %v7433_v20 }
 0x807   : > { %v3128_v10 = vmul.f32 %v7637_v57, %v7637_v57  ;;  %v7646_v23 = vadd.f32 %v5582_v53, %v3413_v4  ;;  %v3200_v29 = vadd.f32 1e-05, %v3184_v11 }
 0x809   : > { %v3172_v19 = vsel %vm526_vm0, %v3128_v10, 0.0  ;;  %v3442_v34 = vpack.c.bf16 %v7646_v23, %v7643_v28  ;;  %5491 = vrsqrt.f32 %v3200_v29  ;;  %vm3276_vm9 = vweird.f32 %v3200_v29 }
 0x80a   : > { %3173 = vadd.xlane.f32.xlu1 %v3172_v19 }
 0x80b   : > { %4998 = vmatmul.msk.bf16.gmra.mxu1 %vm526_vm0, %v3442_v34  ;;  %v5583_v34 = vld [vmem:[%s5715_s27 + $0x30] sm:$0xff] }
 0x80f   : > { %v5492_v33 = vpop.eup %5491 }
 0x810   : > { %v3271_v13 = vmul.f32 %v5492_v33, %v3200_v29  ;;  %vm3277_vm8 = vweird.f32 %v5492_v33  ;;  %v5584_v29 = vld [vmem:[%s5715_s27 + $0x38] sm:$0xff] }
 0x811   : > { %vm3278_vm10 = vmor %vm3276_vm9, %vm3277_vm8 }
 0x812   : > { %v3272_v18 = vmul.f32 %v5492_v33, %v3271_v13 }
 0x814   : > { %v3273_v37 = vmul.f32 0.5, %v3272_v18 }
 0x816   : > { %v3274_v41 = vsub.f32 1.5, %v3273_v37 }
 0x818   : > { %v3275_v42 = vmul.f32 %v5492_v33, %v3274_v41 }
 0x81a   : > { %v3279_v45 = vsel %vm3278_vm10, %v5492_v33, %v3275_v42 }
 0x81b   : > { %v3376_v9 = vmul.f32 %v3279_v45, %v7507_v25 }
 0x81d   : > { %v3395_v44 = vmul.f32 %v7550_v6, %v3376_v9 }
 0x81f   : > { %v3414_v36 = vadd.f32 %v7564_v48, %v3395_v44 }
 0x821   : > { %v7674_v11 = vadd.f32 %v5583_v34, %v3414_v36 }
 0x845   : > { %v3153_v17 = vpop.xlane.xlu0 %3152 }
 0x846   : > { %v3185_v3 = vmul.f32 %v3153_v17, %v7433_v20 }
 0x848   : > { %v3201_v24 = vadd.f32 1e-05, %v3185_v3 }
 0x84a   : > { %5493 = vrsqrt.f32 %v3201_v24  ;;  %vm3286_vm12 = vweird.f32 %v3201_v24 }
 0x84d   : > { %v3156_v21 = vpop.xlane.xlu0 %3155 }
 0x84e   : > { %v3186_v38 = vmul.f32 %v3156_v21, %v7433_v20 }
 0x850   : > { %v5494_v59 = vpop.eup %5493  ;;  %v3202_v8 = vadd.f32 1e-05, %v3186_v38 }
 0x851   : > { %v3281_v2 = vmul.f32 %v5494_v59, %v3201_v24  ;;  %vm3287_vm11 = vweird.f32 %v5494_v59  ;;  %v7684_v24 = vld [vmem:[%s8591_s9] ss:$0 sm:$0xff] }
 0x852   : > { %5495 = vrsqrt.f32 %v3202_v8  ;;  %vm3288_vm13 = vmor %vm3286_vm12, %vm3287_vm11  ;;  %vm3296_vm15 = vweird.f32 %v3202_v8 }
 0x853   : > { %v3282_v49 = vmul.f32 %v5494_v59, %v3281_v2 }
 0x855   : > { %v3283_v62 = vmul.f32 0.5, %v3282_v49  ;;  %v3159_v1 = vpop.xlane.xlu2 %3158  ;;  %v3074_v47 = vpop.xlane.xlu0 %3073 }
 0x856   : > { %v3187_v54 = vmul.f32 %v3159_v1, %v7433_v20  ;;  %v3097_v52 = vmul.f32 %v7433_v20, %v3074_v47 }
 0x857   : > { %v3284_v63 = vsub.f32 1.5, %v3283_v62 }
 0x858   : > { %v5496_v14 = vpop.eup %5495  ;;  %v3203_v56 = vadd.f32 1e-05, %v3187_v54  ;;  %v7659_v50 = vsub.f32 %v7556_v40, %v3097_v52 }
 0x859   : > { %v3285_v26 = vmul.f32 %v5494_v59, %v3284_v63  ;;  %v3291_v60 = vmul.f32 %v5496_v14, %v3202_v8  ;;  %vm3297_vm14 = vweird.f32 %v5496_v14 }
 0x85a   : > { %5497 = vrsqrt.f32 %v3203_v56  ;;  %v3129_v25 = vmul.f32 %v7659_v50, %v7659_v50  ;;  %vm3298_vm1 = vmor %vm3296_vm15, %vm3297_vm14  ;;  %vm3306_vm3 = vweird.f32 %v3203_v56 }
 0x85b   : > { %v3289_v46 = vsel %vm3288_vm13, %v5494_v59, %v3285_v26  ;;  %v3292_v27 = vmul.f32 %v5496_v14, %v3291_v60 }
 0x85c   : > { %v3377_v7 = vmul.f32 %v3289_v46, %v7534_v31  ;;  %v3175_v35 = vsel %vm526_vm0, %v3129_v25, 0.0 }
 0x85d   : > { %v3293_v12 = vmul.f32 0.5, %v3292_v27  ;;  %v3162_v40 = vpop.xlane.xlu2 %3161  ;;  %3176 = vadd.xlane.f32.xlu0 %v3175_v35 }
 0x85e   : > { %v3396_v61 = vmul.f32 %v7550_v6, %v3377_v7  ;;  %v3188_v58 = vmul.f32 %v3162_v40, %v7433_v20 }
 0x85f   : > { %v3294_v4 = vsub.f32 1.5, %v3293_v12 }
 0x860   : > { %v5498_v10 = vpop.eup %5497  ;;  %v7669_v15 = vadd.f32 1e-05, %v3188_v58  ;;  %v3415_v31 = vadd.f32 %v7564_v48, %v3396_v61  ;;  %v5585_v58 = vld [vmem:[%s5715_s27 + $0x40] sm:$0xff] }
 0x861   : > { %v3295_v53 = vmul.f32 %v5496_v14, %v3294_v4  ;;  %v3301_v19 = vmul.f32 %v5498_v10, %v3203_v56  ;;  %vm3307_vm2 = vweird.f32 %v5498_v10  ;;  %v5586_v4 = vld [vmem:[%s5715_s27 + $0x48] sm:$0xff] }
 0x862   : > { %5499 = vrsqrt.f32 %v7669_v15  ;;  %v7677_v33 = vadd.f32 %v5584_v29, %v3415_v31  ;;  %vm3308_vm4 = vmor %vm3306_vm3, %vm3307_vm2  ;;  %vm3316_vm6 = vweird.f32 %v7669_v15 }
 0x863   : > { %v3302_v13 = vmul.f32 %v5498_v10, %v3301_v19  ;;  %v3299_v18 = vsel %vm3298_vm1, %v5496_v14, %v3295_v53 }
 0x864   : > { %v3443_v17 = vpack.c.bf16 %v7677_v33, %v7674_v11  ;;  %v3378_v21 = vmul.f32 %v3299_v18, %v7542_v22 }
 0x865   : > { %v3303_v3 = vmul.f32 0.5, %v3302_v13  ;;  %v3165_v37 = vpop.xlane.xlu1 %3164 }
 0x866   : > { %v3189_v41 = vmul.f32 %v3165_v37, %v7433_v20  ;;  %4999 = vmatmul.msk.bf16.gmra.mxu1 %vm526_vm0, %v3443_v17  ;;  %v3397_v22 = vmul.f32 %v7550_v6, %v3378_v21 }
 0x867   : > { %v3304_v38 = vsub.f32 1.5, %v3303_v3 }
 0x868   : > { %v7689_v42 = vpop.eup %5499  ;;  %v7691_v59 = vadd.f32 1e-05, %v3189_v41  ;;  %v3501_v8 = vpop.f32.mrf.mxu1  ;;  %v3416_v26 = vadd.f32 %v7564_v48, %v3397_v22 }
 0x869   : > { %v3305_v2 = vmul.f32 %v5498_v10, %v3304_v38  ;;  %v3311_v45 = vmul.f32 %v7689_v42, %v7669_v15  ;;  %v7696_v49 = vadd.f32 %v7684_v24, %v3501_v8  ;;  %vm3317_vm5 = vweird.f32 %v7689_v42 }
 0x86a   : > { %5501 = vrsqrt.f32 %v7691_v59  ;;  %v7727_v36 = vadd.f32 %v5585_v58, %v3416_v26  ;;  %vm3318_vm7 = vmor %vm3316_vm6, %vm3317_vm5  ;;  %vm3326_vm9 = vweird.f32 %v7691_v59 }
 0x86b   : > { %v3309_v62 = vsel %vm3308_vm4, %v5498_v10, %v3305_v2  ;;  %v7701_v1 = vmul.f32 0.70710677, %v7696_v49  ;;  %v3312_v9 = vmul.f32 %v7689_v42, %v3311_v45 }
 0x86c   : > { %v3379_v47 = vmul.f32 %v3309_v62, %v7559_v51 }
 0x86d   : > { %v3573_v54 = vmul.f32 %v7701_v1, %v7701_v1  ;;  %v3168_v52 = vpop.xlane.xlu0 %3167  ;;  %v3313_v44 = vmul.f32 0.5, %v3312_v9 }
 0x86e   : > { %v3398_v63 = vmul.f32 %v7550_v6, %v3379_v47  ;;  %v3190_v14 = vmul.f32 %v3168_v52, %v7433_v20 }
 0x86f   : > { %v7709_v56 = vmin.f32 %v3573_v54, 16.0  ;;  %v3314_v31 = vsub.f32 1.5, %v3313_v44 }
 0x870   : > { %v7712_v60 = vpop.eup %5501  ;;  %v7714_v51 = vadd.f32 1e-05, %v3190_v14  ;;  %v3503_v25 = vpop.f32.mrf.mxu1  ;;  %v3417_v46 = vadd.f32 %v7564_v48, %v3398_v63 }
 0x871   : > { %v3321_v27 = vmul.f32 %v7712_v60, %v7691_v59  ;;  %v3575_v7 = vmul.f32 2.1237322e-06, %v7709_v56  ;;  %v3586_v35 = vmul.f32 3.8918573e-05, %v7709_v56  ;;  %v7723_v12 = vadd.f32 %v7684_v24, %v3503_v25 }
 0x872   : > { %5503 = vrsqrt.f32 %v7714_v51  ;;  %v7730_v10 = vadd.f32 %v5586_v4, %v3417_v46  ;;  %v3315_v21 = vmul.f32 %v7689_v42, %v3314_v31  ;;  %vm3327_vm8 = vweird.f32 %v7712_v60 }
 0x873   : > { %v3322_v40 = vmul.f32 %v7712_v60, %v3321_v27  ;;  %v3576_v61 = vadd.f32 0.00028619796, %v3575_v7  ;;  %v3587_v53 = vadd.f32 0.001143296, %v3586_v35  ;;  %v7733_v19 = vmul.f32 0.70710677, %v7723_v12  ;;  %vm3328_vm10 = vmor %vm3326_vm9, %vm3327_vm8 }
 0x874   : > { %v3444_v13 = vpack.c.bf16 %v7730_v10, %v7727_v36  ;;  %v3319_v63 = vsel %vm3318_vm7, %v7689_v42, %v3315_v21  ;;  %vm3336_vm12 = vweird.f32 %v7714_v51 }
 0x875   : > { %v3577_v34 = vmul.f32 %v3576_v61, %v7709_v56  ;;  %v3171_v29 = vpop.xlane.xlu2 %3170  ;;  %v3588_v18 = vmul.f32 %v3587_v53, %v7709_v56  ;;  %v3613_v17 = vmul.f32 %v7733_v19, %v7733_v19  ;;  %v3323_v37 = vmul.f32 0.5, %v3322_v40 }
 0x876   : > { %v3191_v3 = vmul.f32 %v3171_v29, %v7433_v20  ;;  %5000 = vmatmul.msk.bf16.gmra.mxu1 %vm526_vm0, %v3444_v13  ;;  %v3380_v40 = vmul.f32 %v3319_v63, %v7579_v16 }
 0x877   : > { %v3589_v38 = vadd.f32 0.014752088, %v3588_v18  ;;  %v7747_v8 = vmin.f32 %v3613_v17, 16.0  ;;  %v3578_v45 = vadd.f32 0.0036580483, %v3577_v34  ;;  %v3324_v52 = vsub.f32 1.5, %v3323_v37 }
 0x878   : > { %v7744_v41 = vpop.eup %5503  ;;  %v7749_v2 = vadd.f32 1e-05, %v3191_v3  ;;  %v3506_v62 = vpop.f32.mrf.mxu1  ;;  %v3399_v37 = vmul.f32 %v7550_v6, %v3380_v40 }
 0x879   : > { %v3331_v22 = vmul.f32 %v7744_v41, %v7714_v51  ;;  %v3590_v47 = vmul.f32 %v3589_v38, %v7709_v56  ;;  %v3615_v9 = vmul.f32 2.1237322e-06, %v7747_v8  ;;  %v3626_v54 = vmul.f32 3.8918573e-05, %v7747_v8 }
 0x87a   : > { %5505 = vrsqrt.f32 %v7749_v2  ;;  %v3579_v44 = vmul.f32 %v3578_v45, %v7709_v56  ;;  %v7764_v46 = vadd.f32 %v7684_v24, %v3506_v62  ;;  %v3325_v58 = vmul.f32 %v7712_v60, %v3324_v52 }
 0x87b   : > { %v3591_v15 = vadd.f32 0.112945676, %v3590_v47  ;;  %v3616_v14 = vadd.f32 0.00028619796, %v3615_v9  ;;  %v3627_v26 = vadd.f32 0.001143296, %v3626_v54  ;;  %v3332_v25 = vmul.f32 %v7744_v41, %v3331_v22 }
 0x87c   : > { %v7772_v42 = vmul.f32 0.70710677, %v7764_v46  ;;  %v3580_v34 = vadd.f32 0.05243302, %v3579_v44  ;;  %v3329_v21 = vsel %vm3328_vm10, %v7712_v60, %v3325_v58  ;;  %v5069_v9 = vld [vmem:[%s8592_s10 + $0x28] sm:$0xff]  ;;  %vm3337_vm11 = vweird.f32 %v7744_v41 }
 0x87d   : > { %v3592_v27 = vmul.f32 %v3591_v15, %v7709_v56  ;;  %v3617_v7 = vmul.f32 %v3616_v14, %v7747_v8  ;;  %v3628_v35 = vmul.f32 %v3627_v26, %v7747_v8  ;;  %v3333_v29 = vmul.f32 0.5, %v3332_v25  ;;  %4332 = vmatpush.bf16.msrb.mxu2 %v5069_v9  ;;  %vm7822_vm14 = vmor %vm3336_vm12, %vm3337_vm11 }
 0x87e   : > { %v3653_v3 = vmul.f32 %v7772_v42, %v7772_v42  ;;  %v3581_v62 = vmul.f32 %v3580_v34, %v7709_v56  ;;  %v3381_v63 = vmul.f32 %v3329_v21, %v7597_v5  ;;  %v3418_v26 = vadd.f32 %v7564_v48, %v3399_v37 }
 0x87f   : > { %v3593_v4 = vadd.f32 0.4994258, %v3592_v27  ;;  %v3618_v31 = vadd.f32 0.0036580483, %v3617_v7  ;;  %v3629_v53 = vadd.f32 0.014752088, %v3628_v35  ;;  %vm3346_vm13 = vweird.f32 %v7749_v2 }
 0x880   : > { %v7774_v61 = vpop.eup %5505  ;;  %v3508_v59 = vpop.f32.mrf.mxu1  ;;  %v7793_v47 = vmin.f32 %v3653_v3, 16.0  ;;  %v3334_v54 = vsub.f32 1.5, %v3333_v29  ;;  %v3582_v44 = vadd.f32 0.18741608, %v3581_v62  ;;  %v5068_v27 = vld [vmem:[%s8592_s10 + $0x20] sm:$0xff]  ;;  %v3400_v40 = vmul.f32 %v7550_v6, %v3381_v63  ;;  %v5587_v29 = vld [vmem:[%s5715_s27 + $0x50] sm:$0xff] }
 0x881   : > { %v3341_v13 = vmul.f32 %v7774_v61, %v7749_v2  ;;  %v3594_v16 = vmul.f32 %v3593_v4, %v7709_v56  ;;  %v3619_v18 = vmul.f32 %v3618_v31, %v7747_v8  ;;  %v3630_v17 = vmul.f32 %v3629_v53, %v7747_v8  ;;  %4333 = vmatpush.bf16.msrb.mxu2 %v5068_v27 }
 0x882   : > { %v3666_v14 = vmul.f32 3.8918573e-05, %v7793_v47  ;;  %v3335_v7 = vmul.f32 %v7744_v41, %v3334_v54  ;;  %v3655_v53 = vmul.f32 2.1237322e-06, %v7793_v47  ;;  %vm3347_vm15 = vweird.f32 %v7774_v61 }
 0x883   : > { %v7789_v38 = vadd.f32 1.0, %v3594_v16  ;;  %v3631_v45 = vadd.f32 0.112945676, %v3630_v17  ;;  %v3342_v22 = vmul.f32 %v7774_v61, %v3341_v13  ;;  %v3620_v52 = vadd.f32 0.05243302, %v3619_v18  ;;  %vm7854_vm3 = vmor %vm3346_vm13, %vm3347_vm15 }
 0x884   : > { %v3667_v35 = vadd.f32 0.001143296, %v3666_v14  ;;  %v7816_v13 = vadd.f32 %v5587_v29, %v3418_v26  ;;  %v3583_v16 = vmul.f32 %v3582_v44, %v7709_v56  ;;  %v3339_v21 = vsel %vm7822_vm14, %v7744_v41, %v3335_v7  ;;  %v5067_v41 = vld [vmem:[%s8592_s10 + $0x18] sm:$0xff] }
 0x885   : > { %5507 = vrcp.f32 %v7789_v38  ;;  %v3632_v60 = vmul.f32 %v3631_v45, %v7747_v8  ;;  %v3343_v15 = vmul.f32 0.5, %v3342_v22  ;;  %v3621_v5 = vmul.f32 %v3620_v52, %v7747_v8  ;;  %4334 = vmatpush.bf16.msrb.mxu2 %v5067_v41 }
 0x886   : > { %v3668_v34 = vmul.f32 %v3667_v35, %v7793_v47  ;;  %v3607_v37 = vand.u32 2147483648, %v7789_v38  ;;  %v7835_v62 = vadd.f32 %v7684_v24, %v3508_v59  ;;  %v3419_v9 = vadd.f32 %v7564_v48, %v3400_v40 }
 0x887   : > { %v3633_v25 = vadd.f32 0.4994258, %v3632_v60  ;;  %v3344_v31 = vsub.f32 1.5, %v3343_v15  ;;  %v3622_v56 = vadd.f32 0.18741608, %v3621_v5  ;;  %vm3601_vm2 = vweird.f32 %v7789_v38 }
 0x888   : > { %v3511_v3 = vpop.f32.mrf.mxu1  ;;  %v3669_v45 = vadd.f32 0.014752088, %v3668_v34  ;;  %v3656_v52 = vadd.f32 0.00028619796, %v3655_v53  ;;  %v3584_v15 = vadd.f32 1.1283791, %v3583_v16  ;;  %v3382_v44 = vmul.f32 %v3339_v21, %v7608_v55 }
 0x889   : > { %v3634_v58 = vmul.f32 %v3633_v25, %v7747_v8  ;;  %v3345_v54 = vmul.f32 %v7774_v61, %v3344_v31  ;;  %v7841_v60 = vadd.f32 %v7684_v24, %v3511_v3  ;;  %v3605_v59 = vand.u32 2147483647, %v7789_v38  ;;  %v5066_v31 = vld [vmem:[%s8592_s10 + $0x10] sm:$0xff] }
 0x88a   : > { %v3670_v63 = vmul.f32 %v3669_v45, %v7793_v47  ;;  %v3608_v26 = vor.u32 1.1754944e-38, %v3607_v37  ;;  %v3623_v7 = vmul.f32 %v3622_v56, %v7747_v8  ;;  %v7859_v35 = vmul.f32 0.70710677, %v7835_v62  ;;  %4335 = vmatpush.bf16.msrb.mxu2 %v5066_v31 }
 0x88b   : > { %v5508_v4 = vpop.eup %5507  ;;  %v7826_v17 = vadd.f32 1.0, %v3634_v58  ;;  %v3349_v55 = vsel %vm7854_vm3, %v7774_v61, %v3345_v54  ;;  %v3657_v8 = vmul.f32 %v3656_v52, %v7793_v47  ;;  %v7870_v2 = vmul.f32 0.70710677, %v7841_v60  ;;  %v5065_v54 = vld [vmem:[%s8592_s10 + $0x8] sm:$0xff] }
 0x88c   : > { %v3597_v18 = vmul.f32 %v5508_v4, %v7789_v38  ;;  %vm3602_vm1 = vweird.f32 %v5508_v4  ;;  %v3671_v25 = vadd.f32 0.112945676, %v3670_v63  ;;  %v5588_v38 = vld [vmem:[%s5715_s27 + $0x58] sm:$0xff]  ;;  %vm3606_vm5 = vcmp.eq.f32.partialorder %v3605_v59, 8.507059e+37 }
 0x88d   : > { %5509 = vrcp.f32 %v7826_v17  ;;  %v7862_v40 = vadd.f32 %v5588_v38, %v3419_v9  ;;  %vm3603_vm4 = vmor %vm3601_vm2, %vm3602_vm1  ;;  %v3693_v29 = vmul.f32 %v7859_v35, %v7859_v35  ;;  %v3585_v16 = vmul.f32 %v3584_v15, %v7701_v1 }
 0x88e   : > { %v3598_v22 = vsub.f32 1.0, %v3597_v18  ;;  %v3672_v58 = vmul.f32 %v3671_v25, %v7793_v47  ;;  %v3401_v51 = vmul.f32 %v7550_v6, %v3382_v44  ;;  %v3624_v37 = vadd.f32 1.1283791, %v3623_v7  ;;  %4336 = vmatpush.bf16.msrb.mxu2 %v5065_v54 }
 0x88f   : > { %v3445_v61 = vpack.c.bf16 %v7862_v40, %v7816_v13  ;;  %v3383_v21 = vmul.f32 %v3349_v55, %v7626_v32  ;;  %v3658_v9 = vadd.f32 0.0036580483, %v3657_v8  ;;  %v3733_v1 = vmul.f32 %v7870_v2, %v7870_v2  ;;  %v5064_v55 = vld [vmem:[%s8592_s10] sm:$0xff] }
 0x890   : > { %v3599_v14 = vmul.f32 %v5508_v4, %v3598_v22  ;;  %v3673_v56 = vadd.f32 0.4994258, %v3672_v58  ;;  %v3647_v52 = vand.u32 2147483648, %v7826_v17  ;;  %vm3641_vm7 = vweird.f32 %v7826_v17 }
 0x891   : > { %5001 = vmatmul.msk.bf16.gmra.mxu1 %vm526_vm0, %v3445_v61  ;;  %v7896_v59 = vmin.f32 %v3733_v1, 16.0  ;;  %v3659_v5 = vmul.f32 %v3658_v9, %v7793_v47  ;;  %v3625_v8 = vmul.f32 %v3624_v37, %v7733_v19  ;;  %v3513_v61 = vpop.f32.mrf.mxu1  ;;  %vm4305_vm10 = vcmask 785408  }
 0x892   : > { %v3600_v27 = vadd.f32 %v5508_v4, %v3599_v14  ;;  %v3674_v63 = vmul.f32 %v3673_v56, %v7793_v47  ;;  %v3645_v14 = vand.u32 2147483647, %v7826_v17  ;;  %v3648_v58 = vor.u32 1.1754944e-38, %v3647_v52  ;;  %4337 = vmatpush.bf16.msrb.mxu2 %v5064_v55  ;;  %v5590_v55 = vld [vmem:[%s5715_s27 + $0x68] sm:$0xff] }
 0x893   : > { %v5510_v53 = vpop.eup %5509  ;;  %v3746_v38 = vmul.f32 3.8918573e-05, %v7896_v59  ;;  %v3660_v37 = vadd.f32 0.05243302, %v3659_v5 }
 0x894   : > { %v3604_v34 = vsel %vm3603_vm4, %v5508_v4, %v3600_v27  ;;  %v3637_v3 = vmul.f32 %v5510_v53, %v7826_v17  ;;  %v7883_v4 = vmin.f32 %v3693_v29, 16.0  ;;  %vm3642_vm6 = vweird.f32 %v5510_v53 }
 0x895   : > { %v3609_v18 = vsel %vm3606_vm5, %v3608_v26, %v3604_v34  ;;  %v7899_v26 = vadd.f32 1.0, %v3674_v63  ;;  %vm3643_vm8 = vmor %vm3641_vm7, %vm3642_vm6  ;;  %v3402_v17 = vmul.f32 %v7550_v6, %v3383_v21  ;;  %vm3646_vm9 = vcmp.eq.f32.partialorder %v3645_v14, 8.507059e+37 }
 0x896   : > { %v3610_v45 = vmul.f32 %v3609_v18, %v3585_v16  ;;  %v3638_v22 = vsub.f32 1.0, %v3637_v3  ;;  %v3695_v32 = vmul.f32 2.1237322e-06, %v7883_v4  ;;  %v3706_v41 = vmul.f32 3.8918573e-05, %v7883_v4 }
 0x897   : > { %5511 = vrcp.f32 %v7899_v26  ;;  %v3541_v16 = vmul.f32 0.5, %v7696_v49  ;;  %v3747_v3 = vadd.f32 0.001143296, %v3746_v38  ;;  %v3735_v6 = vmul.f32 2.1237322e-06, %v7896_v59  ;;  %v5589_v38 = vld [vmem:[%s5715_s27 + $0x60] sm:$0xff] }
 0x898   : > { %v3639_v15 = vmul.f32 %v5510_v53, %v3638_v22  ;;  %v3696_v44 = vadd.f32 0.00028619796, %v3695_v32  ;;  %v3707_v25 = vadd.f32 0.001143296, %v3706_v41  ;;  %v5004_v27 = vclamps-f32 %v3610_v45, 1.0 }
 0x899   : > { %v7915_v21 = vadd.f32 %v7684_v24, %v3513_v61  ;;  %v3420_v49 = vadd.f32 %v7564_v48, %v3401_v51  ;;  %v3421_v54 = vadd.f32 %v7564_v48, %v3402_v17  ;;  %v3542_v63 = vmul.f32 0.5, %v7723_v12 }
 0x89a   : > { %v3640_v7 = vadd.f32 %v5510_v53, %v3639_v15  ;;  %v3697_v34 = vmul.f32 %v3696_v44, %v7883_v4  ;;  %v3708_v29 = vmul.f32 %v3707_v25, %v7883_v4  ;;  %v4213_v56 = vadd.f32 1.0, %v5004_v27 }
 0x89b   : > { %v3661_v14 = vmul.f32 %v3660_v37, %v7793_v47  ;;  %v7929_v48 = vmul.f32 0.70710677, %v7915_v21  ;;  %v3736_v5 = vadd.f32 0.00028619796, %v3735_v6  ;;  %v7932_v12 = vadd.f32 %v5589_v38, %v3420_v49 }
 0x89c   : > { %v3644_v31 = vsel %vm3643_vm8, %v5510_v53, %v3640_v7  ;;  %v3709_v45 = vadd.f32 0.014752088, %v3708_v29  ;;  %v3698_v22 = vadd.f32 0.0036580483, %v3697_v34  ;;  %v3748_v53 = vmul.f32 %v3747_v3, %v7896_v59 }
 0x89d   : > { %v3649_v18 = vsel %vm3646_vm9, %v3648_v58, %v3644_v31  ;;  %v7920_v52 = vpop.eup %5511  ;;  %v4229_v41 = vmul.f32 %v4213_v56, %v3541_v16  ;;  %v3773_v34 = vmul.f32 %v7929_v48, %v7929_v48  ;;  %v3737_v37 = vmul.f32 %v3736_v5, %v7896_v59 }
 0x89e   : > { %v3650_v19 = vmul.f32 %v3649_v18, %v3625_v8  ;;  %v3710_v1 = vmul.f32 %v3709_v45, %v7883_v4  ;;  %v3749_v32 = vadd.f32 0.014752088, %v3748_v53  ;;  %v3677_v44 = vmul.f32 %v7920_v52, %v7899_v26 }
 0x89f   : > { %v3699_v25 = vmul.f32 %v3698_v22, %v7883_v4  ;;  %v7935_v8 = vadd.f32 %v5590_v55, %v3421_v54  ;;  %v7943_v56 = vmin.f32 %v3773_v34, 16.0  ;;  %vm3682_vm11 = vweird.f32 %v7920_v52 }
 0x8a0   : > { %v5005_v9 = vclamps-f32 %v3650_v19, 1.0  ;;  %v3711_v27 = vadd.f32 0.112945676, %v3710_v1  ;;  %v3750_v51 = vmul.f32 %v3749_v32, %v7896_v59  ;;  %v3678_v58 = vsub.f32 1.0, %v3677_v44 }
 0x8a1   : > { %v3446_v61 = vpack.c.bf16 %v7935_v8, %v7932_v12  ;;  %v3700_v16 = vadd.f32 0.05243302, %v3699_v25  ;;  %v3662_v19 = vadd.f32 0.18741608, %v3661_v14  ;;  %v3775_v53 = vmul.f32 2.1237322e-06, %v7943_v56 }
 0x8a2   : > { %v4214_v15 = vadd.f32 1.0, %v5005_v9  ;;  %v3712_v17 = vmul.f32 %v3711_v27, %v7883_v4  ;;  %v3751_v31 = vadd.f32 0.112945676, %v3750_v51  ;;  %v3679_v45 = vmul.f32 %v7920_v52, %v3678_v58 }
 0x8a3   : > { %5002 = vmatmul.msk.bf16.gmra.mxu1 %vm526_vm0, %v3446_v61  ;;  %v3786_v9 = vmul.f32 3.8918573e-05, %v7943_v56  ;;  %v3701_v1 = vmul.f32 %v3700_v16, %v7883_v4  ;;  %v3776_v32 = vadd.f32 0.00028619796, %v3775_v53  ;;  %v3738_v14 = vadd.f32 0.0036580483, %v3737_v37 }
 0x8a4   : > { %v4230_v7 = vmul.f32 %v4214_v15, %v3542_v63  ;;  %v3713_v18 = vadd.f32 0.4994258, %v3712_v17  ;;  %v3752_v3 = vmul.f32 %v3751_v31, %v7896_v59  ;;  %v3663_v63 = vmul.f32 %v3662_v19, %v7793_v47 }
 0x8a5   : > { %v3680_v15 = vadd.f32 %v7920_v52, %v3679_v45  ;;  %v3687_v44 = vand.u32 2147483648, %v7899_v26  ;;  %v3777_v27 = vmul.f32 %v3776_v32, %v7943_v56  ;;  %vm3681_vm12 = vweird.f32 %v7899_v26 }
 0x8a6   : > { %v4245_v29 = vpack.c.bf16 %v4230_v7, %v4229_v41  ;;  %v3714_v22 = vmul.f32 %v3713_v18, %v7883_v4  ;;  %v3753_v6 = vadd.f32 0.4994258, %v3752_v3  ;;  %v3787_v41 = vadd.f32 0.001143296, %v3786_v9  ;;  %vm3683_vm13 = vmor %vm3681_vm12, %vm3682_vm11 }
 0x8a7   : > { %v3685_v51 = vand.u32 2147483647, %v7899_v26  ;;  %v3702_v7 = vadd.f32 0.18741608, %v3701_v1  ;;  %v3664_v5 = vadd.f32 1.1283791, %v3663_v63  ;;  %v3684_v38 = vsel %vm3683_vm13, %v7920_v52, %v3680_v15 }
 0x8a8   : > { %5044 = vmatmul.msk.bf16.vlgmr.msrb.gmra.mxu2 %vm4305_vm10, %v4245_v29  ;;  %v3715_v49 = vadd.f32 1.0, %v3714_v22  ;;  %v3754_v54 = vmul.f32 %v3753_v6, %v7896_v59  ;;  %v3788_v47 = vmul.f32 %v3787_v41, %v7943_v56  ;;  %v3739_v55 = vmul.f32 %v3738_v14, %v7896_v59  ;;  %v3174_v29 = vpop.xlane.xlu1 %3173 }
 0x8a9   : > { %v3688_v58 = vor.u32 1.1754944e-38, %v3687_v44  ;;  %v3778_v17 = vadd.f32 0.0036580483, %v3777_v27  ;;  %vm3686_vm14 = vcmp.eq.f32.partialorder %v3685_v51, 8.507059e+37  ;;  %v3703_v61 = vmul.f32 %v3702_v7, %v7883_v4 }
 0x8aa   : > { %5513 = vrcp.f32 %v3715_v49  ;;  %v7958_v25 = vadd.f32 1.0, %v3754_v54  ;;  %v3789_v31 = vadd.f32 0.014752088, %v3788_v47  ;;  %v3665_v3 = vmul.f32 %v3664_v5, %v7772_v42 }
 0x8ab   : > { %v3689_v26 = vsel %vm3686_vm14, %v3688_v58, %v3684_v38  ;;  %v3740_v19 = vadd.f32 0.05243302, %v3739_v55  ;;  %v3192_v52 = vmul.f32 %v3174_v29, %v7433_v20  ;;  %v3779_v22 = vmul.f32 %v3778_v17, %v7943_v56 }
 0x8ac   : > { %5515 = vrcp.f32 %v7958_v25  ;;  %v3790_v18 = vmul.f32 %v3789_v31, %v7943_v56  ;;  %v3690_v53 = vmul.f32 %v3689_v26, %v3665_v3  ;;  %v3704_v9 = vadd.f32 1.1283791, %v3703_v61 }
 0x8ad   : > { %v3727_v1 = vand.u32 2147483648, %v3715_v49  ;;  %v3725_v63 = vand.u32 2147483647, %v3715_v49  ;;  %v3741_v42 = vmul.f32 %v3740_v19, %v7896_v59  ;;  %vm3721_vm1 = vweird.f32 %v3715_v49 }
 0x8ae   : > { %v3791_v6 = vadd.f32 0.112945676, %v3790_v18  ;;  %v3780_v14 = vadd.f32 0.05243302, %v3779_v22  ;;  %v7975_v27 = vadd.f32 1e-05, %v3192_v52  ;;  %v3705_v51 = vmul.f32 %v3704_v9, %v7859_v35 }
 0x8af   : > { %v3728_v7 = vor.u32 1.1754944e-38, %v3727_v1  ;;  %v5006_v47 = vclamps-f32 %v3690_v53, 1.0  ;;  %vm3726_vm3 = vcmp.eq.f32.partialorder %v3725_v63, 8.507059e+37  ;;  %v3742_v58 = vadd.f32 0.18741608, %v3741_v42 }
 0x8b0   : > { %v5514_v34 = vpop.eup %5513  ;;  %v3792_v32 = vmul.f32 %v3791_v6, %v7943_v56  ;;  %v3781_v29 = vmul.f32 %v3780_v14, %v7943_v56  ;;  %5517 = vrsqrt.f32 %v7975_v27  ;;  %v3543_v35 = vmul.f32 0.5, %v7764_v46 }
 0x8b1   : > { %v3717_v16 = vmul.f32 %v5514_v34, %v3715_v49  ;;  %vm3722_vm15 = vweird.f32 %v5514_v34  ;;  %v4215_v61 = vadd.f32 1.0, %v5006_v47  ;;  %v3544_v18 = vmul.f32 0.5, %v7835_v62 }
 0x8b2   : > { %v5516_v37 = vpop.eup %5515  ;;  %v3793_v44 = vadd.f32 0.4994258, %v3792_v32  ;;  %vm3723_vm2 = vmor %vm3721_vm1, %vm3722_vm15  ;;  %v3767_v19 = vand.u32 2147483648, %v7958_v25  ;;  %v3782_v52 = vadd.f32 0.18741608, %v3781_v29  ;;  %vm3761_vm5 = vweird.f32 %v7958_v25 }
 0x8b3   : > { %v3718_v45 = vsub.f32 1.0, %v3717_v16  ;;  %v3757_v54 = vmul.f32 %v5516_v37, %v7958_v25  ;;  %v3743_v16 = vmul.f32 %v3742_v58, %v7896_v59  ;;  %vm3762_vm4 = vweird.f32 %v5516_v37 }
 0x8b4   : > { %v3794_v38 = vmul.f32 %v3793_v44, %v7943_v56  ;;  %v4231_v22 = vmul.f32 %v4215_v61, %v3543_v35  ;;  %vm3763_vm6 = vmor %vm3761_vm5, %vm3762_vm4  ;;  %vm3356_vm14 = vweird.f32 %v7975_v27 }
 0x8b5   : > { %v3719_v4 = vmul.f32 %v5514_v34, %v3718_v45  ;;  %v3758_v41 = vsub.f32 1.0, %v3757_v54  ;;  %v3765_v45 = vand.u32 2147483647, %v7958_v25  ;;  %v3744_v9 = vadd.f32 1.1283791, %v3743_v16 }
 0x8b6   : > { %v3795_v49 = vadd.f32 1.0, %v3794_v38  ;;  %v5518_v53 = vpop.eup %5517  ;;  %v3768_v54 = vor.u32 1.1754944e-38, %v3767_v19 }
 0x8b7   : > { %v3720_v15 = vadd.f32 %v5514_v34, %v3719_v4  ;;  %v3759_v17 = vmul.f32 %v5516_v37, %v3758_v41  ;;  %v3783_v4 = vmul.f32 %v3782_v52, %v7943_v56  ;;  %vm3766_vm7 = vcmp.eq.f32.partialorder %v3765_v45, 8.507059e+37 }
 0x8b8   : > { %5519 = vrcp.f32 %v3795_v49  ;;  %v3351_v63 = vmul.f32 %v5518_v53, %v7975_v27  ;;  %v3745_v25 = vmul.f32 %v3744_v9, %v7870_v2  ;;  %vm3801_vm9 = vweird.f32 %v3795_v49  ;;  %v5591_v27 = vld [vmem:[%s8588_s6] ss:$0 sm:$0xff] }
 0x8b9   : > { %v3724_v5 = vsel %vm3723_vm2, %v5514_v34, %v3720_v15  ;;  %v3760_v34 = vadd.f32 %v5516_v37, %v3759_v17  ;;  %v3784_v41 = vadd.f32 1.1283791, %v3783_v4  ;;  %v3807_v15 = vand.u32 2147483648, %v3795_v49 }
 0x8ba   : > { %v3729_v55 = vsel %vm3726_vm3, %v3728_v7, %v3724_v5  ;;  %vm3357_vm13 = vweird.f32 %v5518_v53 }
 0x8bb   : > { %v3730_v31 = vmul.f32 %v3729_v55, %v3705_v51  ;;  %v3764_v46 = vsel %vm3763_vm6, %v5516_v37, %v3760_v34  ;;  %v3805_v37 = vand.u32 2147483647, %v3795_v49  ;;  %v3352_v51 = vmul.f32 %v5518_v53, %v3351_v63  ;;  %vm3358_vm15 = vmor %vm3356_vm14, %vm3357_vm13 }
 0x8bc   : > { %v3769_v32 = vsel %vm3766_vm7, %v3768_v54, %v3764_v46  ;;  %v3785_v56 = vmul.f32 %v3784_v41, %v7929_v48  ;;  %v3808_v47 = vor.u32 1.1754944e-38, %v3807_v15  ;;  %v3546_v48 = vmul.f32 0.5, %v7915_v21 }
 0x8bd   : > { %v5007_v26 = vclamps-f32 %v3730_v31, 1.0  ;;  %v3770_v14 = vmul.f32 %v3769_v32, %v3745_v25  ;;  %vm3806_vm12 = vcmp.eq.f32.partialorder %v3805_v37, 8.507059e+37  ;;  %v3353_v58 = vmul.f32 0.5, %v3352_v51  ;;  %v5592_v32 = vld [vmem:[%s8589_s7] ss:$0 sm:$0xff] }
 0x8be   : > { %v5520_v1 = vpop.eup %5519 }
 0x8bf   : > { %v4216_v3 = vadd.f32 1.0, %v5007_v26  ;;  %v3797_v62 = vmul.f32 %v5520_v1, %v3795_v49  ;;  %vm3802_vm8 = vweird.f32 %v5520_v1  ;;  %v5008_v38 = vclamps-f32 %v3770_v14, 1.0 }
 0x8c0   : > { %vm3803_vm11 = vmor %vm3801_vm9, %vm3802_vm8  ;;  %v3354_v35 = vsub.f32 1.5, %v3353_v58  ;;  %v3545_v49 = vmul.f32 0.5, %v7841_v60 }
 0x8c1   : > { %v4232_v6 = vmul.f32 %v4216_v3, %v3544_v18  ;;  %v3798_v42 = vsub.f32 1.0, %v3797_v62  ;;  %v4217_v61 = vadd.f32 1.0, %v5008_v38 }
 0x8c2   : > { %v3355_v3 = vmul.f32 %v5518_v53, %v3354_v35 }
 0x8c3   : > { %v4246_v59 = vpack.c.bf16 %v4232_v6, %v4231_v22  ;;  %v3799_v44 = vmul.f32 %v5520_v1, %v3798_v42  ;;  %v4233_v34 = vmul.f32 %v4217_v61, %v3545_v49 }
 0x8c4   : > { %v3359_v22 = vsel %vm3358_vm15, %v5518_v53, %v3355_v3 }
 0x8c5   : > { %5045 = vmatmul.msk.bf16.gmra.mxu2 %vm4305_vm10, %v4246_v59  ;;  %v3800_v7 = vadd.f32 %v5520_v1, %v3799_v44  ;;  %v3384_v60 = vmul.f32 %v3359_v22, %v7637_v57 }
 0x8c7   : > { %v3804_v55 = vsel %vm3803_vm11, %v5520_v1, %v3800_v7  ;;  %v3403_v54 = vmul.f32 %v5591_v27, %v3384_v60  ;;  %v5594_v7 = vld [vmem:[%s5715_s27 + $0x78] sm:$0xff] }
 0x8c8   : > { %v3809_v17 = vsel %vm3806_vm12, %v3808_v47, %v3804_v55 }
 0x8c9   : > { %v3810_v31 = vmul.f32 %v3809_v17, %v3785_v56  ;;  %v3422_v25 = vadd.f32 %v5592_v32, %v3403_v54 }
 0x8cb   : > { %v5009_v26 = vclamps-f32 %v3810_v31, 1.0 }
 0x8cd   : > { %v4218_v16 = vadd.f32 1.0, %v5009_v26 }
 0x8cf   : > { %v4234_v18 = vmul.f32 %v4218_v16, %v3546_v48 }
 0x8d0   : > { %v3177_v5 = vpop.xlane.xlu0 %3176 }
 0x8d1   : > { %v3193_v2 = vmul.f32 %v3177_v5, %v7433_v20  ;;  %v4247_v52 = vpack.c.bf16 %v4234_v18, %v4233_v34 }
 0x8d3   : > { %v3209_v29 = vadd.f32 1e-05, %v3193_v2 }
 0x8d5   : > { %5521 = vrsqrt.f32 %v3209_v29  ;;  %5046 = vmatmul.msk.bf16.gmra.mxu2 %vm4305_vm10, %v4247_v52  ;;  %vm3366_vm2 = vweird.f32 %v3209_v29 }
 0x8db   : > { %v5522_v19 = vpop.eup %5521 }
 0x8dc   : > { %v3361_v45 = vmul.f32 %v5522_v19, %v3209_v29  ;;  %vm3367_vm1 = vweird.f32 %v5522_v19 }
 0x8dd   : > { %vm3368_vm3 = vmor %vm3366_vm2, %vm3367_vm1 }
 0x8de   : > { %v3362_v6 = vmul.f32 %v5522_v19, %v3361_v45 }
 0x8e0   : > { %v3363_v9 = vmul.f32 0.5, %v3362_v6 }
 0x8e2   : > { %v3364_v46 = vsub.f32 1.5, %v3363_v9 }
 0x8e3   : > { %v3516_v21 = vpop.f32.mrf.mxu1 }
 0x8e4   : > { %v3365_v1 = vmul.f32 %v5522_v19, %v3364_v46  ;;  %v7999_v59 = vadd.f32 %v7684_v24, %v3516_v21 }
 0x8e6   : > { %v3369_v53 = vsel %vm3368_vm3, %v5522_v19, %v3365_v1  ;;  %v8005_v4 = vmul.f32 0.70710677, %v7999_v59 }
 0x8e7   : > { %v3385_v57 = vmul.f32 %v3369_v53, %v7659_v50  ;;  %v5593_v50 = vld [vmem:[%s5715_s27 + $0x70] sm:$0xff] }
 0x8e8   : > { %v3813_v62 = vmul.f32 %v8005_v4, %v8005_v4  ;;  %v8021_v51 = vadd.f32 %v5593_v50, %v3422_v25 }
 0x8e9   : > { %v3404_v63 = vmul.f32 %v5591_v27, %v3385_v57 }
 0x8ea   : > { %v8013_v42 = vmin.f32 %v3813_v62, 16.0 }
 0x8eb   : > { %v3518_v41 = vpop.f32.mrf.mxu1  ;;  %v3423_v15 = vadd.f32 %v5592_v32, %v3404_v63 }
 0x8ec   : > { %v3815_v14 = vmul.f32 2.1237322e-06, %v8013_v42  ;;  %v3826_v44 = vmul.f32 3.8918573e-05, %v8013_v42  ;;  %v8018_v37 = vadd.f32 %v7684_v24, %v3518_v41 }
 0x8ed   : > { %v8024_v56 = vadd.f32 %v5594_v7, %v3423_v15 }
 0x8ee   : > { %v3816_v47 = vadd.f32 0.00028619796, %v3815_v14  ;;  %v3827_v5 = vadd.f32 0.001143296, %v3826_v44  ;;  %v8027_v38 = vmul.f32 0.70710677, %v8018_v37 }
 0x8ef   : > { %v3447_v55 = vpack.c.bf16 %v8024_v56, %v8021_v51 }
 0x8f0   : > { %v3817_v2 = vmul.f32 %v3816_v47, %v8013_v42  ;;  %v3828_v58 = vmul.f32 %v3827_v5, %v8013_v42  ;;  %v3853_v17 = vmul.f32 %v8027_v38, %v8027_v38 }
 0x8f1   : > { %5003 = vmatmul.msk.bf16.gmra.mxu1 %vm526_vm0, %v3447_v55 }
 0x8f2   : > { %v3829_v31 = vadd.f32 0.014752088, %v3828_v58  ;;  %v3818_v29 = vadd.f32 0.0036580483, %v3817_v2  ;;  %v8036_v61 = vmin.f32 %v3853_v17, 16.0 }
 0x8f3   : > { %v3521_v35 = vpop.f32.mrf.mxu1 }
 0x8f4   : > { %v3830_v26 = vmul.f32 %v3829_v31, %v8013_v42  ;;  %v3855_v49 = vmul.f32 2.1237322e-06, %v8036_v61  ;;  %v3866_v48 = vmul.f32 3.8918573e-05, %v8036_v61  ;;  %v8042_v16 = vadd.f32 %v7684_v24, %v3521_v35 }
 0x8f5   : > { %v3819_v18 = vmul.f32 %v3818_v29, %v8013_v42 }
 0x8f6   : > { %v3831_v34 = vadd.f32 0.112945676, %v3830_v26  ;;  %v3856_v3 = vadd.f32 0.00028619796, %v3855_v49  ;;  %v3867_v19 = vadd.f32 0.001143296, %v3866_v48 }
 0x8f7   : > { %v8047_v45 = vmul.f32 0.70710677, %v8042_v16  ;;  %v3820_v46 = vadd.f32 0.05243302, %v3819_v18 }
 0x8f8   : > { %v3832_v52 = vmul.f32 %v3831_v34, %v8013_v42  ;;  %v3857_v22 = vmul.f32 %v3856_v3, %v8036_v61  ;;  %v3868_v6 = vmul.f32 %v3867_v19, %v8036_v61 }
 0x8f9   : > { %v3893_v60 = vmul.f32 %v8047_v45, %v8047_v45  ;;  %v3821_v25 = vmul.f32 %v3820_v46, %v8013_v42 }
 0x8fa   : > { %v3833_v9 = vadd.f32 0.4994258, %v3832_v52  ;;  %v3869_v21 = vadd.f32 0.014752088, %v3868_v6  ;;  %v3858_v27 = vadd.f32 0.0036580483, %v3857_v22 }
 0x8fb   : > { %v8054_v54 = vmin.f32 %v3893_v60, 16.0  ;;  %v3523_v53 = vpop.f32.mrf.mxu1  ;;  %v3822_v5 = vadd.f32 0.18741608, %v3821_v25 }
 0x8fc   : > { %v3834_v1 = vmul.f32 %v3833_v9, %v8013_v42  ;;  %v3870_v57 = vmul.f32 %v3869_v21, %v8036_v61  ;;  %v8059_v32 = vadd.f32 %v7684_v24, %v3523_v53  ;;  %v3859_v14 = vmul.f32 %v3858_v27, %v8036_v61 }
 0x8fd   : > { %v3895_v63 = vmul.f32 2.1237322e-06, %v8054_v54  ;;  %v3906_v15 = vmul.f32 3.8918573e-05, %v8054_v54  ;;  %v3823_v48 = vmul.f32 %v3822_v5, %v8013_v42 }
 0x8fe   : > { %v3835_v62 = vadd.f32 1.0, %v3834_v1  ;;  %v3871_v41 = vadd.f32 0.112945676, %v3870_v57  ;;  %v8066_v47 = vmul.f32 0.70710677, %v8059_v32 }
 0x8ff   : > { %v3896_v50 = vadd.f32 0.00028619796, %v3895_v63  ;;  %v3907_v7 = vadd.f32 0.001143296, %v3906_v15  ;;  %v3860_v2 = vadd.f32 0.05243302, %v3859_v14 }
 0x900   : > { %5523 = vrcp.f32 %v3835_v62  ;;  %v3872_v44 = vmul.f32 %v3871_v41, %v8036_v61  ;;  %v3933_v17 = vmul.f32 %v8066_v47, %v8066_v47  ;;  %v3845_v9 = vand.u32 2147483647, %v3835_v62 }
 0x901   : > { %v3897_v24 = vmul.f32 %v3896_v50, %v8054_v54  ;;  %v3908_v58 = vmul.f32 %v3907_v7, %v8054_v54  ;;  %v3861_v3 = vmul.f32 %v3860_v2, %v8036_v61  ;;  %v3847_v60 = vand.u32 2147483648, %v3835_v62 }
 0x902   : > { %v3873_v55 = vadd.f32 0.4994258, %v3872_v44  ;;  %v8073_v49 = vmin.f32 %v3933_v17, 16.0  ;;  %v3824_v53 = vadd.f32 1.1283791, %v3823_v48  ;;  %vm3841_vm5 = vweird.f32 %v3835_v62 }
 0x903   : > { %v3898_v26 = vadd.f32 0.0036580483, %v3897_v24  ;;  %v3909_v35 = vadd.f32 0.014752088, %v3908_v58  ;;  %v3862_v57 = vadd.f32 0.18741608, %v3861_v3 }
 0x904   : > { %v3874_v31 = vmul.f32 %v3873_v55, %v8036_v61  ;;  %v3935_v52 = vmul.f32 2.1237322e-06, %v8073_v49  ;;  %v3946_v22 = vmul.f32 3.8918573e-05, %v8073_v49  ;;  %v3848_v14 = vor.u32 1.1754944e-38, %v3847_v60 }
 0x905   : > { %v3910_v19 = vmul.f32 %v3909_v35, %v8054_v54  ;;  %v3899_v46 = vmul.f32 %v3898_v26, %v8054_v54  ;;  %vm3846_vm7 = vcmp.eq.f32.partialorder %v3845_v9, 8.507059e+37  ;;  %v3825_v58 = vmul.f32 %v3824_v53, %v8005_v4 }
 0x906   : > { %v5524_v29 = vpop.eup %5523  ;;  %v3875_v18 = vadd.f32 1.0, %v3874_v31  ;;  %v3936_v42 = vadd.f32 0.00028619796, %v3935_v52  ;;  %v3947_v27 = vadd.f32 0.001143296, %v3946_v22 }
 0x907   : > { %v3837_v34 = vmul.f32 %v5524_v29, %v3835_v62  ;;  %vm3842_vm4 = vweird.f32 %v5524_v29  ;;  %v3911_v1 = vadd.f32 0.112945676, %v3910_v19  ;;  %v3900_v44 = vadd.f32 0.05243302, %v3899_v46 }
 0x908   : > { %5525 = vrcp.f32 %v3875_v18  ;;  %v3937_v41 = vmul.f32 %v3936_v42, %v8073_v49  ;;  %v3948_v15 = vmul.f32 %v3947_v27, %v8073_v49  ;;  %vm3843_vm6 = vmor %vm3841_vm5, %vm3842_vm4  ;;  %v3863_v62 = vmul.f32 %v3862_v57, %v8036_v61  ;;  %v8098_v42 = vld [vmem:[%s8591_s9] ss:$0 sm:$0xff] }
 0x909   : > { %v3838_v6 = vsub.f32 1.0, %v3837_v34  ;;  %v3912_v25 = vmul.f32 %v3911_v1, %v8054_v54  ;;  %v3901_v48 = vmul.f32 %v3900_v44, %v8054_v54  ;;  %v3887_v3 = vand.u32 2147483648, %v3875_v18 }
 0x90a   : > { %v3949_v55 = vadd.f32 0.014752088, %v3948_v15  ;;  %v3938_v31 = vadd.f32 0.0036580483, %v3937_v41  ;;  %v3864_v52 = vadd.f32 1.1283791, %v3863_v62  ;;  %vm3881_vm9 = vweird.f32 %v3875_v18 }
 0x90b   : > { %v3839_v21 = vmul.f32 %v5524_v29, %v3838_v6  ;;  %v3913_v5 = vadd.f32 0.4994258, %v3912_v25  ;;  %v3885_v61 = vand.u32 2147483647, %v3875_v18  ;;  %v3902_v60 = vadd.f32 0.18741608, %v3901_v48 }
 0x90c   : > { %v3950_v26 = vmul.f32 %v3949_v55, %v8073_v49  ;;  %v3939_v4 = vmul.f32 %v3938_v31, %v8073_v49  ;;  %v3888_v1 = vor.u32 1.1754944e-38, %v3887_v3  ;;  %v3865_v53 = vmul.f32 %v3864_v52, %v8027_v38 }
 0x90d   : > { %v3840_v63 = vadd.f32 %v5524_v29, %v3839_v21  ;;  %v3914_v17 = vmul.f32 %v3913_v5, %v8054_v54  ;;  %vm3886_vm12 = vcmp.eq.f32.partialorder %v3885_v61, 8.507059e+37  ;;  %v3547_v38 = vmul.f32 0.5, %v7999_v59 }
 0x90e   : > { %v5526_v50 = vpop.eup %5525  ;;  %v3951_v19 = vadd.f32 0.112945676, %v3950_v26  ;;  %v3526_v6 = vpop.f32.mrf.mxu1  ;;  %v3940_v25 = vadd.f32 0.05243302, %v3939_v4  ;;  %v3548_v31 = vmul.f32 0.5, %v8018_v37 }
 0x90f   : > { %v3844_v7 = vsel %vm3843_vm6, %v5524_v29, %v3840_v63  ;;  %v3877_v2 = vmul.f32 %v5526_v50, %v3875_v18  ;;  %v8090_v29 = vadd.f32 1.0, %v3914_v17  ;;  %vm3882_vm8 = vweird.f32 %v5526_v50 }
 0x910   : > { %v3849_v24 = vsel %vm3846_vm7, %v3848_v14, %v3844_v7  ;;  %v3952_v46 = vmul.f32 %v3951_v19, %v8073_v49  ;;  %vm3883_vm11 = vmor %vm3881_vm9, %vm3882_vm8  ;;  %v8101_v27 = vadd.f32 %v8098_v42, %v3526_v6  ;;  %v3903_v14 = vmul.f32 %v3902_v60, %v8054_v54 }
 0x911   : > { %v3878_v35 = vsub.f32 1.0, %v3877_v2  ;;  %v3850_v34 = vmul.f32 %v3849_v24, %v3825_v58  ;;  %5527 = vrcp.f32 %v8090_v29  ;;  %v3941_v2 = vmul.f32 %v3940_v25, %v8073_v49 }
 0x912   : > { %v3953_v63 = vadd.f32 0.4994258, %v3952_v46  ;;  %v8105_v41 = vmul.f32 0.70710677, %v8101_v27  ;;  %v3925_v59 = vand.u32 2147483647, %v8090_v29  ;;  %vm3921_vm14 = vweird.f32 %v8090_v29 }
 0x913   : > { %v3879_v22 = vmul.f32 %v5526_v50, %v3878_v35  ;;  %v5010_v21 = vclamps-f32 %v3850_v34, 1.0  ;;  %v3904_v35 = vadd.f32 1.1283791, %v3903_v14  ;;  %v3927_v61 = vand.u32 2147483648, %v8090_v29 }
 0x914   : > { %v3954_v44 = vmul.f32 %v3953_v63, %v8073_v49  ;;  %v3973_v55 = vmul.f32 %v8105_v41, %v8105_v41  ;;  %v3942_v37 = vadd.f32 0.18741608, %v3941_v2  ;;  %vm3926_vm1 = vcmp.eq.f32.partialorder %v3925_v59, 8.507059e+37 }
 0x915   : > { %v3880_v9 = vadd.f32 %v5526_v50, %v3879_v22  ;;  %v4219_v5 = vadd.f32 1.0, %v5010_v21  ;;  %v3928_v63 = vor.u32 1.1754944e-38, %v3927_v61 }
 0x916   : > { %v3528_v62 = vpop.f32.mrf.mxu1  ;;  %v8114_v58 = vadd.f32 1.0, %v3954_v44  ;;  %v8116_v17 = vmin.f32 %v3973_v55, 16.0 }
 0x917   : > { %v3884_v57 = vsel %vm3883_vm11, %v5526_v50, %v3880_v9  ;;  %v5528_v7 = vpop.eup %5527  ;;  %v8119_v54 = vadd.f32 %v8098_v42, %v3528_v62  ;;  %v4235_v34 = vmul.f32 %v4219_v5, %v3547_v38 }
 0x918   : > { %v3889_v18 = vsel %vm3886_vm12, %v3888_v1, %v3884_v57  ;;  %v3917_v24 = vmul.f32 %v5528_v7, %v8090_v29  ;;  %vm3922_vm13 = vweird.f32 %v5528_v7  ;;  %5529 = vrcp.f32 %v8114_v58 }
 0x919   : > { %v3890_v15 = vmul.f32 %v3889_v18, %v3865_v53  ;;  %v3975_v52 = vmul.f32 2.1237322e-06, %v8116_v17  ;;  %v3986_v22 = vmul.f32 3.8918573e-05, %v8116_v17  ;;  %v8129_v6 = vmul.f32 0.70710677, %v8119_v54  ;;  %vm3923_vm15 = vmor %vm3921_vm14, %vm3922_vm13 }
 0x91a   : > { %v3918_v48 = vsub.f32 1.0, %v3917_v24  ;;  %v3943_v18 = vmul.f32 %v3942_v37, %v8073_v49  ;;  %v3967_v24 = vand.u32 2147483648, %v8114_v58  ;;  %vm3961_vm3 = vweird.f32 %v8114_v58 }
 0x91b   : > { %v5011_v50 = vclamps-f32 %v3890_v15, 1.0  ;;  %v3976_v60 = vadd.f32 0.00028619796, %v3975_v52  ;;  %v3987_v46 = vadd.f32 0.001143296, %v3986_v22  ;;  %v4013_v21 = vmul.f32 %v8129_v6, %v8129_v6 }
 0x91c   : > { %v3919_v19 = vmul.f32 %v5528_v7, %v3918_v48  ;;  %v3905_v15 = vmul.f32 %v3904_v35, %v8047_v45  ;;  %v3944_v2 = vadd.f32 1.1283791, %v3943_v18  ;;  %v3968_v61 = vor.u32 1.1754944e-38, %v3967_v24 }
 0x91d   : > { %v4220_v26 = vadd.f32 1.0, %v5011_v50  ;;  %v3977_v53 = vmul.f32 %v3976_v60, %v8116_v17  ;;  %v3988_v57 = vmul.f32 %v3987_v46, %v8116_v17  ;;  %v8138_v25 = vmin.f32 %v4013_v21, 16.0 }
 0x91e   : > { %v3920_v9 = vadd.f32 %v5528_v7, %v3919_v19  ;;  %v5530_v29 = vpop.eup %5529 }
 0x91f   : > { %v4236_v3 = vmul.f32 %v4220_v26, %v3548_v31  ;;  %v3957_v14 = vmul.f32 %v5530_v29, %v8114_v58  ;;  %v3989_v5 = vadd.f32 0.014752088, %v3988_v57  ;;  %v4026_v55 = vmul.f32 3.8918573e-05, %v8138_v25 }
 0x920   : > { %v3924_v1 = vsel %vm3923_vm15, %v5528_v7, %v3920_v9  ;;  %v4015_v7 = vmul.f32 2.1237322e-06, %v8138_v25  ;;  %v3531_v38 = vpop.f32.mrf.mxu1  ;;  %v3978_v62 = vadd.f32 0.0036580483, %v3977_v53  ;;  %vm3962_vm2 = vweird.f32 %v5530_v29 }
 0x921   : > { %v4248_v4 = vpack.c.bf16 %v4236_v3, %v4235_v34  ;;  %v3929_v44 = vsel %vm3926_vm1, %v3928_v63, %v3924_v1  ;;  %v3958_v50 = vsub.f32 1.0, %v3957_v14  ;;  %v8146_v49 = vadd.f32 %v8098_v42, %v3531_v38  ;;  %vm3963_vm4 = vmor %vm3961_vm3, %vm3962_vm2 }
 0x922   : > { %v3990_v45 = vmul.f32 %v3989_v5, %v8116_v17  ;;  %v4016_v31 = vadd.f32 0.00028619796, %v4015_v7  ;;  %v4027_v26 = vadd.f32 0.001143296, %v4026_v55  ;;  %v3930_v35 = vmul.f32 %v3929_v44, %v3905_v15 }
 0x923   : > { %5047 = vmatmul.msk.bf16.gmra.mxu2 %vm4305_vm10, %v4248_v4  ;;  %v3959_v48 = vmul.f32 %v5530_v29, %v3958_v50  ;;  %v3965_v34 = vand.u32 2147483647, %v8114_v58  ;;  %v8153_v52 = vmul.f32 0.70710677, %v8146_v49  ;;  %v3979_v37 = vmul.f32 %v3978_v62, %v8116_v17 }
 0x924   : > { %v3991_v59 = vadd.f32 0.112945676, %v3990_v45  ;;  %v4017_v3 = vmul.f32 %v4016_v31, %v8138_v25  ;;  %v4028_v19 = vmul.f32 %v4027_v26, %v8138_v25  ;;  %v5012_v21 = vclamps-f32 %v3930_v35, 1.0 }
 0x925   : > { %v3960_v22 = vadd.f32 %v5530_v29, %v3959_v48  ;;  %v4053_v46 = vmul.f32 %v8153_v52, %v8153_v52  ;;  %v3945_v1 = vmul.f32 %v3944_v2, %v8066_v47  ;;  %vm3966_vm5 = vcmp.eq.f32.partialorder %v3965_v34, 8.507059e+37 }
 0x926   : > { %v3992_v4 = vmul.f32 %v3991_v59, %v8116_v17  ;;  %v4018_v9 = vadd.f32 0.0036580483, %v4017_v3  ;;  %v4029_v60 = vadd.f32 0.014752088, %v4028_v19  ;;  %v3980_v44 = vadd.f32 0.05243302, %v3979_v37 }
 0x927   : > { %v3964_v53 = vsel %vm3963_vm4, %v5530_v29, %v3960_v22  ;;  %v8162_v5 = vmin.f32 %v4053_v46, 16.0  ;;  %v8172_v29 = vld [vmem:[%s8593_s11] ss:$0 sm:$0xff]  ;;  %v4221_v50 = vadd.f32 1.0, %v5012_v21  ;;  %v3549_v2 = vmul.f32 0.5, %v8042_v16 }
 0x928   : > { %v3969_v63 = vsel %vm3966_vm5, %v3968_v61, %v3964_v53  ;;  %v3993_v18 = vadd.f32 0.4994258, %v3992_v4  ;;  %v4030_v58 = vmul.f32 %v4029_v60, %v8138_v25  ;;  %v3533_v15 = vpop.f32.mrf.mxu1  ;;  %v4019_v38 = vmul.f32 %v4018_v9, %v8138_v25 }
 0x929   : > { %v3970_v14 = vmul.f32 %v3969_v63, %v3945_v1  ;;  %v8165_v7 = vadd.f32 %v8098_v42, %v3533_v15  ;;  %v4055_v62 = vmul.f32 2.1237322e-06, %v8162_v5  ;;  %v4066_v26 = vmul.f32 3.8918573e-05, %v8162_v5 }
 0x92a   : > { %v3994_v55 = vmul.f32 %v3993_v18, %v8116_v17  ;;  %v4031_v47 = vadd.f32 0.112945676, %v4030_v58  ;;  %v3550_v35 = vmul.f32 0.5, %v8059_v32  ;;  %v3981_v34 = vmul.f32 %v3980_v44, %v8116_v17 }
 0x92b   : > { %v4339_v57 = vpop.f32.mrf.mxu2  ;;  %v5013_v24 = vclamps-f32 %v3970_v14, 1.0  ;;  %v8181_v59 = vmul.f32 0.70710677, %v8165_v7  ;;  %v4020_v3 = vadd.f32 0.05243302, %v4019_v38  ;;  %v4237_v22 = vmul.f32 %v4221_v50, %v3549_v2 }
 0x92c   : > { %v3995_v45 = vadd.f32 1.0, %v3994_v55  ;;  %v4032_v31 = vmul.f32 %v4031_v47, %v8138_v25  ;;  %v8184_v19 = vadd.f32 %v8172_v29, %v4339_v57  ;;  %v4056_v37 = vadd.f32 0.00028619796, %v4055_v62 }
 0x92d   : > { %v4222_v48 = vadd.f32 1.0, %v5013_v24  ;;  %v4067_v4 = vadd.f32 0.001143296, %v4066_v26  ;;  %v4093_v9 = vmul.f32 %v8181_v59, %v8181_v59  ;;  %v3982_v60 = vadd.f32 0.18741608, %v3981_v34 }
 0x92e   : > { %5531 = vrcp.f32 %v3995_v45  ;;  %v4033_v61 = vadd.f32 0.4994258, %v4032_v31  ;;  %v4021_v1 = vmul.f32 %v4020_v3, %v8138_v25  ;;  %v4381_v57 = vsel %vm526_vm0, %v8184_v19, 0.0 }
 0x92f   : > { %v4238_v16 = vmul.f32 %v4222_v48, %v3550_v35  ;;  %v4068_v53 = vmul.f32 %v4067_v4, %v8162_v5  ;;  %v8191_v63 = vmin.f32 %v4093_v9, 16.0  ;;  %v4057_v58 = vmul.f32 %v4056_v37, %v8162_v5  ;;  %4382 = vadd.xlane.f32.xlu2 %v4381_v57 }
 0x930   : > { %v4034_v46 = vmul.f32 %v4033_v61, %v8138_v25  ;;  %v3983_v50 = vmul.f32 %v3982_v60, %v8116_v17  ;;  %v4005_v24 = vand.u32 2147483647, %v3995_v45  ;;  %v4022_v62 = vadd.f32 0.18741608, %v4021_v1 }
 0x931   : > { %v4249_v32 = vpack.c.bf16 %v4238_v16, %v4237_v22  ;;  %v4069_v14 = vadd.f32 0.014752088, %v4068_v53  ;;  %v4095_v44 = vmul.f32 2.1237322e-06, %v8191_v63  ;;  %v4106_v55 = vmul.f32 3.8918573e-05, %v8191_v63 }
 0x932   : > { %v8195_v18 = vadd.f32 1.0, %v4034_v46  ;;  %v4007_v48 = vand.u32 2147483648, %v3995_v45  ;;  %v4058_v34 = vadd.f32 0.0036580483, %v4057_v58  ;;  %v3984_v17 = vadd.f32 1.1283791, %v3983_v50 }
 0x933   : > { %v4341_v21 = vpop.f32.mrf.mxu2  ;;  %5048 = vmatmul.msk.bf16.gmra.mxu2 %vm4305_vm10, %v4249_v32  ;;  %v4070_v31 = vmul.f32 %v4069_v14, %v8162_v5  ;;  %v4096_v26 = vadd.f32 0.00028619796, %v4095_v44  ;;  %v4107_v35 = vadd.f32 0.001143296, %v4106_v55  ;;  %v4023_v4 = vmul.f32 %v4022_v62, %v8138_v25 }
 0x934   : > { %v5532_v15 = vpop.eup %5531  ;;  %v8202_v38 = vadd.f32 %v8172_v29, %v4341_v21  ;;  %5533 = vrcp.f32 %v8195_v18  ;;  %vm4001_vm7 = vweird.f32 %v3995_v45  ;;  %vm4006_vm9 = vcmp.eq.f32.partialorder %v4005_v24, 8.507059e+37 }
 0x935   : > { %v3997_v47 = vmul.f32 %v5532_v15, %v3995_v45  ;;  %vm4002_vm6 = vweird.f32 %v5532_v15  ;;  %v4071_v16 = vadd.f32 0.112945676, %v4070_v31  ;;  %v4097_v61 = vmul.f32 %v4096_v26, %v8191_v63 }
 0x936   : > { %v4384_v3 = vsel %vm526_vm0, %v8202_v38, 0.0  ;;  %v4108_v37 = vmul.f32 %v4107_v35, %v8191_v63  ;;  %vm4003_vm8 = vmor %vm4001_vm7, %vm4002_vm6  ;;  %v4008_v21 = vor.u32 1.1754944e-38, %v4007_v48  ;;  %v4059_v53 = vmul.f32 %v4058_v34, %v8162_v5 }
 0x937   : > { %v3998_v2 = vsub.f32 1.0, %v3997_v47  ;;  %4385 = vadd.xlane.f32.xlu1 %v4384_v3  ;;  %v4072_v60 = vmul.f32 %v4071_v16, %v8162_v5  ;;  %v4098_v14 = vadd.f32 0.0036580483, %v4097_v61  ;;  %v3985_v25 = vmul.f32 %v3984_v17, %v8105_v41 }
 0x938   : > { %v4109_v46 = vadd.f32 0.014752088, %v4108_v37  ;;  %v4024_v45 = vadd.f32 1.1283791, %v4023_v4  ;;  %v4045_v50 = vand.u32 2147483647, %v8195_v18  ;;  %vm4041_vm12 = vweird.f32 %v8195_v18 }
 0x939   : > { %v3999_v22 = vmul.f32 %v5532_v15, %v3998_v2  ;;  %v4073_v58 = vadd.f32 0.4994258, %v4072_v60  ;;  %v4047_v62 = vand.u32 2147483648, %v8195_v18  ;;  %v4099_v48 = vmul.f32 %v4098_v14, %v8191_v63 }
 0x93a   : > { %v5534_v9 = vpop.eup %5533  ;;  %v4110_v44 = vmul.f32 %v4109_v46, %v8191_v63  ;;  %v4025_v3 = vmul.f32 %v4024_v45, %v8129_v6  ;;  %vm4046_vm14 = vcmp.eq.f32.partialorder %v4045_v50, 8.507059e+37 }
 0x93b   : > { %v4000_v32 = vadd.f32 %v5532_v15, %v3999_v22  ;;  %v4037_v1 = vmul.f32 %v5534_v9, %v8195_v18  ;;  %v4074_v24 = vmul.f32 %v4073_v58, %v8162_v5  ;;  %vm4042_vm11 = vweird.f32 %v5534_v9 }
 0x93c   : > { %v4111_v2 = vadd.f32 0.112945676, %v4110_v44  ;;  %vm4043_vm13 = vmor %vm4041_vm12, %vm4042_vm11  ;;  %v4048_v22 = vor.u32 1.1754944e-38, %v4047_v62  ;;  %v3551_v44 = vmul.f32 0.5, %v8101_v27 }
 0x93d   : > { %v4004_v57 = vsel %vm4003_vm8, %v5532_v15, %v4000_v32  ;;  %v4038_v47 = vsub.f32 1.0, %v4037_v1  ;;  %v4060_v15 = vadd.f32 0.05243302, %v4059_v53  ;;  %v4075_v35 = vadd.f32 1.0, %v4074_v24 }
 0x93e   : > { %v4009_v55 = vsel %vm4006_vm9, %v4008_v21, %v4004_v57  ;;  %v4112_v34 = vmul.f32 %v4111_v2, %v8191_v63  ;;  %v4100_v32 = vadd.f32 0.05243302, %v4099_v48 }
 0x93f   : > { %v4010_v31 = vmul.f32 %v4009_v55, %v3985_v25  ;;  %v4039_v26 = vmul.f32 %v5534_v9, %v4038_v47  ;;  %5535 = vrcp.f32 %v4075_v35  ;;  %v4061_v37 = vmul.f32 %v4060_v15, %v8162_v5 }
 0x940   : > { %v4113_v17 = vadd.f32 0.4994258, %v4112_v34  ;;  %v4101_v14 = vmul.f32 %v4100_v32, %v8191_v63  ;;  %v3552_v25 = vmul.f32 0.5, %v8119_v54  ;;  %v4087_v2 = vand.u32 2147483648, %v4075_v35 }
 0x941   : > { %v4040_v41 = vadd.f32 %v5534_v9, %v4039_v26  ;;  %v5014_v16 = vclamps-f32 %v4010_v31, 1.0  ;;  %v4062_v53 = vadd.f32 0.18741608, %v4061_v37  ;;  %v4085_v48 = vand.u32 2147483647, %v4075_v35 }
 0x942   : > { %v4114_v46 = vmul.f32 %v4113_v17, %v8191_v63  ;;  %v4102_v31 = vadd.f32 0.18741608, %v4101_v14  ;;  %vm4081_vm1 = vweird.f32 %v4075_v35 }
 0x943   : > { %v4044_v61 = vsel %vm4043_vm13, %v5534_v9, %v4040_v41  ;;  %v4223_v18 = vadd.f32 1.0, %v5014_v16  ;;  %v4063_v62 = vmul.f32 %v4062_v53, %v8162_v5  ;;  %vm4086_vm3 = vcmp.eq.f32.partialorder %v4085_v48, 8.507059e+37 }
 0x944   : > { %v4049_v4 = vsel %vm4046_vm14, %v4048_v22, %v4044_v61  ;;  %v4115_v57 = vadd.f32 1.0, %v4114_v46  ;;  %v4088_v22 = vor.u32 1.1754944e-38, %v4087_v2  ;;  %v4103_v5 = vmul.f32 %v4102_v31, %v8191_v63 }
 0x945   : > { %v4050_v60 = vmul.f32 %v4049_v4, %v4025_v3  ;;  %v5536_v58 = vpop.eup %5535  ;;  %v4239_v47 = vmul.f32 %v4223_v18, %v3551_v44  ;;  %v4064_v54 = vadd.f32 1.1283791, %v4063_v62 }
 0x946   : > { %v4077_v45 = vmul.f32 %v5536_v58, %v4075_v35  ;;  %5537 = vrcp.f32 %v4115_v57  ;;  %vm4082_vm15 = vweird.f32 %v5536_v58  ;;  %v4127_v35 = vand.u32 2147483648, %v4115_v57 }
 0x947   : > { %v5015_v6 = vclamps-f32 %v4050_v60, 1.0  ;;  %vm4083_vm2 = vmor %vm4081_vm1, %vm4082_vm15  ;;  %v4065_v4 = vmul.f32 %v4064_v54, %v8153_v52  ;;  %v4104_v60 = vadd.f32 1.1283791, %v4103_v5  ;;  %v4125_v18 = vand.u32 2147483647, %v4115_v57 }
 0x948   : > { %v4344_v21 = vpop.f32.mrf.mxu2  ;;  %v4078_v24 = vsub.f32 1.0, %v4077_v45  ;;  %vm4121_vm5 = vweird.f32 %v4115_v57  ;;  %v4128_v53 = vor.u32 1.1754944e-38, %v4127_v35 }
 0x949   : > { %v8228_v1 = vadd.f32 %v8172_v29, %v4344_v21  ;;  %v4224_v55 = vadd.f32 1.0, %v5015_v6  ;;  %v4105_v63 = vmul.f32 %v4104_v60, %v8181_v59  ;;  %vm4126_vm7 = vcmp.eq.f32.partialorder %v4125_v18, 8.507059e+37 }
 0x94a   : > { %v4079_v15 = vmul.f32 %v5536_v58, %v4078_v24  ;;  %v3554_v59 = vmul.f32 0.5, %v8165_v7 }
 0x94b   : > { %v4387_v9 = vsel %vm526_vm0, %v8228_v1, 0.0  ;;  %v4240_v50 = vmul.f32 %v4224_v55, %v3552_v25 }
 0x94c   : > { %4388 = vadd.xlane.f32.xlu0 %v4387_v9  ;;  %v4080_v41 = vadd.f32 %v5536_v58, %v4079_v15  ;;  %v5538_v3 = vpop.eup %5537 }
 0x94d   : > { %v4250_v26 = vpack.c.bf16 %v4240_v50, %v4239_v47  ;;  %v4117_v37 = vmul.f32 %v5538_v3, %v4115_v57  ;;  %vm4122_vm4 = vweird.f32 %v5538_v3  ;;  %v3553_v57 = vmul.f32 0.5, %v8146_v49 }
 0x94e   : > { %v4084_v61 = vsel %vm4083_vm2, %v5536_v58, %v4080_v41  ;;  %vm4123_vm6 = vmor %vm4121_vm5, %vm4122_vm4 }
 0x94f   : > { %5049 = vmatmul.msk.bf16.gmra.mxu2 %vm4305_vm10, %v4250_v26  ;;  %v4089_v17 = vsel %vm4086_vm3, %v4088_v22, %v4084_v61  ;;  %v4118_v32 = vsub.f32 1.0, %v4117_v37 }
 0x950   : > { %v4346_v34 = vpop.f32.mrf.mxu2  ;;  %v4090_v46 = vmul.f32 %v4089_v17, %v4065_v4 }
 0x951   : > { %v8237_v27 = vadd.f32 %v8172_v29, %v4346_v34  ;;  %v4119_v21 = vmul.f32 %v5538_v3, %v4118_v32 }
 0x952   : > { %v5016_v14 = vclamps-f32 %v4090_v46, 1.0 }
 0x953   : > { %v4390_v16 = vsel %vm526_vm0, %v8237_v27, 0.0  ;;  %v4120_v6 = vadd.f32 %v5538_v3, %v4119_v21 }
 0x954   : > { %4391 = vadd.xlane.f32.xlu2 %v4390_v16  ;;  %v4225_v45 = vadd.f32 1.0, %v5016_v14 }
 0x955   : > { %v4124_v9 = vsel %vm4123_vm6, %v5538_v3, %v4120_v6 }
 0x956   : > { %v4129_v52 = vsel %vm4126_vm7, %v4128_v53, %v4124_v9  ;;  %v4241_v24 = vmul.f32 %v4225_v45, %v3553_v57 }
 0x957   : > { %v4130_v25 = vmul.f32 %v4129_v52, %v4105_v63 }
 0x958   : > { %v4349_v58 = vpop.f32.mrf.mxu2 }
 0x959   : > { %v8246_v44 = vadd.f32 %v8172_v29, %v4349_v58  ;;  %v5017_v47 = vclamps-f32 %v4130_v25, 1.0 }
 0x95b   : > { %v4393_v55 = vsel %vm526_vm0, %v8246_v44, 0.0  ;;  %v4226_v50 = vadd.f32 1.0, %v5017_v47 }
 0x95c   : > { %4394 = vadd.xlane.f32.xlu1 %v4393_v55 }
 0x95d   : > { %v4242_v2 = vmul.f32 %v4226_v50, %v3554_v59 }
 0x95f   : > { %v4251_v26 = vpack.c.bf16 %v4242_v2, %v4241_v24 }
 0x960   : > { %v4351_v62 = vpop.f32.mrf.mxu2 }
 0x961   : > { %v8253_v31 = vadd.f32 %v8172_v29, %v4351_v62  ;;  %5050 = vmatmul.msk.bf16.gmra.mxu2 %vm4305_vm10, %v4251_v26 }
 0x963   : > { %v4396_v15 = vsel %vm526_vm0, %v8253_v31, 0.0 }
 0x964   : > { %4397 = vadd.xlane.f32.xlu0 %v4396_v15 }
 0x96e   : > { %v3536_v48 = vpop.f32.mrf.mxu1 }
 0x96f   : > { %v8259_v34 = vadd.f32 %v8098_v42, %v3536_v48 }
 0x971   : > { %v8262_v49 = vmul.f32 0.70710677, %v8259_v34 }
 0x973   : > { %v4133_v7 = vmul.f32 %v8262_v49, %v8262_v49 }
 0x975   : > { %v4134_v54 = vmin.f32 %v4133_v7, 16.0 }
 0x976   : > { %v3538_v41 = vpop.f32.mrf.mxu1 }
 0x977   : > { %v4135_v3 = vmul.f32 2.1237322e-06, %v4134_v54  ;;  %v4146_v22 = vmul.f32 3.8918573e-05, %v4134_v54  ;;  %v8267_v5 = vadd.f32 %v8098_v42, %v3538_v41 }
 0x979   : > { %v4136_v16 = vadd.f32 0.00028619796, %v4135_v3  ;;  %v4147_v61 = vadd.f32 0.001143296, %v4146_v22  ;;  %v8270_v37 = vmul.f32 0.70710677, %v8267_v5 }
 0x97b   : > { %v4148_v17 = vmul.f32 %v4147_v61, %v4134_v54  ;;  %v4173_v4 = vmul.f32 %v8270_v37, %v8270_v37  ;;  %v4137_v32 = vmul.f32 %v4136_v16, %v4134_v54 }
 0x97d   : > { %v4149_v60 = vadd.f32 0.014752088, %v4148_v17  ;;  %v4174_v35 = vmin.f32 %v4173_v4, 16.0  ;;  %v4138_v6 = vadd.f32 0.0036580483, %v4137_v32 }
 0x97f   : > { %v4150_v46 = vmul.f32 %v4149_v60, %v4134_v54  ;;  %v4175_v21 = vmul.f32 2.1237322e-06, %v4174_v35  ;;  %v4186_v18 = vmul.f32 3.8918573e-05, %v4174_v35  ;;  %v4139_v52 = vmul.f32 %v4138_v6, %v4134_v54 }
 0x981   : > { %v4151_v63 = vadd.f32 0.112945676, %v4150_v46  ;;  %v4176_v53 = vadd.f32 0.00028619796, %v4175_v21  ;;  %v4187_v42 = vadd.f32 0.001143296, %v4186_v18 }
 0x982   : > { %v4140_v59 = vadd.f32 0.05243302, %v4139_v52 }
 0x983   : > { %v4152_v58 = vmul.f32 %v4151_v63, %v4134_v54  ;;  %v4177_v14 = vmul.f32 %v4176_v53, %v4174_v35  ;;  %v4188_v9 = vmul.f32 %v4187_v42, %v4174_v35 }
 0x984   : > { %v4141_v26 = vmul.f32 %v4140_v59, %v4134_v54 }
 0x985   : > { %v4153_v25 = vadd.f32 0.4994258, %v4152_v58  ;;  %v4178_v55 = vadd.f32 0.0036580483, %v4177_v14  ;;  %v4189_v45 = vadd.f32 0.014752088, %v4188_v9 }
 0x986   : > { %v4142_v3 = vadd.f32 0.18741608, %v4141_v26 }
 0x987   : > { %v4154_v47 = vmul.f32 %v4153_v25, %v4134_v54  ;;  %v4190_v57 = vmul.f32 %v4189_v45, %v4174_v35  ;;  %v4179_v62 = vmul.f32 %v4178_v55, %v4174_v35 }
 0x988   : > { %v4143_v4 = vmul.f32 %v4142_v3, %v4134_v54  ;;  %v3556_v3 = vmul.f32 0.5, %v8267_v5 }
 0x989   : > { %v4155_v50 = vadd.f32 1.0, %v4154_v47  ;;  %v4191_v24 = vadd.f32 0.112945676, %v4190_v57  ;;  %v4180_v15 = vadd.f32 0.05243302, %v4179_v62 }
 0x98a   : > { %v4144_v6 = vadd.f32 1.1283791, %v4143_v4 }
 0x98b   : > { %5539 = vrcp.f32 %v4155_v50  ;;  %v4192_v2 = vmul.f32 %v4191_v24, %v4174_v35  ;;  %v4181_v16 = vmul.f32 %v4180_v15, %v4174_v35  ;;  %v4167_v60 = vand.u32 2147483648, %v4155_v50 }
 0x98c   : > { %v4165_v21 = vand.u32 2147483647, %v4155_v50  ;;  %vm4161_vm9 = vweird.f32 %v4155_v50  ;;  %v4145_v52 = vmul.f32 %v4144_v6, %v8262_v49 }
 0x98d   : > { %v4193_v48 = vadd.f32 0.4994258, %v4192_v2  ;;  %v4182_v46 = vadd.f32 0.18741608, %v4181_v16  ;;  %v4168_v42 = vor.u32 1.1754944e-38, %v4167_v60 }
 0x98e   : > { %vm4166_vm12 = vcmp.eq.f32.partialorder %v4165_v21, 8.507059e+37 }
 0x98f   : > { %v4194_v7 = vmul.f32 %v4193_v48, %v4174_v35  ;;  %v4183_v58 = vmul.f32 %v4182_v46, %v4174_v35 }
 0x991   : > { %v5540_v41 = vpop.eup %5539  ;;  %v4195_v61 = vadd.f32 1.0, %v4194_v7  ;;  %v4184_v54 = vadd.f32 1.1283791, %v4183_v58 }
 0x992   : > { %v4157_v22 = vmul.f32 %v5540_v41, %v4155_v50  ;;  %vm4162_vm8 = vweird.f32 %v5540_v41 }
 0x993   : > { %5541 = vrcp.f32 %v4195_v61  ;;  %vm4163_vm11 = vmor %vm4161_vm9, %vm4162_vm8  ;;  %v4207_v55 = vand.u32 2147483648, %v4195_v61  ;;  %v4205_v57 = vand.u32 2147483647, %v4195_v61  ;;  %vm4201_vm14 = vweird.f32 %v4195_v61 }
 0x994   : > { %v4158_v17 = vsub.f32 1.0, %v4157_v22  ;;  %v4185_v24 = vmul.f32 %v4184_v54, %v8270_v37 }
 0x995   : > { %v4208_v50 = vor.u32 1.1754944e-38, %v4207_v55  ;;  %vm4206_vm1 = vcmp.eq.f32.partialorder %v4205_v57, 8.507059e+37 }
 0x996   : > { %v4159_v32 = vmul.f32 %v5540_v41, %v4158_v17 }
 0x998   : > { %v4160_v18 = vadd.f32 %v5540_v41, %v4159_v32 }
 0x999   : > { %v5542_v63 = vpop.eup %5541 }
 0x99a   : > { %v4164_v53 = vsel %vm4163_vm11, %v5540_v41, %v4160_v18  ;;  %v4197_v14 = vmul.f32 %v5542_v63, %v4195_v61  ;;  %vm4202_vm13 = vweird.f32 %v5542_v63  ;;  %v3555_v41 = vmul.f32 0.5, %v8259_v34 }
 0x99b   : > { %v4169_v9 = vsel %vm4166_vm12, %v4168_v42, %v4164_v53  ;;  %vm4203_vm15 = vmor %vm4201_vm14, %vm4202_vm13 }
 0x99c   : > { %v4198_v25 = vsub.f32 1.0, %v4197_v14  ;;  %v4170_v45 = vmul.f32 %v4169_v9, %v4145_v52 }
 0x99e   : > { %v4199_v47 = vmul.f32 %v5542_v63, %v4198_v25  ;;  %v5018_v62 = vclamps-f32 %v4170_v45, 1.0 }
 0x9a0   : > { %v4200_v59 = vadd.f32 %v5542_v63, %v4199_v47  ;;  %v4227_v15 = vadd.f32 1.0, %v5018_v62 }
 0x9a2   : > { %v4204_v35 = vsel %vm4203_vm15, %v5542_v63, %v4200_v59  ;;  %v4243_v61 = vmul.f32 %v4227_v15, %v3555_v41  ;;  %v4383_v55 = vpop.xlane.xlu2 %4382 }
 0x9a3   : > { %v4209_v2 = vsel %vm4206_vm1, %v4208_v50, %v4204_v35  ;;  %v4429_v45 = vmul.f32 %v4383_v55, %v7433_v20 }
 0x9a4   : > { %v4210_v26 = vmul.f32 %v4209_v2, %v4185_v24 }
 0x9a5   : > { %v8313_v59 = vsub.f32 %v8184_v19, %v4429_v45 }
 0x9a6   : > { %v5019_v49 = vclamps-f32 %v4210_v26, 1.0  ;;  %v4354_v48 = vpop.f32.mrf.mxu2 }
 0x9a7   : > { %v4355_v7 = vadd.f32 %v8172_v29, %v4354_v48  ;;  %v4461_v35 = vmul.f32 %v8313_v59, %v8313_v59 }
 0x9a8   : > { %v4228_v22 = vadd.f32 1.0, %v5019_v49 }
 0x9a9   : > { %v4399_v16 = vsel %vm526_vm0, %v4355_v7, 0.0  ;;  %v4477_v26 = vsel %vm526_vm0, %v4461_v35, 0.0 }
 0x9aa   : > { %v4244_v17 = vmul.f32 %v4228_v22, %v3556_v3  ;;  %4400 = vadd.xlane.f32.xlu2 %v4399_v16  ;;  %v4386_v22 = vpop.xlane.xlu1 %4385 }
 0x9ab   : > { %v4430_v16 = vmul.f32 %v4386_v22, %v7433_v20 }
 0x9ac   : > { %v4252_v37 = vpack.c.bf16 %v4244_v17, %v4243_v61 }
 0x9ae   : > { %v4356_v4 = vpop.f32.mrf.mxu2  ;;  %5051 = vmatmul.msk.bf16.gmra.mxu2 %vm4305_vm10, %v4252_v37  ;;  %v8338_v37 = vsub.f32 %v8202_v38, %v4430_v16 }
 0x9af   : > { %v8282_v32 = vadd.f32 %v8172_v29, %v4356_v4 }
 0x9b1   : > { %v4402_v60 = vsel %vm526_vm0, %v8282_v32, 0.0 }
 0x9b2   : > { %4403 = vadd.xlane.f32.xlu1 %v4402_v60 }
 0x9b6   : > { %v4359_v34 = vpop.f32.mrf.mxu2 }
 0x9b7   : > { %v8287_v5 = vadd.f32 %v8172_v29, %v4359_v34 }
 0x9b9   : > { %v4405_v46 = vsel %vm526_vm0, %v8287_v5, 0.0 }
 0x9ba   : > { %4406 = vadd.xlane.f32.xlu0 %v4405_v46 }
 0x9be   : > { %v4361_v21 = vpop.f32.mrf.mxu2 }
 0x9bf   : > { %v4362_v18 = vadd.f32 %v8172_v29, %v4361_v21  ;;  %v4389_v4 = vpop.xlane.xlu0 %4388  ;;  %v4462_v21 = vmul.f32 %v8338_v37, %v8338_v37 }
 0x9c0   : > { %v4431_v34 = vmul.f32 %v4389_v4, %v7433_v20 }
 0x9c1   : > { %v4408_v6 = vsel %vm526_vm0, %v4362_v18, 0.0 }
 0x9c2   : > { %4409 = vadd.xlane.f32.xlu2 %v4408_v6  ;;  %v8350_v38 = vsub.f32 %v8228_v1, %v4431_v34 }
 0x9c4   : > { %v4463_v1 = vmul.f32 %v8350_v38, %v8350_v38 }
 0x9c7   : > { %v4392_v62 = vpop.xlane.xlu2 %4391 }
 0x9c8   : > { %v4432_v24 = vmul.f32 %v4392_v62, %v7433_v20 }
 0x9ca   : > { %v8321_v2 = vsub.f32 %v8237_v27, %v4432_v24 }
 0x9cc   : > { %v4464_v19 = vmul.f32 %v8321_v2, %v8321_v2 }
 0x9ce   : > { %v4486_v15 = vsel %vm526_vm0, %v4464_v19, 0.0 }
 0x9cf   : > { %v4395_v60 = vpop.xlane.xlu1 %4394 }
 0x9d0   : > { %v4433_v46 = vmul.f32 %v4395_v60, %v7433_v20 }
 0x9d2   : > { %v4364_v63 = vpop.f32.mrf.mxu2 }
 0x9d3   : > { %v8294_v53 = vadd.f32 %v8172_v29, %v4364_v63 }
 0x9d5   : > { %v4411_v42 = vsel %vm526_vm0, %v8294_v53, 0.0 }
 0x9d6   : > { %4412 = vadd.xlane.f32.xlu1 %v4411_v42 }
 0x9d7   : > { %v4398_v55 = vpop.xlane.xlu0 %4397 }
 0x9da   : > { %v4366_v58 = vpop.f32.mrf.mxu2 }
 0x9db   : > { %v8299_v14 = vadd.f32 %v8172_v29, %v4366_v58  ;;  %v8353_v58 = vsub.f32 %v8246_v44, %v4433_v46 }
 0x9dd   : > { %v4414_v9 = vsel %vm526_vm0, %v8299_v14, 0.0  ;;  %v4465_v62 = vmul.f32 %v8353_v58, %v8353_v58 }
 0x9de   : > { %4415 = vadd.xlane.f32.xlu0 %v4414_v9 }
 0x9df   : > { %v4489_v19 = vsel %vm526_vm0, %v4465_v62, 0.0 }
 0x9e4   : > { %v4369_v52 = vpop.f32.mrf.mxu2 }
 0x9e5   : > { %v8304_v25 = vadd.f32 %v8172_v29, %v4369_v52 }
 0x9e7   : > { %v4417_v54 = vsel %vm526_vm0, %v8304_v25, 0.0 }
 0x9e8   : > { %4418 = vadd.xlane.f32.xlu2 %v4417_v54  ;;  %v4480_v54 = vsel %vm526_vm0, %v4462_v21, 0.0 }
 0x9ec   : > { %v4371_v47 = vpop.f32.mrf.mxu2 }
 0x9ed   : > { %v8310_v57 = vadd.f32 %v8172_v29, %v4371_v47  ;;  %v4434_v47 = vmul.f32 %v4398_v55, %v7433_v20 }
 0x9ef   : > { %v4420_v50 = vsel %vm526_vm0, %v8310_v57, 0.0  ;;  %v8371_v35 = vsub.f32 %v8253_v31, %v4434_v47 }
 0x9f0   : > { %4421 = vadd.xlane.f32.xlu1 %v4420_v50 }
 0x9f8   : > { %4478 = vadd.xlane.f32.xlu1 %v4477_v26  ;;  %v4483_v26 = vsel %vm526_vm0, %v4463_v1, 0.0 }
 0xa00   : > { %4487 = vadd.xlane.f32.xlu1 %v4486_v15 }
 0xa1d   : > { %v4401_v49 = vpop.xlane.xlu2 %4400 }
 0xa1e   : > { %v4435_v48 = vmul.f32 %v4401_v49, %v7433_v20 }
 0xa20   : > { %v8328_v41 = vsub.f32 %v4355_v7, %v4435_v48  ;;  %v4466_v48 = vmul.f32 %v8371_v35, %v8371_v35 }
 0xa22   : > { %v4467_v3 = vmul.f32 %v8328_v41, %v8328_v41 }
 0xa24   : > { %v4495_v27 = vsel %vm526_vm0, %v4467_v3, 0.0 }
 0xa25   : > { %4496 = vadd.xlane.f32.xlu1 %v4495_v27  ;;  %v4404_v45 = vpop.xlane.xlu1 %4403 }
 0xa26   : > { %v4436_v44 = vmul.f32 %v4404_v45, %v7433_v20 }
 0xa2d   : > { %v4407_v15 = vpop.xlane.xlu0 %4406 }
 0xa2e   : > { %v4437_v49 = vmul.f32 %v4407_v15, %v7433_v20 }
 0xa30   : > { %v8384_v31 = vsub.f32 %v8287_v5, %v4437_v49 }
 0xa31   : > { %v4374_v61 = vpop.f32.mrf.mxu2 }
 0xa32   : > { %v8335_v17 = vadd.f32 %v8172_v29, %v4374_v61  ;;  %v4469_v16 = vmul.f32 %v8384_v31, %v8384_v31 }
 0xa34   : > { %v4423_v7 = vsel %vm526_vm0, %v8335_v17, 0.0 }
 0xa35   : > { %4424 = vadd.xlane.f32.xlu0 %v4423_v7  ;;  %v4410_v42 = vpop.xlane.xlu2 %4409  ;;  %v4501_v7 = vsel %vm526_vm0, %v4469_v16, 0.0  ;;  %v8424_v16 = vld [vmem:[%s8594_s12] ss:$0 sm:$0xff] }
 0xa36   : > { %v4438_v9 = vmul.f32 %v4410_v42, %v7433_v20 }
 0xa39   : > { %v4376_v6 = vpop.f32.mrf.mxu2 }
 0xa3a   : > { %v8347_v63 = vadd.f32 %v8172_v29, %v4376_v6  ;;  %v8359_v29 = vsub.f32 %v4362_v18, %v4438_v9  ;;  %v8374_v18 = vsub.f32 %v8282_v32, %v4436_v44  ;;  %v4492_v32 = vsel %vm526_vm0, %v4466_v48, 0.0 }
 0xa3c   : > { %v4426_v52 = vsel %vm526_vm0, %v8347_v63, 0.0  ;;  %v4470_v50 = vmul.f32 %v8359_v29, %v8359_v29  ;;  %v4468_v3 = vmul.f32 %v8374_v18, %v8374_v18 }
 0xa3d   : > { %4427 = vadd.xlane.f32.xlu2 %v4426_v52  ;;  %4481 = vadd.xlane.f32.xlu0 %v4480_v54 }
 0xa3e   : > { %v4504_v24 = vsel %vm526_vm0, %v4470_v50, 0.0  ;;  %v4498_v27 = vsel %vm526_vm0, %v4468_v3, 0.0 }
 0xa3f   : > { %4505 = vadd.xlane.f32.xlu1 %v4504_v24 }
 0xa45   : > { %4484 = vadd.xlane.f32.xlu2 %v4483_v26  ;;  %4490 = vadd.xlane.f32.xlu0 %v4489_v19 }
 0xa49   : > { %v4413_v22 = vpop.xlane.xlu1 %4412 }
 0xa4a   : > { %v4439_v61 = vmul.f32 %v4413_v22, %v7433_v20 }
 0xa4c   : > { %v8392_v4 = vsub.f32 %v8294_v53, %v4439_v61 }
 0xa4d   : > { %4493 = vadd.xlane.f32.xlu2 %v4492_v32  ;;  %4499 = vadd.xlane.f32.xlu0 %v4498_v27 }
 0xa4e   : > { %v4471_v5 = vmul.f32 %v8392_v4, %v8392_v4 }
 0xa50   : > { %v4507_v60 = vsel %vm526_vm0, %v4471_v5, 0.0  ;;  %v8429_v5 = vld [vmem:[%s8595_s13] ss:$0 sm:$0xff] }
 0xa51   : > { %v4416_v34 = vpop.xlane.xlu0 %4415 }
 0xa52   : > { %v4440_v46 = vmul.f32 %v4416_v34, %v7433_v20 }
 0xa54   : > { %v8400_v21 = vsub.f32 %v8299_v14, %v4440_v46 }
 0xa55   : > { %4502 = vadd.xlane.f32.xlu2 %v4501_v7  ;;  %4508 = vadd.xlane.f32.xlu0 %v4507_v60 }
 0xa56   : > { %v4472_v6 = vmul.f32 %v8400_v21, %v8400_v21 }
 0xa58   : > { %v4510_v53 = vsel %vm526_vm0, %v4472_v6, 0.0 }
 0xa5b   : > { %v4419_v42 = vpop.xlane.xlu2 %4418 }
 0xa5c   : > { %v4441_v9 = vmul.f32 %v4419_v42, %v7433_v20 }
 0xa5d   : > { %4511 = vadd.xlane.f32.xlu2 %v4510_v53 }
 0xa5e   : > { %v8407_v52 = vsub.f32 %v8304_v25, %v4441_v9 }
 0xa60   : > { %v4473_v54 = vmul.f32 %v8407_v52, %v8407_v52 }
 0xa62   : > { %v4513_v55 = vsel %vm526_vm0, %v4473_v54, 0.0 }
 0xa63   : > { %4514 = vadd.xlane.f32.xlu1 %v4513_v55  ;;  %v4422_v14 = vpop.xlane.xlu1 %4421 }
 0xa64   : > { %v4442_v45 = vmul.f32 %v4422_v14, %v7433_v20 }
 0xa66   : > { %v8414_v1 = vsub.f32 %v8310_v57, %v4442_v45 }
 0xa68   : > { %v4474_v47 = vmul.f32 %v8414_v1, %v8414_v1 }
 0xa6a   : > { %v4516_v44 = vsel %vm526_vm0, %v4474_v47, 0.0 }
 0xa6b   : > { %4517 = vadd.xlane.f32.xlu0 %v4516_v44  ;;  %v4479_v25 = vpop.xlane.xlu1 %4478 }
 0xa6c   : > { %v4525_v50 = vmul.f32 %v4479_v25, %v7433_v20 }
 0xa6e   : > { %v4541_v62 = vadd.f32 1e-05, %v4525_v50 }
 0xa70   : > { %5543 = vrsqrt.f32 %v4541_v62  ;;  %vm4563_vm2 = vweird.f32 %v4541_v62 }
 0xa73   : > { %v4488_v24 = vpop.xlane.xlu1 %4487 }
 0xa74   : > { %v4528_v26 = vmul.f32 %v4488_v24, %v7433_v20 }
 0xa76   : > { %v5544_v19 = vpop.eup %5543  ;;  %v4544_v15 = vadd.f32 1e-05, %v4528_v26 }
 0xa77   : > { %v4558_v49 = vmul.f32 %v5544_v19, %v4541_v62  ;;  %vm4564_vm10 = vweird.f32 %v5544_v19 }
 0xa78   : > { %5545 = vrsqrt.f32 %v4544_v15  ;;  %vm4565_vm3 = vmor %vm4563_vm2, %vm4564_vm10  ;;  %vm4593_vm5 = vweird.f32 %v4544_v15 }
 0xa79   : > { %v4559_v57 = vmul.f32 %v5544_v19, %v4558_v49 }
 0xa7b   : > { %v4560_v48 = vmul.f32 0.5, %v4559_v57 }
 0xa7d   : > { %v4561_v3 = vsub.f32 1.5, %v4560_v48 }
 0xa7e   : > { %v5546_v32 = vpop.eup %5545 }
 0xa7f   : > { %v4562_v27 = vmul.f32 %v5544_v19, %v4561_v3  ;;  %v4588_v22 = vmul.f32 %v5546_v32, %v4544_v15  ;;  %vm4594_vm4 = vweird.f32 %v5546_v32 }
 0xa80   : > { %vm4595_vm6 = vmor %vm4593_vm5, %vm4594_vm4 }
 0xa81   : > { %v4566_v61 = vsel %vm4565_vm3, %v5544_v19, %v4562_v27  ;;  %v4589_v7 = vmul.f32 %v5546_v32, %v4588_v22 }
 0xa82   : > { %v4717_v60 = vmul.f32 %v4566_v61, %v8313_v59 }
 0xa83   : > { %v4590_v34 = vmul.f32 0.5, %v4589_v7 }
 0xa84   : > { %v4736_v46 = vmul.f32 %v8424_v16, %v4717_v60 }
 0xa85   : > { %v4591_v6 = vsub.f32 1.5, %v4590_v34 }
 0xa86   : > { %v4755_v53 = vadd.f32 %v8429_v5, %v4736_v46 }
 0xa87   : > { %v4592_v42 = vmul.f32 %v5546_v32, %v4591_v6 }
 0xa88   : > { %v4771_v9 = vadd.f32 %v4755_v53, %v7582_v30 }
 0xa89   : > { %v4596_v59 = vsel %vm4595_vm6, %v5546_v32, %v4592_v42 }
 0xa8a   : > { %4787 = vst.msk [vmem:[%s8439_s15] sm:$0xff] %vm526_vm0, %v4771_v9  ;;  %v4720_v54 = vmul.f32 %v4596_v59, %v8321_v2 }
 0xa8c   : > { %v4739_v55 = vmul.f32 %v8424_v16, %v4720_v54 }
 0xa8e   : > { %v4758_v45 = vadd.f32 %v8429_v5, %v4739_v55 }
 0xa90   : > { %v4774_v44 = vadd.f32 %v4758_v45, %v7617_v39 }
 0xa92   : > { %4790 = vst.msk [vmem:[%s8439_s15 + $0x18] sm:$0xff] %vm526_vm0, %v4774_v44 }
 0xa98   : > { %v4497_v14 = vpop.xlane.xlu1 %4496 }
 0xa99   : > { %v4531_v47 = vmul.f32 %v4497_v14, %v7433_v20 }
 0xa9b   : > { %v4547_v25 = vadd.f32 1e-05, %v4531_v47 }
 0xa9d   : > { %5547 = vrsqrt.f32 %v4547_v25  ;;  %vm4623_vm8 = vweird.f32 %v4547_v25 }
 0xaa3   : > { %v5548_v30 = vpop.eup %5547 }
 0xaa4   : > { %v4618_v50 = vmul.f32 %v5548_v30, %v4547_v25  ;;  %vm4624_vm7 = vweird.f32 %v5548_v30 }
 0xaa5   : > { %vm4625_vm9 = vmor %vm4623_vm8, %vm4624_vm7 }
 0xaa6   : > { %v4619_v62 = vmul.f32 %v5548_v30, %v4618_v50 }
 0xaa8   : > { %v4620_v24 = vmul.f32 0.5, %v4619_v62  ;;  %v4425_v26 = vpop.xlane.xlu0 %4424 }
 0xaa9   : > { %v4443_v2 = vmul.f32 %v4425_v26, %v7433_v20 }
 0xaaa   : > { %v4621_v19 = vsub.f32 1.5, %v4620_v24 }
 0xaab   : > { %v8453_v15 = vsub.f32 %v8335_v17, %v4443_v2 }
 0xaac   : > { %v4622_v49 = vmul.f32 %v5548_v30, %v4621_v19 }
 0xaad   : > { %v4475_v39 = vmul.f32 %v8453_v15, %v8453_v15 }
 0xaae   : > { %v4626_v57 = vsel %vm4625_vm9, %v5548_v30, %v4622_v49 }
 0xaaf   : > { %v4723_v48 = vmul.f32 %v4626_v57, %v8328_v41  ;;  %v4519_v3 = vsel %vm526_vm0, %v4475_v39, 0.0 }
 0xab0   : > { %v4428_v32 = vpop.xlane.xlu2 %4427  ;;  %4520 = vadd.xlane.f32.xlu2 %v4519_v3  ;;  %v4482_v27 = vpop.xlane.xlu0 %4481 }
 0xab1   : > { %v4742_v22 = vmul.f32 %v8424_v16, %v4723_v48  ;;  %v4444_v17 = vmul.f32 %v4428_v32, %v7433_v20  ;;  %v4526_v61 = vmul.f32 %v4482_v27, %v7433_v20 }
 0xab2   : > { %v4506_v6 = vpop.xlane.xlu1 %4505 }
 0xab3   : > { %v4761_v7 = vadd.f32 %v8429_v5, %v4742_v22  ;;  %v8464_v60 = vsub.f32 %v8347_v63, %v4444_v17  ;;  %v4542_v34 = vadd.f32 1e-05, %v4526_v61  ;;  %v4534_v53 = vmul.f32 %v4506_v6, %v7433_v20 }
 0xab5   : > { %v4777_v46 = vadd.f32 %v4761_v7, %v7674_v11  ;;  %5549 = vrsqrt.f32 %v4542_v34  ;;  %v4476_v41 = vmul.f32 %v8464_v60, %v8464_v60  ;;  %v4550_v54 = vadd.f32 1e-05, %v4534_v53 }
 0xab6   : > { %vm4573_vm12 = vweird.f32 %v4542_v34 }
 0xab7   : > { %4793 = vst.msk [vmem:[%s8439_s15 + $0x30] sm:$0xff] %vm526_vm0, %v4777_v46  ;;  %v4522_v42 = vsel %vm526_vm0, %v4476_v41, 0.0  ;;  %5551 = vrsqrt.f32 %v4550_v54  ;;  %vm4653_vm15 = vweird.f32 %v4550_v54 }
 0xab8   : > { %4523 = vadd.xlane.f32.xlu1 %v4522_v42  ;;  %v4485_v9 = vpop.xlane.xlu2 %4484  ;;  %v4491_v59 = vpop.xlane.xlu0 %4490 }
 0xab9   : > { %v4527_v63 = vmul.f32 %v4485_v9, %v7433_v20  ;;  %v4529_v55 = vmul.f32 %v4491_v59, %v7433_v20 }
 0xabb   : > { %v5550_v11 = vpop.eup %5549  ;;  %v4543_v14 = vadd.f32 1e-05, %v4527_v63  ;;  %v4545_v45 = vadd.f32 1e-05, %v4529_v55 }
 0xabc   : > { %v4568_v47 = vmul.f32 %v5550_v11, %v4542_v34  ;;  %vm4574_vm11 = vweird.f32 %v5550_v11 }
 0xabd   : > { %5553 = vrsqrt.f32 %v4543_v14  ;;  %v5552_v62 = vpop.eup %5551  ;;  %vm4575_vm13 = vmor %vm4573_vm12, %vm4574_vm11  ;;  %vm4583_vm1 = vweird.f32 %v4543_v14  ;;  %vm4603_vm4 = vweird.f32 %v4545_v45 }
 0xabe   : > { %v4569_v44 = vmul.f32 %v5550_v11, %v4568_v47  ;;  %5555 = vrsqrt.f32 %v4545_v45  ;;  %v4648_v19 = vmul.f32 %v5552_v62, %v4550_v54  ;;  %vm4654_vm14 = vweird.f32 %v5552_v62 }
 0xabf   : > { %vm4655_vm2 = vmor %vm4653_vm15, %vm4654_vm14 }
 0xac0   : > { %v4570_v25 = vmul.f32 0.5, %v4569_v44  ;;  %v4494_v30 = vpop.xlane.xlu2 %4493  ;;  %v4500_v50 = vpop.xlane.xlu0 %4499  ;;  %v4649_v32 = vmul.f32 %v5552_v62, %v4648_v19 }
 0xac1   : > { %v4530_v24 = vmul.f32 %v4494_v30, %v7433_v20  ;;  %v4532_v26 = vmul.f32 %v4500_v50, %v7433_v20 }
 0xac2   : > { %v4571_v2 = vsub.f32 1.5, %v4570_v25  ;;  %v4650_v61 = vmul.f32 0.5, %v4649_v32 }
 0xac3   : > { %v5554_v49 = vpop.eup %5553  ;;  %v8477_v39 = vadd.f32 1e-05, %v4530_v24  ;;  %v8479_v57 = vadd.f32 1e-05, %v4532_v26 }
 0xac4   : > { %v5556_v48 = vpop.eup %5555  ;;  %v4572_v3 = vmul.f32 %v5550_v11, %v4571_v2  ;;  %v4578_v27 = vmul.f32 %v5554_v49, %v4543_v14  ;;  %v4651_v6 = vsub.f32 1.5, %v4650_v61  ;;  %vm4584_vm10 = vweird.f32 %v5554_v49 }
 0xac5   : > { %v4598_v22 = vmul.f32 %v5556_v48, %v4545_v45  ;;  %5557 = vrsqrt.f32 %v8477_v39  ;;  %vm4604_vm3 = vweird.f32 %v5556_v48  ;;  %vm4585_vm5 = vmor %vm4583_vm1, %vm4584_vm10  ;;  %vm4613_vm9 = vweird.f32 %v8477_v39 }
 0xac6   : > { %v4576_v17 = vsel %vm4575_vm13, %v5550_v11, %v4572_v3  ;;  %v4579_v7 = vmul.f32 %v5554_v49, %v4578_v27  ;;  %5559 = vrsqrt.f32 %v8479_v57  ;;  %v4652_v63 = vmul.f32 %v5552_v62, %v4651_v6  ;;  %vm4605_vm6 = vmor %vm4603_vm4, %vm4604_vm3 }
 0xac7   : > { %v4718_v46 = vmul.f32 %v4576_v17, %v8338_v37  ;;  %v4599_v41 = vmul.f32 %v5556_v48, %v4598_v22  ;;  %vm4633_vm12 = vweird.f32 %v8479_v57 }
 0xac8   : > { %v4580_v53 = vmul.f32 0.5, %v4579_v7  ;;  %v4503_v42 = vpop.xlane.xlu2 %4502  ;;  %v4656_v30 = vsel %vm4655_vm2, %v5552_v62, %v4652_v63  ;;  %v4509_v3 = vpop.xlane.xlu0 %4508 }
 0xac9   : > { %v4737_v34 = vmul.f32 %v8424_v16, %v4718_v46  ;;  %v4600_v9 = vmul.f32 0.5, %v4599_v41  ;;  %v4533_v59 = vmul.f32 %v4503_v42, %v7433_v20  ;;  %v4726_v26 = vmul.f32 %v4656_v30, %v8359_v29 }
 0xaca   : > { %v4581_v55 = vsub.f32 1.5, %v4580_v53  ;;  %v4535_v17 = vmul.f32 %v4509_v3, %v7433_v20 }
 0xacb   : > { %v5558_v11 = vpop.eup %5557  ;;  %v4756_v47 = vadd.f32 %v8429_v5, %v4737_v34  ;;  %v4601_v37 = vsub.f32 1.5, %v4600_v9  ;;  %v8487_v44 = vadd.f32 1e-05, %v4533_v59  ;;  %v4745_v45 = vmul.f32 %v8424_v16, %v4726_v26 }
 0xacc   : > { %v5560_v25 = vpop.eup %5559  ;;  %v4582_v50 = vmul.f32 %v5554_v49, %v4581_v55  ;;  %v4608_v54 = vmul.f32 %v5558_v11, %v8477_v39  ;;  %vm4614_vm7 = vweird.f32 %v5558_v11  ;;  %v4551_v6 = vadd.f32 1e-05, %v4535_v17 }
 0xacd   : > { %v4772_v24 = vadd.f32 %v4756_v47, %v7585_v0  ;;  %v4602_v2 = vmul.f32 %v5556_v48, %v4601_v37  ;;  %v4628_v19 = vmul.f32 %v5560_v25, %v8479_v57  ;;  %5561 = vrsqrt.f32 %v8487_v44  ;;  %vm4615_vm11 = vmor %vm4613_vm9, %vm4614_vm7 }
 0xace   : > { %v4586_v32 = vsel %vm4585_vm5, %v5554_v49, %v4582_v50  ;;  %v4609_v27 = vmul.f32 %v5558_v11, %v4608_v54  ;;  %v4764_v61 = vadd.f32 %v8429_v5, %v4745_v45  ;;  %vm4634_vm8 = vweird.f32 %v5560_v25 }
 0xacf   : > { %4788 = vst.msk [vmem:[%s8439_s15 + $0x8] sm:$0xff] %vm526_vm0, %v4772_v24  ;;  %v4719_v62 = vmul.f32 %v4586_v32, %v8350_v38  ;;  %v4606_v0 = vsel %vm4605_vm6, %v5556_v48, %v4602_v2  ;;  %v4629_v22 = vmul.f32 %v5560_v25, %v4628_v19  ;;  %5563 = vrsqrt.f32 %v4551_v6  ;;  %vm4635_vm13 = vmor %vm4633_vm12, %vm4634_vm8 }
 0xad0   : > { %v4721_v29 = vmul.f32 %v4606_v0, %v8353_v58  ;;  %v4610_v14 = vmul.f32 0.5, %v4609_v27  ;;  %v4780_v38 = vadd.f32 %v4764_v61, %v7730_v10  ;;  %v4512_v58 = vpop.xlane.xlu2 %4511  ;;  %vm4643_vm15 = vweird.f32 %v8487_v44 }
 0xad1   : > { %v4738_v49 = vmul.f32 %v8424_v16, %v4719_v62  ;;  %v4630_v7 = vmul.f32 0.5, %v4629_v22  ;;  %v4536_v37 = vmul.f32 %v4512_v58, %v7433_v20  ;;  %vm4663_vm2 = vweird.f32 %v4551_v6 }
 0xad2   : > { %v4740_v46 = vmul.f32 %v8424_v16, %v4721_v29  ;;  %v4611_v41 = vsub.f32 1.5, %v4610_v14  ;;  %4796 = vst.msk [vmem:[%s8439_s15 + $0x48] sm:$0xff] %vm526_vm0, %v4780_v38 }
 0xad3   : > { %v4757_v48 = vadd.f32 %v8429_v5, %v4738_v49  ;;  %v4631_v53 = vsub.f32 1.5, %v4630_v7  ;;  %v5562_v42 = vpop.eup %5561  ;;  %v4552_v57 = vadd.f32 1e-05, %v4536_v37 }
 0xad4   : > { %v4759_v34 = vadd.f32 %v8429_v5, %v4740_v46  ;;  %v4612_v9 = vmul.f32 %v5558_v11, %v4611_v41  ;;  %v4638_v63 = vmul.f32 %v5562_v42, %v8487_v44  ;;  %vm4644_vm14 = vweird.f32 %v5562_v42 }
 0xad5   : > { %v4773_v59 = vadd.f32 %v4757_v48, %v7614_v43  ;;  %v4632_v10 = vmul.f32 %v5560_v25, %v4631_v53  ;;  %5565 = vrsqrt.f32 %v4552_v57  ;;  %vm4645_vm1 = vmor %vm4643_vm15, %vm4644_vm14  ;;  %vm4673_vm5 = vweird.f32 %v4552_v57 }
 0xad6   : > { %v4775_v55 = vadd.f32 %v4759_v34, %v7643_v28  ;;  %v4616_v47 = vsel %vm4615_vm11, %v5558_v11, %v4612_v9  ;;  %v4639_v50 = vmul.f32 %v5562_v42, %v4638_v63  ;;  %v5564_v11 = vpop.eup %5563  ;;  %v4515_v29 = vpop.xlane.xlu1 %4514 }
 0xad7   : > { %4789 = vst.msk [vmem:[%s8439_s15 + $0x10] sm:$0xff] %vm526_vm0, %v4773_v59  ;;  %v4722_v39 = vmul.f32 %v4616_v47, %v8371_v35  ;;  %v4636_v30 = vsel %vm4635_vm13, %v5560_v25, %v4632_v10  ;;  %v4658_v35 = vmul.f32 %v5564_v11, %v4551_v6  ;;  %vm4664_vm10 = vweird.f32 %v5564_v11 }
 0xad8   : > { %4791 = vst.msk [vmem:[%s8439_s15 + $0x20] sm:$0xff] %vm526_vm0, %v4775_v55  ;;  %v4724_v43 = vmul.f32 %v4636_v30, %v8374_v18  ;;  %v4640_v28 = vmul.f32 0.5, %v4639_v50  ;;  %v4537_v14 = vmul.f32 %v4515_v29, %v7433_v20  ;;  %vm4665_vm3 = vmor %vm4663_vm2, %vm4664_vm10 }
 0xad9   : > { %v4741_v54 = vmul.f32 %v8424_v16, %v4722_v39  ;;  %v4659_v3 = vmul.f32 %v5564_v11, %v4658_v35 }
 0xada   : > { %v4743_v24 = vmul.f32 %v8424_v16, %v4724_v43  ;;  %v4641_v2 = vsub.f32 1.5, %v4640_v28  ;;  %v4553_v49 = vadd.f32 1e-05, %v4537_v14 }
 0xadb   : > { %v4760_v26 = vadd.f32 %v8429_v5, %v4741_v54  ;;  %v4660_v45 = vmul.f32 0.5, %v4659_v3  ;;  %v5566_v62 = vpop.eup %5565 }
 0xadc   : > { %v4762_v25 = vadd.f32 %v8429_v5, %v4743_v24  ;;  %v4642_v18 = vmul.f32 %v5562_v42, %v4641_v2  ;;  %5567 = vrsqrt.f32 %v4553_v49  ;;  %vm4674_vm4 = vweird.f32 %v5566_v62 }
 0xadd   : > { %v4776_v19 = vadd.f32 %v4760_v26, %v7646_v23  ;;  %v4661_v22 = vsub.f32 1.5, %v4660_v45  ;;  %v4668_v23 = vmul.f32 %v5566_v62, %v4552_v57  ;;  %vm4675_vm6 = vmor %vm4673_vm5, %vm4674_vm4  ;;  %vm4683_vm8 = vweird.f32 %v4553_v49 }
 0xade   : > { %v4778_v32 = vadd.f32 %v4762_v25, %v7677_v33  ;;  %v4646_v27 = vsel %vm4645_vm1, %v5562_v42, %v4642_v18  ;;  %v4518_v53 = vpop.xlane.xlu0 %4517 }
 0xadf   : > { %4792 = vst.msk [vmem:[%s8439_s15 + $0x28] sm:$0xff] %vm526_vm0, %v4776_v19  ;;  %v4725_v0 = vmul.f32 %v4646_v27, %v8384_v31  ;;  %v4662_v33 = vmul.f32 %v5564_v11, %v4661_v22  ;;  %v4669_v17 = vmul.f32 %v5566_v62, %v4668_v23  ;;  %v4538_v42 = vmul.f32 %v4518_v53, %v7433_v20 }
 0xae0   : > { %4794 = vst.msk [vmem:[%s8439_s15 + $0x38] sm:$0xff] %vm526_vm0, %v4778_v32 }
 0xae1   : > { %v4744_v44 = vmul.f32 %v8424_v16, %v4725_v0  ;;  %v4666_v7 = vsel %vm4665_vm3, %v5564_v11, %v4662_v33  ;;  %v4670_v46 = vmul.f32 0.5, %v4669_v17  ;;  %v4554_v59 = vadd.f32 1e-05, %v4538_v42 }
 0xae2   : > { %v4727_v41 = vmul.f32 %v4666_v7, %v8392_v4 }
 0xae3   : > { %v4763_v61 = vadd.f32 %v8429_v5, %v4744_v44  ;;  %v4671_v38 = vsub.f32 1.5, %v4670_v46  ;;  %5569 = vrsqrt.f32 %v4554_v59  ;;  %vm4693_vm12 = vweird.f32 %v4554_v59 }
 0xae4   : > { %v4746_v48 = vmul.f32 %v8424_v16, %v4727_v41 }
 0xae5   : > { %v4779_v31 = vadd.f32 %v4763_v61, %v7727_v36  ;;  %v4672_v6 = vmul.f32 %v5566_v62, %v4671_v38  ;;  %v5568_v36 = vpop.eup %5567 }
 0xae6   : > { %v4765_v58 = vadd.f32 %v8429_v5, %v4746_v48  ;;  %v4678_v10 = vmul.f32 %v5568_v36, %v4553_v49  ;;  %vm4684_vm7 = vweird.f32 %v5568_v36 }
 0xae7   : > { %4795 = vst.msk [vmem:[%s8439_s15 + $0x40] sm:$0xff] %vm526_vm0, %v4779_v31  ;;  %v4676_v34 = vsel %vm4675_vm6, %v5566_v62, %v4672_v6  ;;  %vm4685_vm9 = vmor %vm4683_vm8, %vm4684_vm7 }
 0xae8   : > { %v4781_v4 = vadd.f32 %v4765_v58, %v7816_v13  ;;  %v4728_v9 = vmul.f32 %v4676_v34, %v8400_v21  ;;  %v4679_v55 = vmul.f32 %v5568_v36, %v4678_v10 }
 0xae9   : > { %v5570_v50 = vpop.eup %5569 }
 0xaea   : > { %4797 = vst.msk [vmem:[%s8439_s15 + $0x50] sm:$0xff] %vm526_vm0, %v4781_v4  ;;  %v4747_v63 = vmul.f32 %v8424_v16, %v4728_v9  ;;  %v4680_v37 = vmul.f32 0.5, %v4679_v55  ;;  %v4688_v21 = vmul.f32 %v5570_v50, %v4554_v59  ;;  %vm4694_vm11 = vweird.f32 %v5570_v50 }
 0xaeb   : > { %vm4695_vm13 = vmor %vm4693_vm12, %vm4694_vm11 }
 0xaec   : > { %v4766_v47 = vadd.f32 %v8429_v5, %v4747_v63  ;;  %v4681_v30 = vsub.f32 1.5, %v4680_v37  ;;  %v4689_v57 = vmul.f32 %v5570_v50, %v4688_v21 }
 0xaee   : > { %v4782_v39 = vadd.f32 %v4766_v47, %v7862_v40  ;;  %v4682_v13 = vmul.f32 %v5568_v36, %v4681_v30  ;;  %v4690_v28 = vmul.f32 0.5, %v4689_v57 }
 0xaf0   : > { %4798 = vst.msk [vmem:[%s8439_s15 + $0x58] sm:$0xff] %vm526_vm0, %v4782_v39  ;;  %v4686_v43 = vsel %vm4685_vm9, %v5568_v36, %v4682_v13  ;;  %v4691_v24 = vsub.f32 1.5, %v4690_v28 }
 0xaf1   : > { %v4729_v54 = vmul.f32 %v4686_v43, %v8407_v52 }
 0xaf2   : > { %v4692_v26 = vmul.f32 %v5570_v50, %v4691_v24 }
 0xaf3   : > { %v4748_v11 = vmul.f32 %v8424_v16, %v4729_v54 }
 0xaf4   : > { %v4696_v35 = vsel %vm4695_vm13, %v5570_v50, %v4692_v26 }
 0xaf5   : > { %v4767_v40 = vadd.f32 %v8429_v5, %v4748_v11  ;;  %v4730_v25 = vmul.f32 %v4696_v35, %v8414_v1 }
 0xaf7   : > { %v4783_v2 = vadd.f32 %v4767_v40, %v7932_v12  ;;  %v4749_v52 = vmul.f32 %v8424_v16, %v4730_v25 }
 0xaf9   : > { %4799 = vst.msk [vmem:[%s8439_s15 + $0x60] sm:$0xff] %vm526_vm0, %v4783_v2  ;;  %v4768_v19 = vadd.f32 %v8429_v5, %v4749_v52 }
 0xafb   : > { %v4784_v18 = vadd.f32 %v4768_v19, %v7935_v8 }
 0xafd   : > { %4800 = vst.msk [vmem:[%s8439_s15 + $0x68] sm:$0xff] %vm526_vm0, %v4784_v18 }
 0xb23   : > { %v4521_v3 = vpop.xlane.xlu2 %4520 }
 0xb24   : > { %v4539_v32 = vmul.f32 %v4521_v3, %v7433_v20 }
 0xb26   : > { %v4555_v27 = vadd.f32 1e-05, %v4539_v32 }
 0xb28   : > { %5571 = vrsqrt.f32 %v4555_v27  ;;  %vm4703_vm15 = vweird.f32 %v4555_v27 }
 0xb2b   : > { %v4524_v12 = vpop.xlane.xlu1 %4523 }
 0xb2c   : > { %v4540_v45 = vmul.f32 %v4524_v12, %v7433_v20 }
 0xb2e   : > { %v5572_v62 = vpop.eup %5571  ;;  %v4556_v0 = vadd.f32 1e-05, %v4540_v45 }
 0xb2f   : > { %v4698_v22 = vmul.f32 %v5572_v62, %v4555_v27  ;;  %vm4704_vm14 = vweird.f32 %v5572_v62 }
 0xb30   : > { %5573 = vrsqrt.f32 %v4556_v0  ;;  %vm4705_vm1 = vmor %vm4703_vm15, %vm4704_vm14  ;;  %vm4713_vm2 = vweird.f32 %v4556_v0 }
 0xb31   : > { %v4699_v1 = vmul.f32 %v5572_v62, %v4698_v22 }
 0xb33   : > { %v4700_v29 = vmul.f32 0.5, %v4699_v1 }
 0xb35   : > { %v4701_v23 = vsub.f32 1.5, %v4700_v29 }
 0xb36   : > { %v5574_v44 = vpop.eup %5573 }
 0xb37   : > { %v4702_v8 = vmul.f32 %v5572_v62, %v4701_v23  ;;  %v4708_v14 = vmul.f32 %v5574_v44, %v4556_v0  ;;  %vm4714_vm10 = vweird.f32 %v5574_v44 }
 0xb38   : > { %vm4715_vm3 = vmor %vm4713_vm2, %vm4714_vm10 }
 0xb39   : > { %v4706_v33 = vsel %vm4705_vm1, %v5572_v62, %v4702_v8  ;;  %v4709_v17 = vmul.f32 %v5574_v44, %v4708_v14 }
 0xb3a   : > { %v4731_v61 = vmul.f32 %v4706_v33, %v8453_v15 }
 0xb3b   : > { %v4710_v20 = vmul.f32 0.5, %v4709_v17 }
 0xb3c   : > { %v4750_v49 = vmul.f32 %v8424_v16, %v4731_v61 }
 0xb3d   : > { %v4711_v7 = vsub.f32 1.5, %v4710_v20 }
 0xb3e   : > { %v4769_v46 = vadd.f32 %v8429_v5, %v4750_v49 }
 0xb3f   : > { %v4712_v31 = vmul.f32 %v5574_v44, %v4711_v7 }
 0xb40   : > { %v4785_v41 = vadd.f32 %v4769_v46, %v8021_v51 }
 0xb41   : > { %v4716_v38 = vsel %vm4715_vm3, %v5574_v44, %v4712_v31 }
 0xb42   : > { %4801 = vst.msk [vmem:[%s8439_s15 + $0x70] sm:$0xff] %vm526_vm0, %v4785_v41  ;;  %v4732_v48 = vmul.f32 %v4716_v38, %v8464_v60 }
 0xb44   : > { %v4751_v15 = vmul.f32 %v8424_v16, %v4732_v48 }
 0xb46   : > { %v4770_v6 = vadd.f32 %v8429_v5, %v4751_v15 }
 0xb48   : > { %v4786_v53 = vadd.f32 %v4770_v6, %v8024_v56 }
 0xb4a   : > { %4802 = vst.msk [vmem:[%s8439_s15 + $0x78] sm:$0xff] %vm526_vm0, %v4786_v53 }
 0xb4b PF: > { %s24_s29 = sadd.s32 1, %s5602_s29  }
 0xb4c   : > { %p21_p4 = scmp.ge.s32.totalorder %s24_s29, 6  }
 0xb4e   :  { %23 = sbr.rel (!%p21_p4) target bundleno = 1 (0x1), region = 106 }

</bundles_post_ra>
